<compile_context>
chip_gen: v7x
topology: tpu7x:2x2x1
jax: 0.10.0
libtpu: 0.0.40
codegen_flags: <defaults>
</compile_context>

<pallas_src>
import jax
import jax.numpy as jnp
import numpy as np
from jax import lax
from jax.experimental import pallas as pl
from jax.experimental.pallas import tpu as pltpu

SLOPE = 0.2


def _leaky_relu(x, slope=SLOPE):
    return jnp.where(x >= 0, x, slope * x)


def _zero_halo(pad_ref):
    """Zero only the 1-wide halo border of an (H+2, W+2, C) scratch."""
    Hp, Wp, C = pad_ref.shape
    zrow = jnp.zeros((1, Wp, C), pad_ref.dtype)
    pad_ref[0:1, :, :] = zrow
    pad_ref[Hp - 1:Hp, :, :] = zrow
    zcol = jnp.zeros((Hp, 1, C), pad_ref.dtype)
    pad_ref[:, 0:1, :] = zcol
    pad_ref[:, Wp - 1:Wp, :] = zcol


def _conv3x3(pad_ref, col_ref, w_ref, b_ref):
    """3x3 conv (padded input already in pad_ref) as a single im2col matmul.

    pad_ref: (H+2, W+2, C)  padded NHWC activations (halo = 0)
    col_ref: (H*W, 9*C)     im2col scratch
    w_ref:   (9*C, Cout)    weights, rows ordered (ky, kx, c)
    b_ref:   (1, Cout)      bias
    returns: (H*W, Cout) float32, after bias + LeakyReLU
    """
    Hp, Wp, C = pad_ref.shape
    H, W = Hp - 2, Wp - 2
    # Build the (H*W, 9*C) patch matrix once: 9 shifted slab copies.
    for ky in range(3):
        for kx in range(3):
            t = ky * 3 + kx
            col_ref[:, t * C:(t + 1) * C] = (
                pad_ref[ky:ky + H, kx:kx + W, :].reshape(H * W, C))
    # One MXU matmul with K = 9*C, f32 accumulation.
    acc = jnp.dot(col_ref[...], w_ref[...],
                  preferred_element_type=jnp.float32)
    acc = acc + b_ref[...].astype(jnp.float32)
    return _leaky_relu(acc)


def unet_conv_block_kernel(x_ref, w1_ref, b1_ref, w2_ref, b2_ref, o_ref,
                           pad1_ref, col1_ref, pad2_ref, col2_ref):
    # x_ref:  (1, H, W, Cin)  NHWC tile for one batch element
    # w1_ref: (9*Cin, Cmid)   w2_ref: (9*Cmid, Cout)
    # b1_ref: (1, Cmid)       b2_ref: (1, Cout)
    # o_ref:  (1, H, W, Cout)
    H, W = x_ref.shape[1], x_ref.shape[2]
    Cmid = w1_ref.shape[1]
    Cout = w2_ref.shape[1]

    # ---- Conv 1 + LeakyReLU ----
    _zero_halo(pad1_ref)
    pad1_ref[1:H + 1, 1:W + 1, :] = x_ref[0].astype(pad1_ref.dtype)
    act1 = _conv3x3(pad1_ref, col1_ref, w1_ref, b1_ref)      # (H*W, Cmid) f32

    # ---- Conv 2 + LeakyReLU (conv1 output written straight into pad2) ----
    _zero_halo(pad2_ref)
    pad2_ref[1:H + 1, 1:W + 1, :] = act1.reshape(H, W, Cmid).astype(
        pad2_ref.dtype)
    act2 = _conv3x3(pad2_ref, col2_ref, w2_ref, b2_ref)      # (H*W, Cout) f32

    o_ref[0] = act2.reshape(H, W, Cout).astype(o_ref.dtype)


def unet_conv_block(x, w1_oihw, b1, w2_oihw, b2, *,
                    data_format="NCHW", compute_dtype=None):
    """Fused Conv3x3 + LeakyReLU + Conv3x3 + LeakyReLU (UNetConvBlock).

    x: (N, Cin, H, W) if data_format=="NCHW" (PyTorch layout), else NHWC.
    w*: PyTorch OIHW weights (Cout, Cin, 3, 3); b*: (Cout,).
    Returns the same data_format as the input.
    """
    if data_format == "NCHW":
        x_nhwc = jnp.transpose(x, (0, 2, 3, 1))
    else:
        x_nhwc = x
    N, H, W, Cin = x_nhwc.shape
    Cmid = w1_oihw.shape[0]
    Cout = w2_oihw.shape[0]

    if compute_dtype is not None:
        x_nhwc = x_nhwc.astype(compute_dtype)
        w1_oihw = w1_oihw.astype(compute_dtype)
        w2_oihw = w2_oihw.astype(compute_dtype)
    cdt = x_nhwc.dtype

    # Weights: OIHW -> (ky, kx, i, o) -> (9*Cin, Cout); row ordering matches
    # the im2col column order (ky*3 + kx)*C + c used inside the kernel.
    w1_flat = jnp.transpose(w1_oihw, (2, 3, 1, 0)).reshape(9 * Cin, Cmid)
    w2_flat = jnp.transpose(w2_oihw, (2, 3, 1, 0)).reshape(9 * Cmid, Cout)
    b1_2d = b1.reshape(1, Cmid).astype(jnp.float32)
    b2_2d = b2.reshape(1, Cout).astype(jnp.float32)

    # Explicit VMEM budget: double-buffered in/out blocks + weights + scratch,
    # clamped to 64 MiB so the limit is valid on v5e/v6e (128 MiB physical)
    # and v7x (64 MiB physical) alike.
    dsz = jnp.dtype(cdt).itemsize
    block_bytes = 2 * H * W * (Cin + Cout) * dsz
    weight_bytes = 2 * (9 * Cin * Cmid + 9 * Cmid * Cout) * dsz \
        + 2 * (Cmid + Cout) * 4
    scratch_bytes = ((H + 2) * (W + 2) * (Cin + Cmid)
                     + H * W * 9 * (Cin + Cmid)) * dsz
    est = block_bytes + weight_bytes + scratch_bytes
    vmem_limit = int(min(max(2 * est, 32 * 1024 * 1024), 64 * 1024 * 1024))

    out_nhwc = pl.pallas_call(
        unet_conv_block_kernel,
        out_shape=jax.ShapeDtypeStruct((N, H, W, Cout), cdt),
        grid_spec=pltpu.PrefetchScalarGridSpec(
            num_scalar_prefetch=0,
            grid=(N,),
            in_specs=[
                pl.BlockSpec((1, H, W, Cin), lambda n: (n, 0, 0, 0)),
                pl.BlockSpec((9 * Cin, Cmid), lambda n: (0, 0)),
                pl.BlockSpec((1, Cmid), lambda n: (0, 0)),
                pl.BlockSpec((9 * Cmid, Cout), lambda n: (0, 0)),
                pl.BlockSpec((1, Cout), lambda n: (0, 0)),
            ],
            out_specs=pl.BlockSpec((1, H, W, Cout), lambda n: (n, 0, 0, 0)),
            scratch_shapes=[
                pltpu.VMEM((H + 2, W + 2, Cin), cdt),    # pad1 (halo'd input)
                pltpu.VMEM((H * W, 9 * Cin), cdt),       # col1 (im2col)
                pltpu.VMEM((H + 2, W + 2, Cmid), cdt),   # pad2 (halo'd act1)
                pltpu.VMEM((H * W, 9 * Cmid), cdt),      # col2 (im2col)
            ],
        ),
        compiler_params=pltpu.CompilerParams(
            dimension_semantics=("parallel",),
            vmem_limit_bytes=vmem_limit,
        ),
    )(x_nhwc, w1_flat, b1_2d, w2_flat, b2_2d)

    if data_format == "NCHW":
        return jnp.transpose(out_nhwc, (0, 3, 1, 2))
    return out_nhwc


def _reference(x_nchw, w1, b1, w2, b2):
    """Pure-JAX reference (lax.conv) for correctness check."""
    dn = ("NCHW", "OIHW", "NCHW")

    def conv(x, w, b):
        y = lax.conv_general_dilated(x, w, window_strides=(1, 1),
                                     padding=((1, 1), (1, 1)),
                                     dimension_numbers=dn)
        return y + b.reshape(1, -1, 1, 1)

    y = _leaky_relu(conv(x_nchw, w1, b1))
    y = _leaky_relu(conv(y, w2, b2))
    return y


if __name__ == "__main__":
    N, Cin, Cout, H, W = 2, 4, 8, 16, 16

    key = jax.random.PRNGKey(0)
    k_x, k_w1, k_b1, k_w2, k_b2 = jax.random.split(key, 5)

    x = jax.random.normal(k_x, (N, Cin, H, W), dtype=jnp.float32)

    # Deterministic parameter init (PyTorch-like fan-in scaling).
    s1 = 1.0 / np.sqrt(Cin * 9)
    s2 = 1.0 / np.sqrt(Cout * 9)
    w1 = jax.random.uniform(k_w1, (Cout, Cin, 3, 3), jnp.float32, -s1, s1)
    b1 = jax.random.uniform(k_b1, (Cout,), jnp.float32, -s1, s1)
    w2 = jax.random.uniform(k_w2, (Cout, Cout, 3, 3), jnp.float32, -s2, s2)
    b2 = jax.random.uniform(k_b2, (Cout,), jnp.float32, -s2, s2)

    out = unet_conv_block(x, w1, b1, w2, b2)
    out = jax.block_until_ready(out)

    ref = jax.block_until_ready(_reference(x, w1, b1, w2, b2))
    np.testing.assert_allclose(np.asarray(out), np.asarray(ref),
                               rtol=1e-4, atol=1e-4)

    print("KERNEL_OK")
</pallas_src>

<mosaic_0001>
module attributes {stable_mosaic.version = 11 : i64} {
  func.func @unet_conv_block_kernel(%arg0: i32, %arg1: memref<1x16x16x4xf32, #tpu.memory_space<vmem>>, %arg2: memref<36x8xf32, #tpu.memory_space<vmem>>, %arg3: memref<1x8xf32, #tpu.memory_space<vmem>>, %arg4: memref<72x8xf32, #tpu.memory_space<vmem>>, %arg5: memref<1x8xf32, #tpu.memory_space<vmem>>, %arg6: memref<1x16x16x8xf32, #tpu.memory_space<vmem>>, %arg7: memref<18x18x4xf32, #tpu.memory_space<vmem>>, %arg8: memref<256x36xf32, #tpu.memory_space<vmem>>, %arg9: memref<18x18x8xf32, #tpu.memory_space<vmem>>, %arg10: memref<256x72xf32, #tpu.memory_space<vmem>>) attributes {dimension_semantics = [#tpu.dimension_semantics<parallel>], iteration_bounds = array<i64: 2>, scalar_prefetch = 0 : i64, scratch_operands = 4 : i64, tpu.core_type = #tpu.core_type<tc>, window_params = [{transform_indices = @transform_0, window_bounds = array<i64: 1, 16, 16, 4>}, {pipeline_mode = #tpu.pipeline_mode<synchronous>, transform_indices = @transform_1, window_bounds = array<i64: 36, 8>}, {pipeline_mode = #tpu.pipeline_mode<synchronous>, transform_indices = @transform_2, window_bounds = array<i64: 1, 8>}, {pipeline_mode = #tpu.pipeline_mode<synchronous>, transform_indices = @transform_3, window_bounds = array<i64: 72, 8>}, {pipeline_mode = #tpu.pipeline_mode<synchronous>, transform_indices = @transform_4, window_bounds = array<i64: 1, 8>}, {transform_indices = @transform_5, window_bounds = array<i64: 1, 16, 16, 8>}]} {
    %cst = arith.constant 0.000000e+00 : f32
    %0 = vector.broadcast %cst : f32 to vector<1x18x4xf32>
    %c0 = arith.constant 0 : index
    %c0_0 = arith.constant 0 : index
    %c0_1 = arith.constant 0 : index
    %1 = vector.load %arg7[%c0, %c0_0, %c0_1] : memref<18x18x4xf32, #tpu.memory_space<vmem>>, vector<1x18x4xf32>
    tpu.vector_store %arg7[%c0, %c0_0, %c0_1], %0 {strides = array<i32>} : memref<18x18x4xf32, #tpu.memory_space<vmem>>, vector<1x18x4xf32>,
    %c17 = arith.constant 17 : index
    %c0_2 = arith.constant 0 : index
    %c0_3 = arith.constant 0 : index
    %2 = vector.load %arg7[%c17, %c0_2, %c0_3] : memref<18x18x4xf32, #tpu.memory_space<vmem>>, vector<1x18x4xf32>
    tpu.vector_store %arg7[%c17, %c0_2, %c0_3], %0 {strides = array<i32>} : memref<18x18x4xf32, #tpu.memory_space<vmem>>, vector<1x18x4xf32>,
    %cst_4 = arith.constant 0.000000e+00 : f32
    %3 = vector.broadcast %cst_4 : f32 to vector<18x1x4xf32>
    %c0_5 = arith.constant 0 : index
    %c0_6 = arith.constant 0 : index
    %c0_7 = arith.constant 0 : index
    %4 = vector.load %arg7[%c0_5, %c0_6, %c0_7] : memref<18x18x4xf32, #tpu.memory_space<vmem>>, vector<18x1x4xf32>
    tpu.vector_store %arg7[%c0_5, %c0_6, %c0_7], %3 {strides = array<i32>} : memref<18x18x4xf32, #tpu.memory_space<vmem>>, vector<18x1x4xf32>,
    %c0_8 = arith.constant 0 : index
    %c17_9 = arith.constant 17 : index
    %c0_10 = arith.constant 0 : index
    %5 = vector.load %arg7[%c0_8, %c17_9, %c0_10] : memref<18x18x4xf32, #tpu.memory_space<vmem>>, vector<18x1x4xf32>
    tpu.vector_store %arg7[%c0_8, %c17_9, %c0_10], %3 {strides = array<i32>} : memref<18x18x4xf32, #tpu.memory_space<vmem>>, vector<18x1x4xf32>,
    %c0_11 = arith.constant 0 : index
    %c0_12 = arith.constant 0 : index
    %c0_13 = arith.constant 0 : index
    %c0_14 = arith.constant 0 : index
    %6 = vector.load %arg1[%c0_11, %c0_12, %c0_13, %c0_14] : memref<1x16x16x4xf32, #tpu.memory_space<vmem>>, vector<1x16x16x4xf32>
    %7 = vector.shape_cast %6 : vector<1x16x16x4xf32> to vector<16x16x4xf32>
    %c1 = arith.constant 1 : index
    %c1_15 = arith.constant 1 : index
    %c0_16 = arith.constant 0 : index
    %8 = vector.load %arg7[%c1, %c1_15, %c0_16] : memref<18x18x4xf32, #tpu.memory_space<vmem>>, vector<16x16x4xf32>
    tpu.vector_store %arg7[%c1, %c1_15, %c0_16], %7 {strides = array<i32>} : memref<18x18x4xf32, #tpu.memory_space<vmem>>, vector<16x16x4xf32>,
    %c0_17 = arith.constant 0 : index
    %c0_18 = arith.constant 0 : index
    %c0_19 = arith.constant 0 : index
    %9 = vector.load %arg7[%c0_17, %c0_18, %c0_19] : memref<18x18x4xf32, #tpu.memory_space<vmem>>, vector<16x16x4xf32>
    %10 = vector.shape_cast %9 : vector<16x16x4xf32> to vector<256x4xf32>
    %c0_20 = arith.constant 0 : index
    %c0_21 = arith.constant 0 : index
    %11 = vector.load %arg8[%c0_20, %c0_21] : memref<256x36xf32, #tpu.memory_space<vmem>>, vector<256x4xf32>
    tpu.vector_store %arg8[%c0_20, %c0_21], %10 {strides = array<i32>} : memref<256x36xf32, #tpu.memory_space<vmem>>, vector<256x4xf32>,
    %c0_22 = arith.constant 0 : index
    %c1_23 = arith.constant 1 : index
    %c0_24 = arith.constant 0 : index
    %12 = vector.load %arg7[%c0_22, %c1_23, %c0_24] : memref<18x18x4xf32, #tpu.memory_space<vmem>>, vector<16x16x4xf32>
    %13 = vector.shape_cast %12 : vector<16x16x4xf32> to vector<256x4xf32>
    %c0_25 = arith.constant 0 : index
    %c4 = arith.constant 4 : index
    %14 = vector.load %arg8[%c0_25, %c4] : memref<256x36xf32, #tpu.memory_space<vmem>>, vector<256x4xf32>
    tpu.vector_store %arg8[%c0_25, %c4], %13 {strides = array<i32>} : memref<256x36xf32, #tpu.memory_space<vmem>>, vector<256x4xf32>,
    %c0_26 = arith.constant 0 : index
    %c2 = arith.constant 2 : index
    %c0_27 = arith.constant 0 : index
    %15 = vector.load %arg7[%c0_26, %c2, %c0_27] : memref<18x18x4xf32, #tpu.memory_space<vmem>>, vector<16x16x4xf32>
    %16 = vector.shape_cast %15 : vector<16x16x4xf32> to vector<256x4xf32>
    %c0_28 = arith.constant 0 : index
    %c8 = arith.constant 8 : index
    %17 = vector.load %arg8[%c0_28, %c8] : memref<256x36xf32, #tpu.memory_space<vmem>>, vector<256x4xf32>
    tpu.vector_store %arg8[%c0_28, %c8], %16 {strides = array<i32>} : memref<256x36xf32, #tpu.memory_space<vmem>>, vector<256x4xf32>,
    %c1_29 = arith.constant 1 : index
    %c0_30 = arith.constant 0 : index
    %c0_31 = arith.constant 0 : index
    %18 = vector.load %arg7[%c1_29, %c0_30, %c0_31] : memref<18x18x4xf32, #tpu.memory_space<vmem>>, vector<16x16x4xf32>
    %19 = vector.shape_cast %18 : vector<16x16x4xf32> to vector<256x4xf32>
    %c0_32 = arith.constant 0 : index
    %c12 = arith.constant 12 : index
    %20 = vector.load %arg8[%c0_32, %c12] : memref<256x36xf32, #tpu.memory_space<vmem>>, vector<256x4xf32>
    tpu.vector_store %arg8[%c0_32, %c12], %19 {strides = array<i32>} : memref<256x36xf32, #tpu.memory_space<vmem>>, vector<256x4xf32>,
    %c1_33 = arith.constant 1 : index
    %c1_34 = arith.constant 1 : index
    %c0_35 = arith.constant 0 : index
    %21 = vector.load %arg7[%c1_33, %c1_34, %c0_35] : memref<18x18x4xf32, #tpu.memory_space<vmem>>, vector<16x16x4xf32>
    %22 = vector.shape_cast %21 : vector<16x16x4xf32> to vector<256x4xf32>
    %c0_36 = arith.constant 0 : index
    %c16 = arith.constant 16 : index
    %23 = vector.load %arg8[%c0_36, %c16] : memref<256x36xf32, #tpu.memory_space<vmem>>, vector<256x4xf32>
    tpu.vector_store %arg8[%c0_36, %c16], %22 {strides = array<i32>} : memref<256x36xf32, #tpu.memory_space<vmem>>, vector<256x4xf32>,
    %c1_37 = arith.constant 1 : index
    %c2_38 = arith.constant 2 : index
    %c0_39 = arith.constant 0 : index
    %24 = vector.load %arg7[%c1_37, %c2_38, %c0_39] : memref<18x18x4xf32, #tpu.memory_space<vmem>>, vector<16x16x4xf32>
    %25 = vector.shape_cast %24 : vector<16x16x4xf32> to vector<256x4xf32>
    %c0_40 = arith.constant 0 : index
    %c20 = arith.constant 20 : index
    %26 = vector.load %arg8[%c0_40, %c20] : memref<256x36xf32, #tpu.memory_space<vmem>>, vector<256x4xf32>
    tpu.vector_store %arg8[%c0_40, %c20], %25 {strides = array<i32>} : memref<256x36xf32, #tpu.memory_space<vmem>>, vector<256x4xf32>,
    %c2_41 = arith.constant 2 : index
    %c0_42 = arith.constant 0 : index
    %c0_43 = arith.constant 0 : index
    %27 = vector.load %arg7[%c2_41, %c0_42, %c0_43] : memref<18x18x4xf32, #tpu.memory_space<vmem>>, vector<16x16x4xf32>
    %28 = vector.shape_cast %27 : vector<16x16x4xf32> to vector<256x4xf32>
    %c0_44 = arith.constant 0 : index
    %c24 = arith.constant 24 : index
    %29 = vector.load %arg8[%c0_44, %c24] : memref<256x36xf32, #tpu.memory_space<vmem>>, vector<256x4xf32>
    tpu.vector_store %arg8[%c0_44, %c24], %28 {strides = array<i32>} : memref<256x36xf32, #tpu.memory_space<vmem>>, vector<256x4xf32>,
    %c2_45 = arith.constant 2 : index
    %c1_46 = arith.constant 1 : index
    %c0_47 = arith.constant 0 : index
    %30 = vector.load %arg7[%c2_45, %c1_46, %c0_47] : memref<18x18x4xf32, #tpu.memory_space<vmem>>, vector<16x16x4xf32>
    %31 = vector.shape_cast %30 : vector<16x16x4xf32> to vector<256x4xf32>
    %c0_48 = arith.constant 0 : index
    %c28 = arith.constant 28 : index
    %32 = vector.load %arg8[%c0_48, %c28] : memref<256x36xf32, #tpu.memory_space<vmem>>, vector<256x4xf32>
    tpu.vector_store %arg8[%c0_48, %c28], %31 {strides = array<i32>} : memref<256x36xf32, #tpu.memory_space<vmem>>, vector<256x4xf32>,
    %c2_49 = arith.constant 2 : index
    %c2_50 = arith.constant 2 : index
    %c0_51 = arith.constant 0 : index
    %33 = vector.load %arg7[%c2_49, %c2_50, %c0_51] : memref<18x18x4xf32, #tpu.memory_space<vmem>>, vector<16x16x4xf32>
    %34 = vector.shape_cast %33 : vector<16x16x4xf32> to vector<256x4xf32>
    %c0_52 = arith.constant 0 : index
    %c32 = arith.constant 32 : index
    %35 = vector.load %arg8[%c0_52, %c32] : memref<256x36xf32, #tpu.memory_space<vmem>>, vector<256x4xf32>
    tpu.vector_store %arg8[%c0_52, %c32], %34 {strides = array<i32>} : memref<256x36xf32, #tpu.memory_space<vmem>>, vector<256x4xf32>,
    %c0_53 = arith.constant 0 : index
    %c0_54 = arith.constant 0 : index
    %36 = vector.load %arg8[%c0_53, %c0_54] : memref<256x36xf32, #tpu.memory_space<vmem>>, vector<256x36xf32>
    %c0_55 = arith.constant 0 : index
    %c0_56 = arith.constant 0 : index
    %37 = vector.load %arg2[%c0_55, %c0_56] : memref<36x8xf32, #tpu.memory_space<vmem>>, vector<36x8xf32>
    %cst_57 = arith.constant dense<0.000000e+00> : vector<256x8xf32>
    %38 = tpu.matmul %36, %37, %cst_57 {dimension_numbers = #tpu.dot_dimension_numbers<[1], [0], [0], [1], [0, 0, 1, 1], [], []>} : vector<256x36xf32>, vector<36x8xf32>, vector<256x8xf32> -> vector<256x8xf32>
    %c0_58 = arith.constant 0 : index
    %c0_59 = arith.constant 0 : index
    %39 = vector.load %arg3[%c0_58, %c0_59] : memref<1x8xf32, #tpu.memory_space<vmem>>, vector<1x8xf32>
    %40 = vector.broadcast %39 : vector<1x8xf32> to vector<256x8xf32>
    %41 = arith.addf %38, %40 : vector<256x8xf32>
    %cst_60 = arith.constant 0.000000e+00 : f32
    %42 = vector.broadcast %cst_60 : f32 to vector<256x8xf32>
    %43 = arith.cmpf oge, %41, %42 : vector<256x8xf32>
    %cst_61 = arith.constant 2.000000e-01 : f32
    %44 = vector.broadcast %cst_61 : f32 to vector<256x8xf32>
    %45 = arith.mulf %44, %41 : vector<256x8xf32>
    %46 = arith.select %43, %41, %45 : vector<256x8xi1>, vector<256x8xf32>
    %cst_62 = arith.constant 0.000000e+00 : f32
    %47 = vector.broadcast %cst_62 : f32 to vector<1x18x8xf32>
    %c0_63 = arith.constant 0 : index
    %c0_64 = arith.constant 0 : index
    %c0_65 = arith.constant 0 : index
    %48 = vector.load %arg9[%c0_63, %c0_64, %c0_65] : memref<18x18x8xf32, #tpu.memory_space<vmem>>, vector<1x18x8xf32>
    tpu.vector_store %arg9[%c0_63, %c0_64, %c0_65], %47 {strides = array<i32>} : memref<18x18x8xf32, #tpu.memory_space<vmem>>, vector<1x18x8xf32>,
    %c17_66 = arith.constant 17 : index
    %c0_67 = arith.constant 0 : index
    %c0_68 = arith.constant 0 : index
    %49 = vector.load %arg9[%c17_66, %c0_67, %c0_68] : memref<18x18x8xf32, #tpu.memory_space<vmem>>, vector<1x18x8xf32>
    tpu.vector_store %arg9[%c17_66, %c0_67, %c0_68], %47 {strides = array<i32>} : memref<18x18x8xf32, #tpu.memory_space<vmem>>, vector<1x18x8xf32>,
    %cst_69 = arith.constant 0.000000e+00 : f32
    %50 = vector.broadcast %cst_69 : f32 to vector<18x1x8xf32>
    %c0_70 = arith.constant 0 : index
    %c0_71 = arith.constant 0 : index
    %c0_72 = arith.constant 0 : index
    %51 = vector.load %arg9[%c0_70, %c0_71, %c0_72] : memref<18x18x8xf32, #tpu.memory_space<vmem>>, vector<18x1x8xf32>
    tpu.vector_store %arg9[%c0_70, %c0_71, %c0_72], %50 {strides = array<i32>} : memref<18x18x8xf32, #tpu.memory_space<vmem>>, vector<18x1x8xf32>,
    %c0_73 = arith.constant 0 : index
    %c17_74 = arith.constant 17 : index
    %c0_75 = arith.constant 0 : index
    %52 = vector.load %arg9[%c0_73, %c17_74, %c0_75] : memref<18x18x8xf32, #tpu.memory_space<vmem>>, vector<18x1x8xf32>
    tpu.vector_store %arg9[%c0_73, %c17_74, %c0_75], %50 {strides = array<i32>} : memref<18x18x8xf32, #tpu.memory_space<vmem>>, vector<18x1x8xf32>,
    %53 = vector.shape_cast %46 : vector<256x8xf32> to vector<16x16x8xf32>
    %c1_76 = arith.constant 1 : index
    %c1_77 = arith.constant 1 : index
    %c0_78 = arith.constant 0 : index
    %54 = vector.load %arg9[%c1_76, %c1_77, %c0_78] : memref<18x18x8xf32, #tpu.memory_space<vmem>>, vector<16x16x8xf32>
    tpu.vector_store %arg9[%c1_76, %c1_77, %c0_78], %53 {strides = array<i32>} : memref<18x18x8xf32, #tpu.memory_space<vmem>>, vector<16x16x8xf32>,
    %c0_79 = arith.constant 0 : index
    %c0_80 = arith.constant 0 : index
    %c0_81 = arith.constant 0 : index
    %55 = vector.load %arg9[%c0_79, %c0_80, %c0_81] : memref<18x18x8xf32, #tpu.memory_space<vmem>>, vector<16x16x8xf32>
    %56 = vector.shape_cast %55 : vector<16x16x8xf32> to vector<256x8xf32>
    %c0_82 = arith.constant 0 : index
    %c0_83 = arith.constant 0 : index
    %57 = vector.load %arg10[%c0_82, %c0_83] : memref<256x72xf32, #tpu.memory_space<vmem>>, vector<256x8xf32>
    tpu.vector_store %arg10[%c0_82, %c0_83], %56 {strides = array<i32>} : memref<256x72xf32, #tpu.memory_space<vmem>>, vector<256x8xf32>,
    %c0_84 = arith.constant 0 : index
    %c1_85 = arith.constant 1 : index
    %c0_86 = arith.constant 0 : index
    %58 = vector.load %arg9[%c0_84, %c1_85, %c0_86] : memref<18x18x8xf32, #tpu.memory_space<vmem>>, vector<16x16x8xf32>
    %59 = vector.shape_cast %58 : vector<16x16x8xf32> to vector<256x8xf32>
    %c0_87 = arith.constant 0 : index
    %c8_88 = arith.constant 8 : index
    %60 = vector.load %arg10[%c0_87, %c8_88] : memref<256x72xf32, #tpu.memory_space<vmem>>, vector<256x8xf32>
    tpu.vector_store %arg10[%c0_87, %c8_88], %59 {strides = array<i32>} : memref<256x72xf32, #tpu.memory_space<vmem>>, vector<256x8xf32>,
    %c0_89 = arith.constant 0 : index
    %c2_90 = arith.constant 2 : index
    %c0_91 = arith.constant 0 : index
    %61 = vector.load %arg9[%c0_89, %c2_90, %c0_91] : memref<18x18x8xf32, #tpu.memory_space<vmem>>, vector<16x16x8xf32>
    %62 = vector.shape_cast %61 : vector<16x16x8xf32> to vector<256x8xf32>
    %c0_92 = arith.constant 0 : index
    %c16_93 = arith.constant 16 : index
    %63 = vector.load %arg10[%c0_92, %c16_93] : memref<256x72xf32, #tpu.memory_space<vmem>>, vector<256x8xf32>
    tpu.vector_store %arg10[%c0_92, %c16_93], %62 {strides = array<i32>} : memref<256x72xf32, #tpu.memory_space<vmem>>, vector<256x8xf32>,
    %c1_94 = arith.constant 1 : index
    %c0_95 = arith.constant 0 : index
    %c0_96 = arith.constant 0 : index
    %64 = vector.load %arg9[%c1_94, %c0_95, %c0_96] : memref<18x18x8xf32, #tpu.memory_space<vmem>>, vector<16x16x8xf32>
    %65 = vector.shape_cast %64 : vector<16x16x8xf32> to vector<256x8xf32>
    %c0_97 = arith.constant 0 : index
    %c24_98 = arith.constant 24 : index
    %66 = vector.load %arg10[%c0_97, %c24_98] : memref<256x72xf32, #tpu.memory_space<vmem>>, vector<256x8xf32>
    tpu.vector_store %arg10[%c0_97, %c24_98], %65 {strides = array<i32>} : memref<256x72xf32, #tpu.memory_space<vmem>>, vector<256x8xf32>,
    %c1_99 = arith.constant 1 : index
    %c1_100 = arith.constant 1 : index
    %c0_101 = arith.constant 0 : index
    %67 = vector.load %arg9[%c1_99, %c1_100, %c0_101] : memref<18x18x8xf32, #tpu.memory_space<vmem>>, vector<16x16x8xf32>
    %68 = vector.shape_cast %67 : vector<16x16x8xf32> to vector<256x8xf32>
    %c0_102 = arith.constant 0 : index
    %c32_103 = arith.constant 32 : index
    %69 = vector.load %arg10[%c0_102, %c32_103] : memref<256x72xf32, #tpu.memory_space<vmem>>, vector<256x8xf32>
    tpu.vector_store %arg10[%c0_102, %c32_103], %68 {strides = array<i32>} : memref<256x72xf32, #tpu.memory_space<vmem>>, vector<256x8xf32>,
    %c1_104 = arith.constant 1 : index
    %c2_105 = arith.constant 2 : index
    %c0_106 = arith.constant 0 : index
    %70 = vector.load %arg9[%c1_104, %c2_105, %c0_106] : memref<18x18x8xf32, #tpu.memory_space<vmem>>, vector<16x16x8xf32>
    %71 = vector.shape_cast %70 : vector<16x16x8xf32> to vector<256x8xf32>
    %c0_107 = arith.constant 0 : index
    %c40 = arith.constant 40 : index
    %72 = vector.load %arg10[%c0_107, %c40] : memref<256x72xf32, #tpu.memory_space<vmem>>, vector<256x8xf32>
    tpu.vector_store %arg10[%c0_107, %c40], %71 {strides = array<i32>} : memref<256x72xf32, #tpu.memory_space<vmem>>, vector<256x8xf32>,
    %c2_108 = arith.constant 2 : index
    %c0_109 = arith.constant 0 : index
    %c0_110 = arith.constant 0 : index
    %73 = vector.load %arg9[%c2_108, %c0_109, %c0_110] : memref<18x18x8xf32, #tpu.memory_space<vmem>>, vector<16x16x8xf32>
    %74 = vector.shape_cast %73 : vector<16x16x8xf32> to vector<256x8xf32>
    %c0_111 = arith.constant 0 : index
    %c48 = arith.constant 48 : index
    %75 = vector.load %arg10[%c0_111, %c48] : memref<256x72xf32, #tpu.memory_space<vmem>>, vector<256x8xf32>
    tpu.vector_store %arg10[%c0_111, %c48], %74 {strides = array<i32>} : memref<256x72xf32, #tpu.memory_space<vmem>>, vector<256x8xf32>,
    %c2_112 = arith.constant 2 : index
    %c1_113 = arith.constant 1 : index
    %c0_114 = arith.constant 0 : index
    %76 = vector.load %arg9[%c2_112, %c1_113, %c0_114] : memref<18x18x8xf32, #tpu.memory_space<vmem>>, vector<16x16x8xf32>
    %77 = vector.shape_cast %76 : vector<16x16x8xf32> to vector<256x8xf32>
    %c0_115 = arith.constant 0 : index
    %c56 = arith.constant 56 : index
    %78 = vector.load %arg10[%c0_115, %c56] : memref<256x72xf32, #tpu.memory_space<vmem>>, vector<256x8xf32>
    tpu.vector_store %arg10[%c0_115, %c56], %77 {strides = array<i32>} : memref<256x72xf32, #tpu.memory_space<vmem>>, vector<256x8xf32>,
    %c2_116 = arith.constant 2 : index
    %c2_117 = arith.constant 2 : index
    %c0_118 = arith.constant 0 : index
    %79 = vector.load %arg9[%c2_116, %c2_117, %c0_118] : memref<18x18x8xf32, #tpu.memory_space<vmem>>, vector<16x16x8xf32>
    %80 = vector.shape_cast %79 : vector<16x16x8xf32> to vector<256x8xf32>
    %c0_119 = arith.constant 0 : index
    %c64 = arith.constant 64 : index
    %81 = vector.load %arg10[%c0_119, %c64] : memref<256x72xf32, #tpu.memory_space<vmem>>, vector<256x8xf32>
    tpu.vector_store %arg10[%c0_119, %c64], %80 {strides = array<i32>} : memref<256x72xf32, #tpu.memory_space<vmem>>, vector<256x8xf32>,
    %c0_120 = arith.constant 0 : index
    %c0_121 = arith.constant 0 : index
    %82 = vector.load %arg10[%c0_120, %c0_121] : memref<256x72xf32, #tpu.memory_space<vmem>>, vector<256x72xf32>
    %c0_122 = arith.constant 0 : index
    %c0_123 = arith.constant 0 : index
    %83 = vector.load %arg4[%c0_122, %c0_123] : memref<72x8xf32, #tpu.memory_space<vmem>>, vector<72x8xf32>
    %cst_124 = arith.constant dense<0.000000e+00> : vector<256x8xf32>
    %84 = tpu.matmul %82, %83, %cst_124 {dimension_numbers = #tpu.dot_dimension_numbers<[1], [0], [0], [1], [0, 0, 1, 1], [], []>} : vector<256x72xf32>, vector<72x8xf32>, vector<256x8xf32> -> vector<256x8xf32>
    %c0_125 = arith.constant 0 : index
    %c0_126 = arith.constant 0 : index
    %85 = vector.load %arg5[%c0_125, %c0_126] : memref<1x8xf32, #tpu.memory_space<vmem>>, vector<1x8xf32>
    %86 = vector.broadcast %85 : vector<1x8xf32> to vector<256x8xf32>
    %87 = arith.addf %84, %86 : vector<256x8xf32>
    %cst_127 = arith.constant 0.000000e+00 : f32
    %88 = vector.broadcast %cst_127 : f32 to vector<256x8xf32>
    %89 = arith.cmpf oge, %87, %88 : vector<256x8xf32>
    %cst_128 = arith.constant 2.000000e-01 : f32
    %90 = vector.broadcast %cst_128 : f32 to vector<256x8xf32>
    %91 = arith.mulf %90, %87 : vector<256x8xf32>
    %92 = arith.select %89, %87, %91 : vector<256x8xi1>, vector<256x8xf32>
    %93 = vector.shape_cast %92 : vector<256x8xf32> to vector<16x16x8xf32>
    %c0_129 = arith.constant 0 : index
    %c0_130 = arith.constant 0 : index
    %c0_131 = arith.constant 0 : index
    %c0_132 = arith.constant 0 : index
    %94 = vector.load %arg6[%c0_129, %c0_130, %c0_131, %c0_132] : memref<1x16x16x8xf32, #tpu.memory_space<vmem>>, vector<1x16x16x8xf32>
    %95 = vector.shape_cast %94 : vector<1x16x16x8xf32> to vector<16x16x8xf32>
    %96 = vector.shape_cast %93 : vector<16x16x8xf32> to vector<1x16x16x8xf32>
    tpu.vector_store %arg6[%c0_129, %c0_130, %c0_131, %c0_132], %96 {strides = array<i32>} : memref<1x16x16x8xf32, #tpu.memory_space<vmem>>, vector<1x16x16x8xf32>,
    return
  }
  func.func @transform_0(%arg0: i32) -> (i32, i32, i32, i32) {
    %c0_i32 = arith.constant 0 : i32
    %c0_i32_0 = arith.constant 0 : i32
    %c0_i32_1 = arith.constant 0 : i32
    %c0_i32_2 = arith.constant 0 : i32
    return %arg0, %c0_i32, %c0_i32_0, %c0_i32_1 : i32, i32, i32, i32
  }
  func.func @transform_1(%arg0: i32) -> (i32, i32) {
    %c0_i32 = arith.constant 0 : i32
    %c0_i32_0 = arith.constant 0 : i32
    %c0_i32_1 = arith.constant 0 : i32
    return %c0_i32, %c0_i32_0 : i32, i32
  }
  func.func @transform_2(%arg0: i32) -> (i32, i32) {
    %c0_i32 = arith.constant 0 : i32
    %c0_i32_0 = arith.constant 0 : i32
    %c0_i32_1 = arith.constant 0 : i32
    return %c0_i32, %c0_i32_0 : i32, i32
  }
  func.func @transform_3(%arg0: i32) -> (i32, i32) {
    %c0_i32 = arith.constant 0 : i32
    %c0_i32_0 = arith.constant 0 : i32
    %c0_i32_1 = arith.constant 0 : i32
    return %c0_i32, %c0_i32_0 : i32, i32
  }
  func.func @transform_4(%arg0: i32) -> (i32, i32) {
    %c0_i32 = arith.constant 0 : i32
    %c0_i32_0 = arith.constant 0 : i32
    %c0_i32_1 = arith.constant 0 : i32
    return %c0_i32, %c0_i32_0 : i32, i32
  }
  func.func @transform_5(%arg0: i32) -> (i32, i32, i32, i32) {
    %c0_i32 = arith.constant 0 : i32
    %c0_i32_0 = arith.constant 0 : i32
    %c0_i32_1 = arith.constant 0 : i32
    %c0_i32_2 = arith.constant 0 : i32
    return %arg0, %c0_i32, %c0_i32_0, %c0_i32_1 : i32, i32, i32, i32
  }
}

</mosaic_0001>

<bundles_post_ra>
// kernel: tpu_custom_call.1
= control target key start
LH: loop header
LB: loop body
LE: loop exit
PB: predicated region body
PF: predicated region fallthrough
CT: control target
= control target key end

     0   :  { %s5041_s18 = smov 0   ;;  %s7303_s0 = inlined_call_operand.vmem [shape: f32[2,16,16,4], index: 0, kind: input, shape index: {}]   ;;  %s7304_s1 = inlined_call_operand.vmem [shape: f32[36,8], index: 1, kind: input, shape index: {}]   ;;  %s7305_s2 = inlined_call_operand.vmem [shape: f32[1,8], index: 2, kind: input, shape index: {}]   ;;  %s7306_s3 = inlined_call_operand.vmem [shape: f32[72,8], index: 3, kind: input, shape index: {}]   ;;  %s7307_s4 = inlined_call_operand.vmem [shape: f32[1,8], index: 4, kind: input, shape index: {}]   ;;  %s7308_s5 = inlined_call_operand.vmem [shape: f32[2,16,16,8], index: 5, kind: output, shape index: {}]  }
   0x1 LB: > { %s4652_s19 = sadd.s32 4294967295, %s4996_s18   ;;  %p4656_p0 = scmp.ge.s32.totalorder %s4996_s18, 1  ;;  %s4996_s18 = sphi %s5041_s18, %s15_s18  }
   0x2   : > { %p187_p1 = scmp.lt.s32.totalorder %s4996_s18, 3 }
   0x4   : > { %p188_p2 = pnand %p4656_p0, %p187_p1 }
   0x6   : > { %191 = sbr.rel (%p188_p2) target bundleno = 1678 (0x68e), region = 40 }
   0xd   : > { %vm225_vm0 = vcmask 31744   ;;  %vm234_vm1 = vcmask 24576   ;;  %p5051_p3 = scmp.lt.s32.totalorder %s4652_s19, 1  ;;  %vm228_vm2 = vcmask 25600   ;;  %v7309_v0 = vmov 0.0   ;;  %s4999_s25 = smov 4  }
   0xe   : > { %226 = vst.msk [vmem:[#allocation2] sm:$0xff] %vm225_vm0, %v7309_v0  ;;  %227 = vst.msk [vmem:[#allocation2 + $0x8] sm:$0xff] %vm225_vm0, %v7309_v0  ;;  %s5000_s26 = smov 8   ;;  %vm560_vm3 = vcmask 64544   ;;  %s5001_s27 = smov 12   ;;  %vm753_vm4 = vcmask 97344  }
   0xf   : > { %231 = vst.msk [vmem:[#allocation2 + $0x198] sm:$0xff] %vm225_vm0, %v7309_v0  ;;  %232 = vst.msk [vmem:[#allocation2 + $0x1a0] sm:$0xff] %vm225_vm0, %v7309_v0  ;;  %s7404_s19 = smov (!%p5051_p3, %s4652_s19), 1  ;;  %s5002_s28 = smov 16   ;;  %vm946_vm5 = vcmask 130144   ;;  %vm1139_vm6 = vcmask 162944  }
  0x10   : > { %236 = vst.msk [vmem:[#allocation2 + $0x18] sm:$0x1] %vm234_vm1, %v7309_v0  ;;  %237 = vst.msk [vmem:[#allocation2 + $0x30] sm:$0x1] %vm234_vm1, %v7309_v0  ;;  %s4730_s21 = sshll.u32 %s7404_s19, 8  ;;  %s5003_s29 = smov 20  }
  0x11   : > { %238 = vst.msk [vmem:[#allocation2 + $0x48] sm:$0x1] %vm234_vm1, %v7309_v0  ;;  %239 = vst.msk [vmem:[#allocation2 + $0x60] sm:$0x1] %vm234_vm1, %v7309_v0  ;;  %s5151_s24 = scalar_lea.vmem %s7303_s0, %s4730_s21  ;;  %s5004_s30 = smov 24   ;;  %vm1332_vm7 = vcmask 195744  }
  0x12   : > { %240 = vst.msk [vmem:[#allocation2 + $0x78] sm:$0x1] %vm234_vm1, %v7309_v0  ;;  %241 = vst.msk [vmem:[#allocation2 + $0x90] sm:$0x1] %vm234_vm1, %v7309_v0  ;;  %v271_v1 = vld [vmem:[%s5151_s24] sm:$0xff]  ;;  %v272_v2 = vld [vmem:[%s5151_s24 + $0x8] sm:$0xff] }
  0x13   : > { %242 = vst.msk [vmem:[#allocation2 + $0xa8] sm:$0x1] %vm234_vm1, %v7309_v0  ;;  %243 = vst.msk [vmem:[#allocation2 + $0xc0] sm:$0x1] %vm234_vm1, %v7309_v0  ;;  %v273_v3 = vld [vmem:[%s5151_s24 + $0x10] sm:$0xff]  ;;  %v274_v4 = vld [vmem:[%s5151_s24 + $0x18] sm:$0xff] }
  0x14   : > { %244 = vst.msk [vmem:[#allocation2 + $0xd8] sm:$0x1] %vm234_vm1, %v7309_v0  ;;  %245 = vst.msk [vmem:[#allocation2 + $0xf0] sm:$0x1] %vm234_vm1, %v7309_v0  ;;  %v275_v5 = vld [vmem:[%s5151_s24 + $0x20] sm:$0xff]  ;;  %v276_v6 = vld [vmem:[%s5151_s24 + $0x28] sm:$0xff] }
  0x15   : > { %246 = vst.msk [vmem:[#allocation2 + $0x108] sm:$0x1] %vm234_vm1, %v7309_v0  ;;  %247 = vst.msk [vmem:[#allocation2 + $0x120] sm:$0x1] %vm234_vm1, %v7309_v0  ;;  %v400_v7 = vld [vmem:[#allocation2 + $0x1] sm:$0xff]  ;;  %v277_v9 = vld [vmem:[%s5151_s24 + $0x30] sm:$0xff] }
  0x16   : > { %248 = vst.msk [vmem:[#allocation2 + $0x138] sm:$0x1] %vm234_vm1, %v7309_v0  ;;  %249 = vst.msk [vmem:[#allocation2 + $0x150] sm:$0x1] %vm234_vm1, %v7309_v0  ;;  %464 = vrot.lane.b32.xlu0 %v400_v7, %s4999_s25  ;;  %v278_v10 = vld [vmem:[%s5151_s24 + $0x38] sm:$0xff]  ;;  %v279_v11 = vld [vmem:[%s5151_s24 + $0x40] sm:$0xff] }
  0x17   : > { %250 = vst.msk [vmem:[#allocation2 + $0x168] sm:$0x1] %vm234_vm1, %v7309_v0  ;;  %251 = vst.msk [vmem:[#allocation2 + $0x180] sm:$0x1] %vm234_vm1, %v7309_v0  ;;  %v280_v12 = vld [vmem:[%s5151_s24 + $0x48] sm:$0xff]  ;;  %v281_v13 = vld [vmem:[%s5151_s24 + $0x50] sm:$0xff] }
  0x18   : > { %254 = vst.msk [vmem:[#allocation2 + $0x29] sm:$0x1] %vm234_vm1, %v7309_v0  ;;  %255 = vst.msk [vmem:[#allocation2 + $0x41] sm:$0x1] %vm234_vm1, %v7309_v0  ;;  %v282_v14 = vld [vmem:[%s5151_s24 + $0x58] sm:$0xff]  ;;  %v283_v15 = vld [vmem:[%s5151_s24 + $0x60] sm:$0xff] }
  0x19   : > { %256 = vst.msk [vmem:[#allocation2 + $0x59] sm:$0x1] %vm234_vm1, %v7309_v0  ;;  %257 = vst.msk [vmem:[#allocation2 + $0x71] sm:$0x1] %vm234_vm1, %v7309_v0  ;;  %v284_v16 = vld [vmem:[%s5151_s24 + $0x68] sm:$0xff]  ;;  %v285_v17 = vld [vmem:[%s5151_s24 + $0x70] sm:$0xff] }
  0x1a   : > { %258 = vst.msk [vmem:[#allocation2 + $0x89] sm:$0x1] %vm234_vm1, %v7309_v0  ;;  %259 = vst.msk [vmem:[#allocation2 + $0xa1] sm:$0x1] %vm234_vm1, %v7309_v0  ;;  %v286_v18 = vld [vmem:[%s5151_s24 + $0x78] sm:$0xff]  ;;  %v287_v19 = vld [vmem:[%s5151_s24 + $0x80] sm:$0xff] }
  0x1b   : > { %260 = vst.msk [vmem:[#allocation2 + $0xb9] sm:$0x1] %vm234_vm1, %v7309_v0  ;;  %261 = vst.msk [vmem:[#allocation2 + $0xd1] sm:$0x1] %vm234_vm1, %v7309_v0  ;;  %v288_v20 = vld [vmem:[%s5151_s24 + $0x88] sm:$0xff]  ;;  %v289_v21 = vld [vmem:[%s5151_s24 + $0x90] sm:$0xff] }
  0x1c   : > { %262 = vst.msk [vmem:[#allocation2 + $0xe9] sm:$0x1] %vm234_vm1, %v7309_v0  ;;  %263 = vst.msk [vmem:[#allocation2 + $0x101] sm:$0x1] %vm234_vm1, %v7309_v0  ;;  %v290_v22 = vld [vmem:[%s5151_s24 + $0x98] sm:$0xff]  ;;  %v291_v23 = vld [vmem:[%s5151_s24 + $0xa0] sm:$0xff] }
  0x1d   : > { %264 = vst.msk [vmem:[#allocation2 + $0x119] sm:$0x1] %vm234_vm1, %v7309_v0  ;;  %265 = vst.msk [vmem:[#allocation2 + $0x131] sm:$0x1] %vm234_vm1, %v7309_v0  ;;  %v292_v24 = vld [vmem:[%s5151_s24 + $0xa8] sm:$0xff]  ;;  %v293_v28 = vld [vmem:[%s5151_s24 + $0xb0] sm:$0xff] }
  0x1e   : > { %266 = vst.msk [vmem:[#allocation2 + $0x149] sm:$0x1] %vm234_vm1, %v7309_v0  ;;  %267 = vst.msk [vmem:[#allocation2 + $0x161] sm:$0x1] %vm234_vm1, %v7309_v0  ;;  %v294_v29 = vld [vmem:[%s5151_s24 + $0xb8] sm:$0xff]  ;;  %v295_v33 = vld [vmem:[%s5151_s24 + $0xc0] sm:$0xff] }
  0x1f   : > { %268 = vst.msk [vmem:[#allocation2 + $0x179] sm:$0x1] %vm234_vm1, %v7309_v0  ;;  %269 = vst.msk [vmem:[#allocation2 + $0x191] sm:$0x1] %vm234_vm1, %v7309_v0  ;;  %v296_v34 = vld [vmem:[%s5151_s24 + $0xc8] sm:$0xff]  ;;  %v297_v35 = vld [vmem:[%s5151_s24 + $0xd0] sm:$0xff] }
  0x20   : > { %229 = vst.msk [vmem:[#allocation2 + $0x10] sm:$0x3] %vm228_vm2, %v7309_v0  ;;  %233 = vst.msk [vmem:[#allocation2 + $0x1a8] sm:$0x3] %vm228_vm2, %v7309_v0  ;;  %v298_v36 = vld [vmem:[%s5151_s24 + $0xd8] sm:$0xff]  ;;  %v299_v37 = vld [vmem:[%s5151_s24 + $0xe0] sm:$0xff] }
  0x21   : > { %235 = vst.msk [vmem:[#allocation2] sm:$0x1] %vm234_vm1, %v7309_v0  ;;  %252 = vst.msk [vmem:[#allocation2 + $0x198] sm:$0x1] %vm234_vm1, %v7309_v0  ;;  %v300_v38 = vld [vmem:[%s5151_s24 + $0xe8] sm:$0xff]  ;;  %s5005_s14 = smov 28  }
  0x22   : > { %253 = vst.msk [vmem:[#allocation2 + $0x11] sm:$0x1] %vm234_vm1, %v7309_v0  ;;  %270 = vst.msk [vmem:[#allocation2 + $0x1a9] sm:$0x1] %vm234_vm1, %v7309_v0  ;;  %v337_v48 = vld [vmem:[#allocation2 + $0x8] sm:$0xff]  ;;  %vm2086_vm8 = vcmask 1043456  }
  0x23   : > { %304 = vst.msk [vmem:[#allocation2 + $0x19] sm:$0xff] %vm225_vm0, %v271_v1  ;;  %305 = vst.msk [vmem:[#allocation2 + $0x21] sm:$0xff] %vm225_vm0, %v272_v2  ;;  %s5006_s17 = smov 32   ;;  %vm1526_vm9 = vcmask 228544   ;;  %vm1719_vm10 = vcmask 261344   ;;  %vm1912_vm11 = vcmask 294144  }
  0x24   : > { %306 = vst.msk [vmem:[#allocation2 + $0x31] sm:$0xff] %vm225_vm0, %v273_v3  ;;  %307 = vst.msk [vmem:[#allocation2 + $0x39] sm:$0xff] %vm225_vm0, %v274_v4  ;;  %vm1989_vm12 = vcmask 293888   ;;  %vm2411_vm13 = vcmask 64512   ;;  %vm2414_vm14 = vcmask 58368   ;;  %vm2420_vm15 = vcmask 57344  }
  0x25   : > { %308 = vst.msk [vmem:[#allocation2 + $0x49] sm:$0xff] %vm225_vm0, %v275_v5  ;;  %309 = vst.msk [vmem:[#allocation2 + $0x51] sm:$0xff] %vm225_vm0, %v276_v6  ;;  %s5008_s8 = smov 48   ;;  %s5009_s20 = smov 56  }
  0x26   : > { %310 = vst.msk [vmem:[#allocation2 + $0x61] sm:$0xff] %vm225_vm0, %v277_v9  ;;  %311 = vst.msk [vmem:[#allocation2 + $0x69] sm:$0xff] %vm225_vm0, %v278_v10  ;;  %s5010_s22 = smov 64  }
  0x27   : > { %v401_v8 = vld [vmem:[#allocation2 + $0x9] sm:$0xff]  ;;  %312 = vst.msk [vmem:[#allocation2 + $0x79] sm:$0xff] %vm225_vm0, %v279_v11  ;;  %313 = vst.msk [vmem:[#allocation2 + $0x81] sm:$0xff] %vm225_vm0, %v280_v12 }
  0x28   : > { %314 = vst.msk [vmem:[#allocation2 + $0x91] sm:$0xff] %vm225_vm0, %v281_v13  ;;  %315 = vst.msk [vmem:[#allocation2 + $0x99] sm:$0xff] %vm225_vm0, %v282_v14  ;;  %466 = vrot.lane.b32.xlu0 %v401_v8, %s4999_s25  ;;  %v336_v45 = vld [vmem:[#allocation2] sm:$0xff] }
  0x29   : > { %316 = vst.msk [vmem:[#allocation2 + $0xa9] sm:$0xff] %vm225_vm0, %v283_v15  ;;  %317 = vst.msk [vmem:[#allocation2 + $0xb1] sm:$0xff] %vm225_vm0, %v284_v16 }
  0x2a   : > { %318 = vst.msk [vmem:[#allocation2 + $0xc1] sm:$0xff] %vm225_vm0, %v285_v17  ;;  %319 = vst.msk [vmem:[#allocation2 + $0xc9] sm:$0xff] %vm225_vm0, %v286_v18  ;;  %v5196_v25 = vld [vmem:[#allocation2 + $0x19] sm:$0xff]  ;;  %v5205_v27 = vld [vmem:[#allocation2 + $0x21] sm:$0xff] }
  0x2b   : > { %320 = vst.msk [vmem:[#allocation2 + $0xd9] sm:$0xff] %vm225_vm0, %v287_v19  ;;  %321 = vst.msk [vmem:[#allocation2 + $0xe1] sm:$0xff] %vm225_vm0, %v288_v20  ;;  %v5198_v26 = vld [vmem:[#allocation2 + $0x31] sm:$0xff]  ;;  %468 = vrot.lane.b32.xlu1 %v5196_v25, %s4999_s25  ;;  %v5217_v31 = vld [vmem:[#allocation2 + $0x39] sm:$0xff] }
  0x2c   : > { %322 = vst.msk [vmem:[#allocation2 + $0xf1] sm:$0xff] %vm225_vm0, %v289_v21  ;;  %323 = vst.msk [vmem:[#allocation2 + $0xf9] sm:$0xff] %vm225_vm0, %v290_v22  ;;  %472 = vrot.lane.b32.xlu0 %v5198_v26, %s4999_s25  ;;  %v5213_v30 = vld [vmem:[#allocation2 + $0x49] sm:$0xff]  ;;  %v5234_v39 = vld [vmem:[#allocation2 + $0x51] sm:$0xff] }
  0x2d   : > { %324 = vst.msk [vmem:[#allocation2 + $0x109] sm:$0xff] %vm225_vm0, %v291_v23  ;;  %325 = vst.msk [vmem:[#allocation2 + $0x111] sm:$0xff] %vm225_vm0, %v292_v24  ;;  %v5221_v32 = vld [vmem:[#allocation2 + $0x61] sm:$0xff]  ;;  %v5245_v41 = vld [vmem:[#allocation2 + $0x69] sm:$0xff] }
  0x2e   : > { %326 = vst.msk [vmem:[#allocation2 + $0x121] sm:$0xff] %vm225_vm0, %v293_v28  ;;  %327 = vst.msk [vmem:[#allocation2 + $0x129] sm:$0xff] %vm225_vm0, %v294_v29  ;;  %v5241_v40 = vld [vmem:[#allocation2 + $0x79] sm:$0xff]  ;;  %v5253_v43 = vld [vmem:[#allocation2 + $0x81] sm:$0xff] }
  0x2f   : > { %470 = vrot.lane.b32.xlu1 %v5205_v27, %s4999_s25  ;;  %328 = vst.msk [vmem:[#allocation2 + $0x139] sm:$0xff] %vm225_vm0, %v295_v33  ;;  %329 = vst.msk [vmem:[#allocation2 + $0x141] sm:$0xff] %vm225_vm0, %v296_v34  ;;  %v5249_v42 = vld [vmem:[#allocation2 + $0x91] sm:$0xff]  ;;  %v5263_v47 = vld [vmem:[#allocation2 + $0x99] sm:$0xff] }
  0x30   : > { %476 = vrot.lane.b32.xlu0 %v5213_v30, %s4999_s25  ;;  %330 = vst.msk [vmem:[#allocation2 + $0x151] sm:$0xff] %vm225_vm0, %v297_v35  ;;  %331 = vst.msk [vmem:[#allocation2 + $0x159] sm:$0xff] %vm225_vm0, %v298_v36  ;;  %v5257_v44 = vld [vmem:[#allocation2 + $0xa9] sm:$0xff]  ;;  %v5261_v46 = vld [vmem:[#allocation2 + $0x18] sm:$0xff] }
  0x31   : > { %332 = vst.msk [vmem:[#allocation2 + $0x169] sm:$0xff] %vm225_vm0, %v299_v37  ;;  %333 = vst.msk [vmem:[#allocation2 + $0x171] sm:$0xff] %vm225_vm0, %v300_v38  ;;  %v5271_v49 = vld [vmem:[#allocation2 + $0x20] sm:$0xff]  ;;  %v5277_v51 = vld [vmem:[#allocation2 + $0x30] sm:$0xff] }
  0x32   : > { %368 = vst.msk [vmem:[#allocation3] sm:$0xff] %vm225_vm0, %v336_v45  ;;  %370 = vst.msk [vmem:[#allocation3 + $0x10] sm:$0xff] %vm225_vm0, %v5261_v46  ;;  %v5273_v50 = vld [vmem:[#allocation2 + $0xc1] sm:$0xff]  ;;  %v5279_v52 = vld [vmem:[#allocation2 + $0x38] sm:$0xff] }
  0x33   : > { %474 = vrot.lane.b32.xlu1 %v5217_v31, %s4999_s25  ;;  %369 = vst.msk [vmem:[#allocation3 + $0x8] sm:$0xff] %vm225_vm0, %v337_v48  ;;  %371 = vst.msk [vmem:[#allocation3 + $0x18] sm:$0xff] %vm225_vm0, %v5271_v49  ;;  %v5283_v53 = vld [vmem:[#allocation2 + $0xb1] sm:$0xff]  ;;  %v5289_v54 = vld [vmem:[#allocation2 + $0x48] sm:$0xff] }
  0x34   : > { %480 = vrot.lane.b32.xlu0 %v5221_v32, %s4999_s25  ;;  %372 = vst.msk [vmem:[#allocation3 + $0x20] sm:$0xff] %vm225_vm0, %v5277_v51  ;;  %373 = vst.msk [vmem:[#allocation3 + $0x28] sm:$0xff] %vm225_vm0, %v5279_v52  ;;  %v5291_v55 = vld [vmem:[#allocation2 + $0x50] sm:$0xff]  ;;  %v5293_v56 = vld [vmem:[#allocation2 + $0xd9] sm:$0xff] }
  0x35   : > { %374 = vst.msk [vmem:[#allocation3 + $0x30] sm:$0xff] %vm225_vm0, %v5289_v54  ;;  %375 = vst.msk [vmem:[#allocation3 + $0x38] sm:$0xff] %vm225_vm0, %v5291_v55  ;;  %v5299_v57 = vld [vmem:[#allocation2 + $0x60] sm:$0xff]  ;;  %v5301_v58 = vld [vmem:[#allocation2 + $0x68] sm:$0xff] }
  0x36   : > { %v5303_v59 = vld [vmem:[#allocation2 + $0x78] sm:$0xff]  ;;  %376 = vst.msk [vmem:[#allocation3 + $0x40] sm:$0xff] %vm225_vm0, %v5299_v57  ;;  %377 = vst.msk [vmem:[#allocation3 + $0x48] sm:$0xff] %vm225_vm0, %v5301_v58  ;;  %v5313_v60 = vld [vmem:[#allocation2 + $0x80] sm:$0xff] }
  0x37   : > { %478 = vrot.lane.b32.xlu1 %v5234_v39, %s4999_s25  ;;  %378 = vst.msk [vmem:[#allocation3 + $0x50] sm:$0xff] %vm225_vm0, %v5303_v59  ;;  %v5315_v61 = vld [vmem:[#allocation2 + $0x90] sm:$0xff]  ;;  %v5317_v62 = vld [vmem:[#allocation2 + $0x98] sm:$0xff]  ;;  %379 = vst.msk [vmem:[#allocation3 + $0x58] sm:$0xff] %vm225_vm0, %v5313_v60 }
  0x38   : > { %484 = vrot.lane.b32.xlu0 %v5241_v40, %s4999_s25  ;;  %v5319_v63 = vld [vmem:[#allocation2 + $0xc9] sm:$0xff]  ;;  %380 = vst.msk [vmem:[#allocation3 + $0x60] sm:$0xff] %vm225_vm0, %v5315_v61  ;;  %381 = vst.msk [vmem:[#allocation3 + $0x68] sm:$0xff] %vm225_vm0, %v5317_v62  ;;  %v5331_v3 = vld [vmem:[#allocation2 + $0xc0] sm:$0xff] }
  0x39   : > { %v5327_v1 = vld [vmem:[#allocation2 + $0xa8] sm:$0xff]  ;;  %v5329_v2 = vld [vmem:[#allocation2 + $0xb0] sm:$0xff]  ;;  %384 = vst.msk [vmem:[#allocation3 + $0x80] sm:$0xff] %vm225_vm0, %v5331_v3  ;;  %v5343_v5 = vld [vmem:[#allocation2 + $0xd8] sm:$0xff] }
  0x3a   : > { %382 = vst.msk [vmem:[#allocation3 + $0x70] sm:$0xff] %vm225_vm0, %v5327_v1  ;;  %383 = vst.msk [vmem:[#allocation3 + $0x78] sm:$0xff] %vm225_vm0, %v5329_v2  ;;  %v5341_v4 = vld [vmem:[#allocation2 + $0xc8] sm:$0xff]  ;;  %v5345_v6 = vld [vmem:[#allocation2 + $0xe0] sm:$0xff] }
  0x3b   : > { %482 = vrot.lane.b32.xlu1 %v5245_v41, %s4999_s25  ;;  %385 = vst.msk [vmem:[#allocation3 + $0x88] sm:$0xff] %vm225_vm0, %v5341_v4  ;;  %386 = vst.msk [vmem:[#allocation3 + $0x90] sm:$0xff] %vm225_vm0, %v5343_v5  ;;  %v5353_v7 = vld [vmem:[#allocation2 + $0xf0] sm:$0xff]  ;;  %v5355_v8 = vld [vmem:[#allocation2 + $0xf8] sm:$0xff] }
  0x3c   : > { %488 = vrot.lane.b32.xlu0 %v5249_v42, %s4999_s25  ;;  %387 = vst.msk [vmem:[#allocation3 + $0x98] sm:$0xff] %vm225_vm0, %v5345_v6  ;;  %v5357_v9 = vld [vmem:[#allocation2 + $0x108] sm:$0xff]  ;;  %388 = vst.msk [vmem:[#allocation3 + $0xa0] sm:$0xff] %vm225_vm0, %v5353_v7  ;;  %v5367_v10 = vld [vmem:[#allocation2 + $0x110] sm:$0xff] }
  0x3d   : > { %389 = vst.msk [vmem:[#allocation3 + $0xa8] sm:$0xff] %vm225_vm0, %v5355_v8  ;;  %390 = vst.msk [vmem:[#allocation3 + $0xb0] sm:$0xff] %vm225_vm0, %v5357_v9  ;;  %v5369_v11 = vld [vmem:[#allocation2 + $0xf1] sm:$0xff]  ;;  %v5375_v12 = vld [vmem:[#allocation2 + $0x120] sm:$0xff] }
  0x3e   : > { %391 = vst.msk [vmem:[#allocation3 + $0xb8] sm:$0xff] %vm225_vm0, %v5367_v10  ;;  %v5377_v13 = vld [vmem:[#allocation2 + $0x128] sm:$0xff]  ;;  %392 = vst.msk [vmem:[#allocation3 + $0xc0] sm:$0xff] %vm225_vm0, %v5375_v12  ;;  %v5391_v16 = vld [vmem:[#allocation2 + $0x138] sm:$0xff] }
  0x3f   : > { %486 = vrot.lane.b32.xlu1 %v5253_v43, %s4999_s25  ;;  %v5379_v14 = vld [vmem:[#allocation2 + $0xe1] sm:$0xff]  ;;  %393 = vst.msk [vmem:[#allocation3 + $0xc8] sm:$0xff] %vm225_vm0, %v5377_v13  ;;  %v5387_v15 = vld [vmem:[#allocation2 + $0x109] sm:$0xff]  ;;  %v5395_v18 = vld [vmem:[#allocation2 + $0xf9] sm:$0xff] }
  0x40   : > { %492 = vrot.lane.b32.xlu0 %v5257_v44, %s4999_s25  ;;  %v5393_v17 = vld [vmem:[#allocation2 + $0x140] sm:$0xff]  ;;  %394 = vst.msk [vmem:[#allocation3 + $0xd0] sm:$0xff] %vm225_vm0, %v5391_v16  ;;  %v5407_v20 = vld [vmem:[#allocation2 + $0x150] sm:$0xff]  ;;  %v5409_v21 = vld [vmem:[#allocation2 + $0x158] sm:$0xff] }
  0x41   : > { %395 = vst.msk [vmem:[#allocation3 + $0xd8] sm:$0xff] %vm225_vm0, %v5393_v17  ;;  %v5403_v19 = vld [vmem:[#allocation2 + $0x121] sm:$0xff]  ;;  %v5411_v22 = vld [vmem:[#allocation2 + $0x111] sm:$0xff]  ;;  %396 = vst.msk [vmem:[#allocation3 + $0xe0] sm:$0xff] %vm225_vm0, %v5407_v20 }
  0x42   : > { %397 = vst.msk [vmem:[#allocation3 + $0xe8] sm:$0xff] %vm225_vm0, %v5409_v21  ;;  %v5419_v23 = vld [vmem:[#allocation2 + $0x139] sm:$0xff]  ;;  %v5423_v24 = vld [vmem:[#allocation2 + $0x168] sm:$0xff]  ;;  %v5425_v28 = vld [vmem:[#allocation2 + $0x170] sm:$0xff] }
  0x43   : > { %490 = vrot.lane.b32.xlu1 %v5263_v47, %s4999_s25  ;;  %v5427_v29 = vld [vmem:[#allocation2 + $0x129] sm:$0xff]  ;;  %398 = vst.msk [vmem:[#allocation3 + $0xf0] sm:$0xff] %vm225_vm0, %v5423_v24  ;;  %399 = vst.msk [vmem:[#allocation3 + $0xf8] sm:$0xff] %vm225_vm0, %v5425_v28  ;;  %v5435_v33 = vld [vmem:[#allocation2 + $0x151] sm:$0xff] }
  0x44   : > { %496 = vrot.lane.b32.xlu0 %v5273_v50, %s4999_s25  ;;  %v5439_v34 = vld [vmem:[#allocation2 + $0x141] sm:$0xff]  ;;  %v301_v35 = vld [vmem:[%s5151_s24 + $0xf0] sm:$0xff]  ;;  %v302_v37 = vld [vmem:[%s5151_s24 + $0xf8] sm:$0xff] }
  0x45   : > { %7342 = vst [vmem:[#allocation6_spill] sm:$0xff] %v5439_v34  ;;  %v5444_v36 = vld [vmem:[#allocation2 + $0x169] sm:$0xff]  ;;  %334 = vst.msk [vmem:[#allocation2 + $0x181] sm:$0xff] %vm225_vm0, %v301_v35  ;;  %v5451_v38 = vld [vmem:[#allocation2 + $0x159] sm:$0xff] }
  0x46   : > { %7343 = vst [vmem:[#allocation7_spill] sm:$0xff] %v5444_v36  ;;  %335 = vst.msk [vmem:[#allocation2 + $0x189] sm:$0xff] %vm225_vm0, %v302_v37  ;;  %v593_v45 = vld [vmem:[#allocation2 + $0x2] sm:$0xff]  ;;  %v5457_v48 = vld [vmem:[#allocation2 + $0x171] sm:$0xff]  ;;  %vm2714_vm0 = vcmask 130112  }
  0x47   : > { %494 = vrot.lane.b32.xlu1 %v5283_v53, %s4999_s25  ;;  %7344 = vst [vmem:[#allocation8_spill] sm:$0xff] %v5451_v38  ;;  %7345 = vst [vmem:[#allocation9_spill] sm:$0xff] %v5457_v48  ;;  %v5460_v35 = vld [vmem:[#allocation2 + $0x1a] sm:$0xff]  ;;  %v594_v37 = vld [vmem:[#allocation2 + $0xa] sm:$0xff] }
  0x48   : > { %500 = vrot.lane.b32.xlu0 %v5293_v56, %s4999_s25  ;;  %7346 = vst [vmem:[#allocation10_spill] sm:$0xff] %v5460_v35  ;;  %v5466_v0 = vld [vmem:[#allocation2 + $0x32] sm:$0xff] }
  0x49   : > { %7347 = vst [vmem:[#allocation11_spill] sm:$0xff] %v5466_v0 }
  0x4b   : > { %498 = vrot.lane.b32.xlu1 %v5319_v63, %s4999_s25 }
  0x4c   : > { %504 = vrot.lane.b32.xlu0 %v5369_v11, %s4999_s25 }
  0x4f   : > { %502 = vrot.lane.b32.xlu1 %v5379_v14, %s4999_s25 }
  0x50   : > { %508 = vrot.lane.b32.xlu0 %v5387_v15, %s4999_s25 }
  0x53   : > { %506 = vrot.lane.b32.xlu1 %v5395_v18, %s4999_s25 }
  0x54   : > { %512 = vrot.lane.b32.xlu0 %v5403_v19, %s4999_s25 }
  0x57   : > { %510 = vrot.lane.b32.xlu1 %v5411_v22, %s4999_s25 }
  0x58   : > { %516 = vrot.lane.b32.xlu0 %v5419_v23, %s4999_s25 }
  0x5b   : > { %514 = vrot.lane.b32.xlu1 %v5427_v29, %s4999_s25 }
  0x5c   : > { %520 = vrot.lane.b32.xlu0 %v5435_v33, %s4999_s25 }
  0x5f   : > { %518 = vrot.lane.b32.xlu1 %v5439_v34, %s4999_s25 }
  0x60   : > { %524 = vrot.lane.b32.xlu0 %v5444_v36, %s4999_s25  ;;  %v5469_v36 = vld [vmem:[#allocation2 + $0x22] sm:$0xff] }
  0x61   : > { %7348 = vst [vmem:[#allocation12_spill] sm:$0xff] %v5469_v36 }
  0x63   : > { %522 = vrot.lane.b32.xlu1 %v5451_v38, %s4999_s25  ;;  %v5473_v38 = vld [vmem:[#allocation2 + $0x4a] sm:$0xff] }
  0x64   : > { %657 = vrot.lane.b32.xlu0 %v593_v45, %s5000_s26  ;;  %7349 = vst [vmem:[#allocation13_spill] sm:$0xff] %v5473_v38  ;;  %v5477_v45 = vld [vmem:[#allocation2 + $0x3a] sm:$0xff] }
  0x65   : > { %7350 = vst [vmem:[#allocation14_spill] sm:$0xff] %v5477_v45 }
  0x67   : > { %526 = vrot.lane.b32.xlu1 %v5457_v48, %s4999_s25  ;;  %v5557_v48 = vld [vmem:[#allocation2 + $0x12a] sm:$0xff] }
  0x68   : > { %661 = vrot.lane.b32.xlu0 %v5460_v35, %s5000_s26  ;;  %v5481_v35 = vld [vmem:[#allocation2 + $0x62] sm:$0xff]  ;;  %7370 = vst [vmem:[#allocation34_spill] sm:$0xff] %v5557_v48 }
  0x69   : > { %7351 = vst [vmem:[#allocation15_spill] sm:$0xff] %v5481_v35 }
  0x6b   : > { %659 = vrot.lane.b32.xlu1 %v594_v37, %s5000_s26  ;;  %v5485_v37 = vld [vmem:[#allocation2 + $0x52] sm:$0xff] }
  0x6c   : > { %665 = vrot.lane.b32.xlu0 %v5466_v0, %s5000_s26  ;;  %7352 = vst [vmem:[#allocation16_spill] sm:$0xff] %v5485_v37  ;;  %v5489_v0 = vld [vmem:[#allocation2 + $0x7a] sm:$0xff] }
  0x6d   : > { %7353 = vst [vmem:[#allocation17_spill] sm:$0xff] %v5489_v0 }
  0x6f   : > { %663 = vrot.lane.b32.xlu1 %v5469_v36, %s5000_s26  ;;  %v5493_v36 = vld [vmem:[#allocation2 + $0x6a] sm:$0xff] }
  0x70   : > { %669 = vrot.lane.b32.xlu0 %v5473_v38, %s5000_s26  ;;  %7354 = vst [vmem:[#allocation18_spill] sm:$0xff] %v5493_v36  ;;  %v5497_v38 = vld [vmem:[#allocation2 + $0x92] sm:$0xff] }
  0x71   : > { %7355 = vst [vmem:[#allocation19_spill] sm:$0xff] %v5497_v38 }
  0x73   : > { %667 = vrot.lane.b32.xlu1 %v5477_v45, %s5000_s26  ;;  %v5501_v45 = vld [vmem:[#allocation2 + $0x82] sm:$0xff] }
  0x74   : > { %673 = vrot.lane.b32.xlu0 %v5481_v35, %s5000_s26  ;;  %7356 = vst [vmem:[#allocation20_spill] sm:$0xff] %v5501_v45  ;;  %v5505_v35 = vld [vmem:[#allocation2 + $0xaa] sm:$0xff] }
  0x75   : > { %7357 = vst [vmem:[#allocation21_spill] sm:$0xff] %v5505_v35 }
  0x77   : > { %671 = vrot.lane.b32.xlu1 %v5485_v37, %s5000_s26  ;;  %v5509_v37 = vld [vmem:[#allocation2 + $0x9a] sm:$0xff] }
  0x78   : > { %677 = vrot.lane.b32.xlu0 %v5489_v0, %s5000_s26  ;;  %7358 = vst [vmem:[#allocation22_spill] sm:$0xff] %v5509_v37  ;;  %v5513_v0 = vld [vmem:[#allocation2 + $0xc2] sm:$0xff] }
  0x79   : > { %7359 = vst [vmem:[#allocation23_spill] sm:$0xff] %v5513_v0 }
  0x7b   : > { %675 = vrot.lane.b32.xlu1 %v5493_v36, %s5000_s26  ;;  %v5517_v36 = vld [vmem:[#allocation2 + $0xb2] sm:$0xff] }
  0x7c   : > { %681 = vrot.lane.b32.xlu0 %v5497_v38, %s5000_s26  ;;  %7360 = vst [vmem:[#allocation24_spill] sm:$0xff] %v5517_v36  ;;  %v5521_v38 = vld [vmem:[#allocation2 + $0xda] sm:$0xff] }
  0x7d   : > { %7361 = vst [vmem:[#allocation25_spill] sm:$0xff] %v5521_v38 }
  0x7f   : > { %679 = vrot.lane.b32.xlu1 %v5501_v45, %s5000_s26  ;;  %v5525_v45 = vld [vmem:[#allocation2 + $0xca] sm:$0xff] }
  0x80   : > { %685 = vrot.lane.b32.xlu0 %v5505_v35, %s5000_s26  ;;  %7362 = vst [vmem:[#allocation26_spill] sm:$0xff] %v5525_v45  ;;  %v5529_v35 = vld [vmem:[#allocation2 + $0xf2] sm:$0xff] }
  0x81   : > { %7363 = vst [vmem:[#allocation27_spill] sm:$0xff] %v5529_v35 }
  0x83   : > { %683 = vrot.lane.b32.xlu1 %v5509_v37, %s5000_s26  ;;  %v5533_v37 = vld [vmem:[#allocation2 + $0xe2] sm:$0xff] }
  0x84   : > { %689 = vrot.lane.b32.xlu0 %v5513_v0, %s5000_s26  ;;  %7364 = vst [vmem:[#allocation28_spill] sm:$0xff] %v5533_v37  ;;  %v5537_v0 = vld [vmem:[#allocation2 + $0x10a] sm:$0xff] }
  0x85   : > { %7365 = vst [vmem:[#allocation29_spill] sm:$0xff] %v5537_v0 }
  0x87   : > { %687 = vrot.lane.b32.xlu1 %v5517_v36, %s5000_s26  ;;  %v5541_v36 = vld [vmem:[#allocation2 + $0xfa] sm:$0xff] }
  0x88   : > { %693 = vrot.lane.b32.xlu0 %v5521_v38, %s5000_s26  ;;  %7366 = vst [vmem:[#allocation30_spill] sm:$0xff] %v5541_v36  ;;  %v5545_v38 = vld [vmem:[#allocation2 + $0x122] sm:$0xff] }
  0x89   : > { %7367 = vst [vmem:[#allocation31_spill] sm:$0xff] %v5545_v38 }
  0x8b   : > { %691 = vrot.lane.b32.xlu1 %v5525_v45, %s5000_s26  ;;  %v5549_v45 = vld [vmem:[#allocation2 + $0x112] sm:$0xff] }
  0x8c   : > { %697 = vrot.lane.b32.xlu0 %v5529_v35, %s5000_s26  ;;  %7368 = vst [vmem:[#allocation32_spill] sm:$0xff] %v5549_v45  ;;  %v5553_v35 = vld [vmem:[#allocation2 + $0x13a] sm:$0xff] }
  0x8d   : > { %7369 = vst [vmem:[#allocation33_spill] sm:$0xff] %v5553_v35 }
  0x8f   : > { %695 = vrot.lane.b32.xlu1 %v5533_v37, %s5000_s26  ;;  %v465_v37 = vpop.permute.xlu0 %464 }
  0x90   : > { %701 = vrot.lane.b32.xlu0 %v5537_v0, %s5000_s26  ;;  %561 = vst.msk [vmem:[#allocation3] sm:$0xff] %vm560_vm3, %v465_v37  ;;  %v5566_v0 = vld [vmem:[#allocation2 + $0x142] sm:$0xff]  ;;  %v5572_v37 = vld [vmem:[#allocation2 + $0x16a] sm:$0xff] }
  0x91   : > { %7371 = vst [vmem:[#allocation35_spill] sm:$0xff] %v5566_v0 }
  0x93   : > { %699 = vrot.lane.b32.xlu1 %v5541_v36, %s5000_s26  ;;  %v5562_v36 = vld [vmem:[#allocation2 + $0x152] sm:$0xff] }
  0x94   : > { %705 = vrot.lane.b32.xlu0 %v5545_v38, %s5000_s26 }
  0x97   : > { %703 = vrot.lane.b32.xlu1 %v5549_v45, %s5000_s26  ;;  %v5576_v45 = vld [vmem:[#allocation2 + $0x15a] sm:$0xff] }
  0x98   : > { %709 = vrot.lane.b32.xlu0 %v5553_v35, %s5000_s26 }
  0x9a   : > { %v467_v38 = vpop.permute.xlu0 %466 }
  0x9b   : > { %707 = vrot.lane.b32.xlu1 %v5557_v48, %s5000_s26  ;;  %562 = vst.msk [vmem:[#allocation3 + $0x8] sm:$0xff] %vm560_vm3, %v467_v38  ;;  %v5584_v38 = vld [vmem:[#allocation2 + $0x172] sm:$0xff] }
  0x9c   : > { %713 = vrot.lane.b32.xlu0 %v5562_v36, %s5000_s26 }
  0x9d   : > { %v469_v34 = vpop.permute.xlu1 %468 }
  0x9e   : > { %563 = vst.msk [vmem:[#allocation3 + $0x10] sm:$0xff] %vm560_vm3, %v469_v34  ;;  %v473_v35 = vpop.permute.xlu0 %472 }
  0x9f   : > { %711 = vrot.lane.b32.xlu1 %v5566_v0, %s5000_s26  ;;  %565 = vst.msk [vmem:[#allocation3 + $0x20] sm:$0xff] %vm560_vm3, %v473_v35 }
  0xa0   : > { %717 = vrot.lane.b32.xlu0 %v5572_v37, %s5000_s26 }
  0xa1   : > { %v471_v48 = vpop.permute.xlu1 %470 }
  0xa2   : > { %564 = vst.msk [vmem:[#allocation3 + $0x18] sm:$0xff] %vm560_vm3, %v471_v48  ;;  %v477_v34 = vpop.permute.xlu0 %476 }
  0xa3   : > { %715 = vrot.lane.b32.xlu1 %v5576_v45, %s5000_s26  ;;  %567 = vst.msk [vmem:[#allocation3 + $0x30] sm:$0xff] %vm560_vm3, %v477_v34 }
  0xa4   : > { %850 = vrot.lane.b32.xlu0 %v5261_v46, %s5001_s27 }
  0xa5   : > { %v475_v0 = vpop.permute.xlu1 %474 }
  0xa6   : > { %566 = vst.msk [vmem:[#allocation3 + $0x28] sm:$0xff] %vm560_vm3, %v475_v0  ;;  %v481_v35 = vpop.permute.xlu0 %480 }
  0xa7   : > { %719 = vrot.lane.b32.xlu1 %v5584_v38, %s5000_s26  ;;  %569 = vst.msk [vmem:[#allocation3 + $0x40] sm:$0xff] %vm560_vm3, %v481_v35 }
  0xa8   : > { %854 = vrot.lane.b32.xlu0 %v5277_v51, %s5001_s27 }
  0xa9   : > { %v479_v48 = vpop.permute.xlu1 %478 }
  0xaa   : > { %568 = vst.msk [vmem:[#allocation3 + $0x38] sm:$0xff] %vm560_vm3, %v479_v48  ;;  %v485_v34 = vpop.permute.xlu0 %484 }
  0xab   : > { %852 = vrot.lane.b32.xlu1 %v5271_v49, %s5001_s27  ;;  %571 = vst.msk [vmem:[#allocation3 + $0x50] sm:$0xff] %vm560_vm3, %v485_v34 }
  0xac   : > { %858 = vrot.lane.b32.xlu0 %v5289_v54, %s5001_s27 }
  0xad   : > { %v483_v46 = vpop.permute.xlu1 %482 }
  0xae   : > { %570 = vst.msk [vmem:[#allocation3 + $0x48] sm:$0xff] %vm560_vm3, %v483_v46  ;;  %v489_v0 = vpop.permute.xlu0 %488 }
  0xaf   : > { %856 = vrot.lane.b32.xlu1 %v5279_v52, %s5001_s27  ;;  %573 = vst.msk [vmem:[#allocation3 + $0x60] sm:$0xff] %vm560_vm3, %v489_v0 }
  0xb0   : > { %862 = vrot.lane.b32.xlu0 %v5299_v57, %s5001_s27 }
  0xb1   : > { %v487_v35 = vpop.permute.xlu1 %486 }
  0xb2   : > { %572 = vst.msk [vmem:[#allocation3 + $0x58] sm:$0xff] %vm560_vm3, %v487_v35  ;;  %v493_v49 = vpop.permute.xlu0 %492 }
  0xb3   : > { %860 = vrot.lane.b32.xlu1 %v5291_v55, %s5001_s27  ;;  %575 = vst.msk [vmem:[#allocation3 + $0x70] sm:$0xff] %vm560_vm3, %v493_v49 }
  0xb4   : > { %866 = vrot.lane.b32.xlu0 %v5303_v59, %s5001_s27 }
  0xb5   : > { %v491_v48 = vpop.permute.xlu1 %490 }
  0xb6   : > { %574 = vst.msk [vmem:[#allocation3 + $0x68] sm:$0xff] %vm560_vm3, %v491_v48  ;;  %v497_v34 = vpop.permute.xlu0 %496 }
  0xb7   : > { %864 = vrot.lane.b32.xlu1 %v5301_v58, %s5001_s27  ;;  %577 = vst.msk [vmem:[#allocation3 + $0x80] sm:$0xff] %vm560_vm3, %v497_v34 }
  0xb8   : > { %870 = vrot.lane.b32.xlu0 %v5315_v61, %s5001_s27 }
  0xb9   : > { %v495_v46 = vpop.permute.xlu1 %494 }
  0xba   : > { %576 = vst.msk [vmem:[#allocation3 + $0x78] sm:$0xff] %vm560_vm3, %v495_v46  ;;  %v501_v0 = vpop.permute.xlu0 %500 }
  0xbb   : > { %868 = vrot.lane.b32.xlu1 %v5313_v60, %s5001_s27  ;;  %579 = vst.msk [vmem:[#allocation3 + $0x90] sm:$0xff] %vm560_vm3, %v501_v0 }
  0xbc   : > { %874 = vrot.lane.b32.xlu0 %v5327_v1, %s5001_s27 }
  0xbd   : > { %v499_v35 = vpop.permute.xlu1 %498 }
  0xbe   : > { %578 = vst.msk [vmem:[#allocation3 + $0x88] sm:$0xff] %vm560_vm3, %v499_v35  ;;  %v505_v49 = vpop.permute.xlu0 %504 }
  0xbf   : > { %872 = vrot.lane.b32.xlu1 %v5317_v62, %s5001_s27  ;;  %581 = vst.msk [vmem:[#allocation3 + $0xa0] sm:$0xff] %vm560_vm3, %v505_v49 }
  0xc0   : > { %878 = vrot.lane.b32.xlu0 %v5331_v3, %s5001_s27 }
  0xc1   : > { %v503_v48 = vpop.permute.xlu1 %502 }
  0xc2   : > { %580 = vst.msk [vmem:[#allocation3 + $0x98] sm:$0xff] %vm560_vm3, %v503_v48  ;;  %v509_v34 = vpop.permute.xlu0 %508 }
  0xc3   : > { %876 = vrot.lane.b32.xlu1 %v5329_v2, %s5001_s27  ;;  %583 = vst.msk [vmem:[#allocation3 + $0xb0] sm:$0xff] %vm560_vm3, %v509_v34 }
  0xc4   : > { %882 = vrot.lane.b32.xlu0 %v5343_v5, %s5001_s27 }
  0xc5   : > { %v507_v46 = vpop.permute.xlu1 %506 }
  0xc6   : > { %582 = vst.msk [vmem:[#allocation3 + $0xa8] sm:$0xff] %vm560_vm3, %v507_v46  ;;  %v513_v0 = vpop.permute.xlu0 %512 }
  0xc7   : > { %880 = vrot.lane.b32.xlu1 %v5341_v4, %s5001_s27  ;;  %585 = vst.msk [vmem:[#allocation3 + $0xc0] sm:$0xff] %vm560_vm3, %v513_v0 }
  0xc8   : > { %886 = vrot.lane.b32.xlu0 %v5353_v7, %s5001_s27 }
  0xc9   : > { %v511_v35 = vpop.permute.xlu1 %510 }
  0xca   : > { %584 = vst.msk [vmem:[#allocation3 + $0xb8] sm:$0xff] %vm560_vm3, %v511_v35  ;;  %v517_v49 = vpop.permute.xlu0 %516 }
  0xcb   : > { %884 = vrot.lane.b32.xlu1 %v5345_v6, %s5001_s27  ;;  %587 = vst.msk [vmem:[#allocation3 + $0xd0] sm:$0xff] %vm560_vm3, %v517_v49 }
  0xcc   : > { %890 = vrot.lane.b32.xlu0 %v5357_v9, %s5001_s27 }
  0xcd   : > { %v515_v48 = vpop.permute.xlu1 %514 }
  0xce   : > { %586 = vst.msk [vmem:[#allocation3 + $0xc8] sm:$0xff] %vm560_vm3, %v515_v48  ;;  %v521_v34 = vpop.permute.xlu0 %520 }
  0xcf   : > { %888 = vrot.lane.b32.xlu1 %v5355_v8, %s5001_s27  ;;  %589 = vst.msk [vmem:[#allocation3 + $0xe0] sm:$0xff] %vm560_vm3, %v521_v34 }
  0xd0   : > { %894 = vrot.lane.b32.xlu0 %v5375_v12, %s5001_s27 }
  0xd1   : > { %v519_v46 = vpop.permute.xlu1 %518 }
  0xd2   : > { %588 = vst.msk [vmem:[#allocation3 + $0xd8] sm:$0xff] %vm560_vm3, %v519_v46  ;;  %v525_v0 = vpop.permute.xlu0 %524 }
  0xd3   : > { %892 = vrot.lane.b32.xlu1 %v5367_v10, %s5001_s27  ;;  %591 = vst.msk [vmem:[#allocation3 + $0xf0] sm:$0xff] %vm560_vm3, %v525_v0  ;;  %v5674_v0 = vld [vmem:[#allocation2 + $0x180] sm:$0xff] }
  0xd4   : > { %898 = vrot.lane.b32.xlu0 %v5391_v16, %s5001_s27 }
  0xd5   : > { %v523_v35 = vpop.permute.xlu1 %522 }
  0xd6   : > { %590 = vst.msk [vmem:[#allocation3 + $0xe8] sm:$0xff] %vm560_vm3, %v523_v35  ;;  %v658_v49 = vpop.permute.xlu0 %657 }
  0xd7   : > { %896 = vrot.lane.b32.xlu1 %v5377_v13, %s5001_s27  ;;  %754 = vst.msk [vmem:[#allocation3] sm:$0xff] %vm753_vm4, %v658_v49 }
  0xd8   : > { %902 = vrot.lane.b32.xlu0 %v5407_v20, %s5001_s27 }
  0xd9   : > { %v527_v48 = vpop.permute.xlu1 %526 }
  0xda   : > { %592 = vst.msk [vmem:[#allocation3 + $0xf8] sm:$0xff] %vm560_vm3, %v527_v48  ;;  %v662_v34 = vpop.permute.xlu0 %661 }
  0xdb   : > { %900 = vrot.lane.b32.xlu1 %v5393_v17, %s5001_s27  ;;  %756 = vst.msk [vmem:[#allocation3 + $0x10] sm:$0xff] %vm753_vm4, %v662_v34  ;;  %v5684_v34 = vld [vmem:[#allocation2 + $0x188] sm:$0xff] }
  0xdc   : > { %906 = vrot.lane.b32.xlu0 %v5423_v24, %s5001_s27 }
  0xdd   : > { %v660_v46 = vpop.permute.xlu1 %659 }
  0xde   : > { %755 = vst.msk [vmem:[#allocation3 + $0x8] sm:$0xff] %vm753_vm4, %v660_v46  ;;  %v666_v35 = vpop.permute.xlu0 %665 }
  0xdf   : > { %904 = vrot.lane.b32.xlu1 %v5409_v21, %s5001_s27  ;;  %758 = vst.msk [vmem:[#allocation3 + $0x20] sm:$0xff] %vm753_vm4, %v666_v35 }
  0xe0   : > { %910 = vrot.lane.b32.xlu0 %v5674_v0, %s5001_s27 }
  0xe1   : > { %v664_v49 = vpop.permute.xlu1 %663 }
  0xe2   : > { %757 = vst.msk [vmem:[#allocation3 + $0x18] sm:$0xff] %vm753_vm4, %v664_v49  ;;  %v670_v48 = vpop.permute.xlu0 %669 }
  0xe3   : > { %908 = vrot.lane.b32.xlu1 %v5425_v28, %s5001_s27  ;;  %760 = vst.msk [vmem:[#allocation3 + $0x30] sm:$0xff] %vm753_vm4, %v670_v48 }
  0xe4   : > { %1043 = vrot.lane.b32.xlu0 %v5196_v25, %s5002_s28 }
  0xe5   : > { %v668_v46 = vpop.permute.xlu1 %667 }
  0xe6   : > { %759 = vst.msk [vmem:[#allocation3 + $0x28] sm:$0xff] %vm753_vm4, %v668_v46  ;;  %v674_v35 = vpop.permute.xlu0 %673 }
  0xe7   : > { %912 = vrot.lane.b32.xlu1 %v5684_v34, %s5001_s27  ;;  %762 = vst.msk [vmem:[#allocation3 + $0x40] sm:$0xff] %vm753_vm4, %v674_v35  ;;  %s5007_s27 = smov 40  }
  0xe8   : > { %1047 = vrot.lane.b32.xlu0 %v5198_v26, %s5002_s28 }
  0xe9   : > { %v672_v49 = vpop.permute.xlu1 %671 }
  0xea   : > { %761 = vst.msk [vmem:[#allocation3 + $0x38] sm:$0xff] %vm753_vm4, %v672_v49  ;;  %v678_v48 = vpop.permute.xlu0 %677  ;;  %v7373_v49 = vld [vmem:[#allocation7_spill] sm:$0xff] }
  0xeb   : > { %1045 = vrot.lane.b32.xlu1 %v5205_v27, %s5002_s28  ;;  %764 = vst.msk [vmem:[#allocation3 + $0x50] sm:$0xff] %vm753_vm4, %v678_v48  ;;  %v7374_v48 = vld [vmem:[#allocation8_spill] sm:$0xff] }
  0xec   : > { %1051 = vrot.lane.b32.xlu0 %v5213_v30, %s5002_s28 }
  0xed   : > { %v676_v25 = vpop.permute.xlu1 %675 }
  0xee   : > { %763 = vst.msk [vmem:[#allocation3 + $0x48] sm:$0xff] %vm753_vm4, %v676_v25  ;;  %v682_v46 = vpop.permute.xlu0 %681 }
  0xef   : > { %1049 = vrot.lane.b32.xlu1 %v5217_v31, %s5002_s28  ;;  %766 = vst.msk [vmem:[#allocation3 + $0x60] sm:$0xff] %vm753_vm4, %v682_v46  ;;  %v7375_v46 = vld [vmem:[#allocation9_spill] sm:$0xff] }
  0xf0   : > { %1055 = vrot.lane.b32.xlu0 %v5221_v32, %s5002_s28 }
  0xf1   : > { %v680_v26 = vpop.permute.xlu1 %679 }
  0xf2   : > { %765 = vst.msk [vmem:[#allocation3 + $0x58] sm:$0xff] %vm753_vm4, %v680_v26  ;;  %v686_v27 = vpop.permute.xlu0 %685 }
  0xf3   : > { %1053 = vrot.lane.b32.xlu1 %v5234_v39, %s5002_s28  ;;  %768 = vst.msk [vmem:[#allocation3 + $0x70] sm:$0xff] %vm753_vm4, %v686_v27  ;;  %v5784_v27 = vld [vmem:[#allocation2 + $0x189] sm:$0xff] }
  0xf4   : > { %1059 = vrot.lane.b32.xlu0 %v5241_v40, %s5002_s28 }
  0xf5   : > { %v684_v30 = vpop.permute.xlu1 %683 }
  0xf6   : > { %767 = vst.msk [vmem:[#allocation3 + $0x68] sm:$0xff] %vm753_vm4, %v684_v30  ;;  %v690_v31 = vpop.permute.xlu0 %689 }
  0xf7   : > { %1057 = vrot.lane.b32.xlu1 %v5245_v41, %s5002_s28  ;;  %770 = vst.msk [vmem:[#allocation3 + $0x80] sm:$0xff] %vm753_vm4, %v690_v31  ;;  %v7376_v31 = vld [vmem:[#allocation10_spill] sm:$0xff] }
  0xf8   : > { %1063 = vrot.lane.b32.xlu0 %v5249_v42, %s5002_s28 }
  0xf9   : > { %v688_v32 = vpop.permute.xlu1 %687 }
  0xfa   : > { %769 = vst.msk [vmem:[#allocation3 + $0x78] sm:$0xff] %vm753_vm4, %v688_v32  ;;  %v694_v39 = vpop.permute.xlu0 %693 }
  0xfb   : > { %1061 = vrot.lane.b32.xlu1 %v5253_v43, %s5002_s28  ;;  %772 = vst.msk [vmem:[#allocation3 + $0x90] sm:$0xff] %vm753_vm4, %v694_v39 }
  0xfc   : > { %1067 = vrot.lane.b32.xlu0 %v5257_v44, %s5002_s28 }
  0xfd   : > { %v692_v40 = vpop.permute.xlu1 %691 }
  0xfe   : > { %771 = vst.msk [vmem:[#allocation3 + $0x88] sm:$0xff] %vm753_vm4, %v692_v40  ;;  %v698_v41 = vpop.permute.xlu0 %697  ;;  %v7377_v40 = vld [vmem:[#allocation11_spill] sm:$0xff] }
  0xff   : > { %1065 = vrot.lane.b32.xlu1 %v5263_v47, %s5002_s28  ;;  %774 = vst.msk [vmem:[#allocation3 + $0xa0] sm:$0xff] %vm753_vm4, %v698_v41  ;;  %v7378_v41 = vld [vmem:[#allocation12_spill] sm:$0xff] }
 0x100   : > { %1071 = vrot.lane.b32.xlu0 %v5273_v50, %s5002_s28 }
 0x101   : > { %v696_v42 = vpop.permute.xlu1 %695 }
 0x102   : > { %773 = vst.msk [vmem:[#allocation3 + $0x98] sm:$0xff] %vm753_vm4, %v696_v42  ;;  %v702_v43 = vpop.permute.xlu0 %701 }
 0x103   : > { %1069 = vrot.lane.b32.xlu1 %v5283_v53, %s5002_s28  ;;  %776 = vst.msk [vmem:[#allocation3 + $0xb0] sm:$0xff] %vm753_vm4, %v702_v43 }
 0x104   : > { %1075 = vrot.lane.b32.xlu0 %v5293_v56, %s5002_s28 }
 0x105   : > { %v700_v44 = vpop.permute.xlu1 %699 }
 0x106   : > { %775 = vst.msk [vmem:[#allocation3 + $0xa8] sm:$0xff] %vm753_vm4, %v700_v44  ;;  %v706_v47 = vpop.permute.xlu0 %705  ;;  %v7379_v44 = vld [vmem:[#allocation13_spill] sm:$0xff] }
 0x107   : > { %1073 = vrot.lane.b32.xlu1 %v5319_v63, %s5002_s28  ;;  %778 = vst.msk [vmem:[#allocation3 + $0xc0] sm:$0xff] %vm753_vm4, %v706_v47  ;;  %v7380_v47 = vld [vmem:[#allocation14_spill] sm:$0xff] }
 0x108   : > { %1079 = vrot.lane.b32.xlu0 %v5369_v11, %s5002_s28 }
 0x109   : > { %v704_v50 = vpop.permute.xlu1 %703 }
 0x10a   : > { %777 = vst.msk [vmem:[#allocation3 + $0xb8] sm:$0xff] %vm753_vm4, %v704_v50  ;;  %v710_v53 = vpop.permute.xlu0 %709 }
 0x10b   : > { %1077 = vrot.lane.b32.xlu1 %v5379_v14, %s5002_s28  ;;  %780 = vst.msk [vmem:[#allocation3 + $0xd0] sm:$0xff] %vm753_vm4, %v710_v53 }
 0x10c   : > { %1083 = vrot.lane.b32.xlu0 %v5387_v15, %s5002_s28 }
 0x10d   : > { %v708_v56 = vpop.permute.xlu1 %707 }
 0x10e   : > { %779 = vst.msk [vmem:[#allocation3 + $0xc8] sm:$0xff] %vm753_vm4, %v708_v56  ;;  %v714_v63 = vpop.permute.xlu0 %713  ;;  %v7381_v56 = vld [vmem:[#allocation15_spill] sm:$0xff] }
 0x10f   : > { %1081 = vrot.lane.b32.xlu1 %v5395_v18, %s5002_s28  ;;  %782 = vst.msk [vmem:[#allocation3 + $0xe0] sm:$0xff] %vm753_vm4, %v714_v63  ;;  %v7382_v63 = vld [vmem:[#allocation16_spill] sm:$0xff] }
 0x110   : > { %1087 = vrot.lane.b32.xlu0 %v5403_v19, %s5002_s28 }
 0x111   : > { %v712_v11 = vpop.permute.xlu1 %711 }
 0x112   : > { %781 = vst.msk [vmem:[#allocation3 + $0xd8] sm:$0xff] %vm753_vm4, %v712_v11  ;;  %v718_v14 = vpop.permute.xlu0 %717 }
 0x113   : > { %1085 = vrot.lane.b32.xlu1 %v5411_v22, %s5002_s28  ;;  %784 = vst.msk [vmem:[#allocation3 + $0xf0] sm:$0xff] %vm753_vm4, %v718_v14  ;;  %v7372_v22 = vld [vmem:[#allocation6_spill] sm:$0xff] }
 0x114   : > { %1091 = vrot.lane.b32.xlu0 %v5419_v23, %s5002_s28 }
 0x115   : > { %v716_v15 = vpop.permute.xlu1 %715 }
 0x116   : > { %783 = vst.msk [vmem:[#allocation3 + $0xe8] sm:$0xff] %vm753_vm4, %v716_v15  ;;  %v851_v18 = vpop.permute.xlu0 %850  ;;  %v7383_v15 = vld [vmem:[#allocation17_spill] sm:$0xff] }
 0x117   : > { %1089 = vrot.lane.b32.xlu1 %v5427_v29, %s5002_s28  ;;  %947 = vst.msk [vmem:[#allocation3] sm:$0xff] %vm946_vm5, %v851_v18  ;;  %v5774_v29 = vld [vmem:[#allocation2 + $0x181] sm:$0xff] }
 0x118   : > { %1095 = vrot.lane.b32.xlu0 %v5435_v33, %s5002_s28  ;;  %v7384_v18 = vld [vmem:[#allocation18_spill] sm:$0xff] }
 0x119   : > { %v720_v19 = vpop.permute.xlu1 %719 }
 0x11a   : > { %785 = vst.msk [vmem:[#allocation3 + $0xf8] sm:$0xff] %vm753_vm4, %v720_v19  ;;  %v855_v35 = vpop.permute.xlu0 %854 }
 0x11b   : > { %1093 = vrot.lane.b32.xlu1 %v7372_v22, %s5002_s28  ;;  %949 = vst.msk [vmem:[#allocation3 + $0x10] sm:$0xff] %vm946_vm5, %v855_v35  ;;  %v7385_v35 = vld [vmem:[#allocation19_spill] sm:$0xff] }
 0x11c   : > { %1099 = vrot.lane.b32.xlu0 %v7373_v49, %s5002_s28 }
 0x11d   : > { %v853_v23 = vpop.permute.xlu1 %852 }
 0x11e   : > { %948 = vst.msk [vmem:[#allocation3 + $0x8] sm:$0xff] %vm946_vm5, %v853_v23  ;;  %v859_v33 = vpop.permute.xlu0 %858  ;;  %v7386_v23 = vld [vmem:[#allocation20_spill] sm:$0xff] }
 0x11f   : > { %1097 = vrot.lane.b32.xlu1 %v7374_v48, %s5002_s28  ;;  %951 = vst.msk [vmem:[#allocation3 + $0x20] sm:$0xff] %vm946_vm5, %v859_v33  ;;  %v7387_v33 = vld [vmem:[#allocation21_spill] sm:$0xff] }
 0x120   : > { %1103 = vrot.lane.b32.xlu0 %v5774_v29, %s5002_s28 }
 0x121   : > { %v857_v25 = vpop.permute.xlu1 %856 }
 0x122   : > { %950 = vst.msk [vmem:[#allocation3 + $0x18] sm:$0xff] %vm946_vm5, %v857_v25  ;;  %v863_v26 = vpop.permute.xlu0 %862  ;;  %v7388_v25 = vld [vmem:[#allocation22_spill] sm:$0xff] }
 0x123   : > { %1101 = vrot.lane.b32.xlu1 %v7375_v46, %s5002_s28  ;;  %953 = vst.msk [vmem:[#allocation3 + $0x30] sm:$0xff] %vm946_vm5, %v863_v26 }
 0x124   : > { %1236 = vrot.lane.b32.xlu0 %v7376_v31, %s5003_s29  ;;  %v7390_v31 = vld [vmem:[#allocation24_spill] sm:$0xff] }
 0x125   : > { %v861_v30 = vpop.permute.xlu1 %860 }
 0x126   : > { %952 = vst.msk [vmem:[#allocation3 + $0x28] sm:$0xff] %vm946_vm5, %v861_v30  ;;  %v867_v32 = vpop.permute.xlu0 %866  ;;  %v7389_v30 = vld [vmem:[#allocation23_spill] sm:$0xff] }
 0x127   : > { %1105 = vrot.lane.b32.xlu1 %v5784_v27, %s5002_s28  ;;  %955 = vst.msk [vmem:[#allocation3 + $0x40] sm:$0xff] %vm946_vm5, %v867_v32 }
 0x128   : > { %1240 = vrot.lane.b32.xlu0 %v7377_v40, %s5003_s29  ;;  %v7391_v40 = vld [vmem:[#allocation25_spill] sm:$0xff] }
 0x129   : > { %v865_v39 = vpop.permute.xlu1 %864 }
 0x12a   : > { %954 = vst.msk [vmem:[#allocation3 + $0x38] sm:$0xff] %vm946_vm5, %v865_v39  ;;  %v871_v42 = vpop.permute.xlu0 %870 }
 0x12b   : > { %1238 = vrot.lane.b32.xlu1 %v7378_v41, %s5003_s29  ;;  %957 = vst.msk [vmem:[#allocation3 + $0x50] sm:$0xff] %vm946_vm5, %v871_v42  ;;  %v7392_v41 = vld [vmem:[#allocation26_spill] sm:$0xff] }
 0x12c   : > { %1244 = vrot.lane.b32.xlu0 %v7379_v44, %s5003_s29  ;;  %v7393_v44 = vld [vmem:[#allocation27_spill] sm:$0xff] }
 0x12d   : > { %v869_v43 = vpop.permute.xlu1 %868 }
 0x12e   : > { %956 = vst.msk [vmem:[#allocation3 + $0x48] sm:$0xff] %vm946_vm5, %v869_v43  ;;  %v875_v50 = vpop.permute.xlu0 %874 }
 0x12f   : > { %1242 = vrot.lane.b32.xlu1 %v7380_v47, %s5003_s29  ;;  %959 = vst.msk [vmem:[#allocation3 + $0x60] sm:$0xff] %vm946_vm5, %v875_v50  ;;  %v7394_v47 = vld [vmem:[#allocation28_spill] sm:$0xff] }
 0x130   : > { %1248 = vrot.lane.b32.xlu0 %v7381_v56, %s5003_s29  ;;  %v7395_v56 = vld [vmem:[#allocation29_spill] sm:$0xff] }
 0x131   : > { %v873_v53 = vpop.permute.xlu1 %872 }
 0x132   : > { %958 = vst.msk [vmem:[#allocation3 + $0x58] sm:$0xff] %vm946_vm5, %v873_v53  ;;  %v879_v11 = vpop.permute.xlu0 %878 }
 0x133   : > { %1246 = vrot.lane.b32.xlu1 %v7382_v63, %s5003_s29  ;;  %961 = vst.msk [vmem:[#allocation3 + $0x70] sm:$0xff] %vm946_vm5, %v879_v11  ;;  %v7396_v63 = vld [vmem:[#allocation30_spill] sm:$0xff] }
 0x134   : > { %1252 = vrot.lane.b32.xlu0 %v7383_v15, %s5003_s29  ;;  %v7397_v15 = vld [vmem:[#allocation31_spill] sm:$0xff] }
 0x135   : > { %v877_v14 = vpop.permute.xlu1 %876 }
 0x136   : > { %960 = vst.msk [vmem:[#allocation3 + $0x68] sm:$0xff] %vm946_vm5, %v877_v14  ;;  %v883_v19 = vpop.permute.xlu0 %882 }
 0x137   : > { %1250 = vrot.lane.b32.xlu1 %v7384_v18, %s5003_s29  ;;  %963 = vst.msk [vmem:[#allocation3 + $0x80] sm:$0xff] %vm946_vm5, %v883_v19  ;;  %v7398_v18 = vld [vmem:[#allocation32_spill] sm:$0xff] }
 0x138   : > { %1256 = vrot.lane.b32.xlu0 %v7385_v35, %s5003_s29  ;;  %v7399_v35 = vld [vmem:[#allocation33_spill] sm:$0xff] }
 0x139   : > { %v881_v22 = vpop.permute.xlu1 %880 }
 0x13a   : > { %962 = vst.msk [vmem:[#allocation3 + $0x78] sm:$0xff] %vm946_vm5, %v881_v22  ;;  %v887_v49 = vpop.permute.xlu0 %886 }
 0x13b   : > { %1254 = vrot.lane.b32.xlu1 %v7386_v23, %s5003_s29  ;;  %965 = vst.msk [vmem:[#allocation3 + $0x90] sm:$0xff] %vm946_vm5, %v887_v49  ;;  %v7400_v23 = vld [vmem:[#allocation34_spill] sm:$0xff] }
 0x13c   : > { %1260 = vrot.lane.b32.xlu0 %v7387_v33, %s5003_s29  ;;  %v7401_v33 = vld [vmem:[#allocation35_spill] sm:$0xff] }
 0x13d   : > { %v885_v48 = vpop.permute.xlu1 %884 }
 0x13e   : > { %964 = vst.msk [vmem:[#allocation3 + $0x88] sm:$0xff] %vm946_vm5, %v885_v48  ;;  %v891_v46 = vpop.permute.xlu0 %890 }
 0x13f   : > { %1258 = vrot.lane.b32.xlu1 %v7388_v25, %s5003_s29  ;;  %967 = vst.msk [vmem:[#allocation3 + $0xa0] sm:$0xff] %vm946_vm5, %v891_v46 }
 0x140   : > { %1264 = vrot.lane.b32.xlu0 %v7389_v30, %s5003_s29 }
 0x141   : > { %v889_v26 = vpop.permute.xlu1 %888 }
 0x142   : > { %966 = vst.msk [vmem:[#allocation3 + $0x98] sm:$0xff] %vm946_vm5, %v889_v26  ;;  %v895_v32 = vpop.permute.xlu0 %894  ;;  %v5874_v26 = vld [vmem:[#allocation2 + $0x182] sm:$0xff] }
 0x143   : > { %1262 = vrot.lane.b32.xlu1 %v7390_v31, %s5003_s29  ;;  %969 = vst.msk [vmem:[#allocation3 + $0xb0] sm:$0xff] %vm946_vm5, %v895_v32  ;;  %v5884_v31 = vld [vmem:[#allocation2 + $0x18a] sm:$0xff] }
 0x144   : > { %1268 = vrot.lane.b32.xlu0 %v7391_v40, %s5003_s29 }
 0x145   : > { %v893_v39 = vpop.permute.xlu1 %892 }
 0x146   : > { %968 = vst.msk [vmem:[#allocation3 + $0xa8] sm:$0xff] %vm946_vm5, %v893_v39  ;;  %v899_v42 = vpop.permute.xlu0 %898 }
 0x147   : > { %1266 = vrot.lane.b32.xlu1 %v7392_v41, %s5003_s29  ;;  %971 = vst.msk [vmem:[#allocation3 + $0xc0] sm:$0xff] %vm946_vm5, %v899_v42 }
 0x148   : > { %1272 = vrot.lane.b32.xlu0 %v7393_v44, %s5003_s29 }
 0x149   : > { %v897_v43 = vpop.permute.xlu1 %896 }
 0x14a   : > { %970 = vst.msk [vmem:[#allocation3 + $0xb8] sm:$0xff] %vm946_vm5, %v897_v43  ;;  %v903_v50 = vpop.permute.xlu0 %902  ;;  %v1980_v43 = vld [vmem:[%s7304_s1 + $0x18] sm:$0xff] }
 0x14b   : > { %1270 = vrot.lane.b32.xlu1 %v7394_v47, %s5003_s29  ;;  %973 = vst.msk [vmem:[#allocation3 + $0xd0] sm:$0xff] %vm946_vm5, %v903_v50  ;;  %v1752_v50 = vld [vmem:[#allocation2 + $0x32] sm:$0xff] }
 0x14c   : > { %1276 = vrot.lane.b32.xlu0 %v7395_v56, %s5003_s29  ;;  %v1560_v56 = vld [vmem:[#allocation2 + $0x39] sm:$0xff] }
 0x14d   : > { %v901_v53 = vpop.permute.xlu1 %900 }
 0x14e   : > { %972 = vst.msk [vmem:[#allocation3 + $0xc8] sm:$0xff] %vm946_vm5, %v901_v53  ;;  %v907_v11 = vpop.permute.xlu0 %906  ;;  %v1981_v53 = vld [vmem:[%s7304_s1 + $0x20] sm:$0xf] }
 0x14f   : > { %1274 = vrot.lane.b32.xlu1 %v7396_v63, %s5003_s29  ;;  %975 = vst.msk [vmem:[#allocation3 + $0xe0] sm:$0xff] %vm946_vm5, %v907_v11  ;;  %v1561_v11 = vld [vmem:[#allocation2 + $0x49] sm:$0xff] }
 0x150   : > { %1280 = vrot.lane.b32.xlu0 %v7397_v15, %s5003_s29  ;;  %v1753_v15 = vld [vmem:[#allocation2 + $0x3a] sm:$0xff] }
 0x151   : > { %v905_v14 = vpop.permute.xlu1 %904 }
 0x152   : > { %974 = vst.msk [vmem:[#allocation3 + $0xd8] sm:$0xff] %vm946_vm5, %v905_v14  ;;  %v911_v19 = vpop.permute.xlu0 %910 }
 0x153   : > { %1278 = vrot.lane.b32.xlu1 %v7398_v18, %s5003_s29  ;;  %977 = vst.msk [vmem:[#allocation3 + $0xf0] sm:$0xff] %vm946_vm5, %v911_v19  ;;  %v1754_v18 = vld [vmem:[#allocation2 + $0x4a] sm:$0xff] }
 0x154   : > { %1284 = vrot.lane.b32.xlu0 %v7399_v35, %s5003_s29 }
 0x155   : > { %v909_v22 = vpop.permute.xlu1 %908 }
 0x156   : > { %976 = vst.msk [vmem:[#allocation3 + $0xe8] sm:$0xff] %vm946_vm5, %v909_v22  ;;  %v1044_v49 = vpop.permute.xlu0 %1043  ;;  %v1562_v22 = vld [vmem:[#allocation2 + $0x51] sm:$0xff] }
 0x157   : > { %1282 = vrot.lane.b32.xlu1 %v7400_v23, %s5003_s29  ;;  %1140 = vst.msk [vmem:[#allocation3] sm:$0xff] %vm1139_vm6, %v1044_v49  ;;  %v1563_v23 = vld [vmem:[#allocation2 + $0x61] sm:$0xff] }
 0x158   : > { %1288 = vrot.lane.b32.xlu0 %v5562_v36, %s5003_s29 }
 0x159   : > { %v913_v48 = vpop.permute.xlu1 %912 }
 0x15a   : > { %978 = vst.msk [vmem:[#allocation3 + $0xf8] sm:$0xff] %vm946_vm5, %v913_v48  ;;  %v1048_v25 = vpop.permute.xlu0 %1047  ;;  %v1755_v48 = vld [vmem:[#allocation2 + $0x52] sm:$0xff] }
 0x15b   : > { %1286 = vrot.lane.b32.xlu1 %v7401_v33, %s5003_s29  ;;  %1142 = vst.msk [vmem:[#allocation3 + $0x10] sm:$0xff] %vm1139_vm6, %v1048_v25  ;;  %v1756_v25 = vld [vmem:[#allocation2 + $0x62] sm:$0xff] }
 0x15c   : > { %1292 = vrot.lane.b32.xlu0 %v5572_v37, %s5003_s29 }
 0x15d   : > { %v1046_v46 = vpop.permute.xlu1 %1045 }
 0x15e   : > { %1141 = vst.msk [vmem:[#allocation3 + $0x8] sm:$0xff] %vm1139_vm6, %v1046_v46  ;;  %v1052_v36 = vpop.permute.xlu0 %1051 }
 0x15f   : > { %1290 = vrot.lane.b32.xlu1 %v5576_v45, %s5003_s29  ;;  %1144 = vst.msk [vmem:[#allocation3 + $0x20] sm:$0xff] %vm1139_vm6, %v1052_v36  ;;  %v1564_v36 = vld [vmem:[#allocation2 + $0x69] sm:$0xff] }
 0x160   : > { %1296 = vrot.lane.b32.xlu0 %v5874_v26, %s5003_s29 }
 0x161   : > { %v1050_v30 = vpop.permute.xlu1 %1049 }
 0x162   : > { %1143 = vst.msk [vmem:[#allocation3 + $0x18] sm:$0xff] %vm1139_vm6, %v1050_v30  ;;  %v1056_v37 = vpop.permute.xlu0 %1055 }
 0x163   : > { %1294 = vrot.lane.b32.xlu1 %v5584_v38, %s5003_s29  ;;  %1146 = vst.msk [vmem:[#allocation3 + $0x30] sm:$0xff] %vm1139_vm6, %v1056_v37  ;;  %v1565_v37 = vld [vmem:[#allocation2 + $0x79] sm:$0xff] }
 0x164   : > { %1430 = vrot.lane.b32.xlu0 %v5277_v51, %s5004_s30 }
 0x165   : > { %v1054_v32 = vpop.permute.xlu1 %1053 }
 0x166   : > { %1145 = vst.msk [vmem:[#allocation3 + $0x28] sm:$0xff] %vm1139_vm6, %v1054_v32  ;;  %v1060_v45 = vpop.permute.xlu0 %1059 }
 0x167   : > { %1298 = vrot.lane.b32.xlu1 %v5884_v31, %s5003_s29  ;;  %1148 = vst.msk [vmem:[#allocation3 + $0x40] sm:$0xff] %vm1139_vm6, %v1060_v45  ;;  %v1757_v45 = vld [vmem:[#allocation2 + $0x6a] sm:$0xff]  ;;  %s7146_s29 = scalar_lea.vmem %s7308_s5, %s4730_s21 }
 0x168   : > { %1434 = vrot.lane.b32.xlu0 %v5289_v54, %s5004_s30 }
 0x169   : > { %v1058_v39 = vpop.permute.xlu1 %1057 }
 0x16a   : > { %1147 = vst.msk [vmem:[#allocation3 + $0x38] sm:$0xff] %vm1139_vm6, %v1058_v39  ;;  %v1064_v38 = vpop.permute.xlu0 %1063 }
 0x16b   : > { %1432 = vrot.lane.b32.xlu1 %v5279_v52, %s5004_s30  ;;  %1150 = vst.msk [vmem:[#allocation3 + $0x50] sm:$0xff] %vm1139_vm6, %v1064_v38  ;;  %v1758_v38 = vld [vmem:[#allocation2 + $0x7a] sm:$0xff] }
 0x16c   : > { %1438 = vrot.lane.b32.xlu0 %v5299_v57, %s5004_s30 }
 0x16d   : > { %v1062_v51 = vpop.permute.xlu1 %1061 }
 0x16e   : > { %1149 = vst.msk [vmem:[#allocation3 + $0x48] sm:$0xff] %vm1139_vm6, %v1062_v51  ;;  %v1068_v40 = vpop.permute.xlu0 %1067 }
 0x16f   : > { %1436 = vrot.lane.b32.xlu1 %v5291_v55, %s5004_s30  ;;  %1152 = vst.msk [vmem:[#allocation3 + $0x60] sm:$0xff] %vm1139_vm6, %v1068_v40  ;;  %v1566_v40 = vld [vmem:[#allocation2 + $0x81] sm:$0xff] }
 0x170   : > { %1442 = vrot.lane.b32.xlu0 %v5303_v59, %s5004_s30 }
 0x171   : > { %v1066_v54 = vpop.permute.xlu1 %1065 }
 0x172   : > { %1151 = vst.msk [vmem:[#allocation3 + $0x58] sm:$0xff] %vm1139_vm6, %v1066_v54  ;;  %v1072_v52 = vpop.permute.xlu0 %1071 }
 0x173   : > { %1440 = vrot.lane.b32.xlu1 %v5301_v58, %s5004_s30  ;;  %1154 = vst.msk [vmem:[#allocation3 + $0x70] sm:$0xff] %vm1139_vm6, %v1072_v52  ;;  %v1567_v52 = vld [vmem:[#allocation2 + $0x91] sm:$0xff] }
 0x174   : > { %1446 = vrot.lane.b32.xlu0 %v5315_v61, %s5004_s30 }
 0x175   : > { %v1070_v57 = vpop.permute.xlu1 %1069 }
 0x176   : > { %1153 = vst.msk [vmem:[#allocation3 + $0x68] sm:$0xff] %vm1139_vm6, %v1070_v57  ;;  %v1076_v55 = vpop.permute.xlu0 %1075 }
 0x177   : > { %1444 = vrot.lane.b32.xlu1 %v5313_v60, %s5004_s30  ;;  %1156 = vst.msk [vmem:[#allocation3 + $0x80] sm:$0xff] %vm1139_vm6, %v1076_v55  ;;  %v1759_v55 = vld [vmem:[#allocation2 + $0x82] sm:$0xff] }
 0x178   : > { %1450 = vrot.lane.b32.xlu0 %v5327_v1, %s5004_s30 }
 0x179   : > { %v1074_v59 = vpop.permute.xlu1 %1073 }
 0x17a   : > { %1155 = vst.msk [vmem:[#allocation3 + $0x78] sm:$0xff] %vm1139_vm6, %v1074_v59  ;;  %v1080_v58 = vpop.permute.xlu0 %1079 }
 0x17b   : > { %1448 = vrot.lane.b32.xlu1 %v5317_v62, %s5004_s30  ;;  %1158 = vst.msk [vmem:[#allocation3 + $0x90] sm:$0xff] %vm1139_vm6, %v1080_v58  ;;  %v1760_v58 = vld [vmem:[#allocation2 + $0x92] sm:$0xff] }
 0x17c   : > { %1454 = vrot.lane.b32.xlu0 %v5331_v3, %s5004_s30 }
 0x17d   : > { %v1078_v61 = vpop.permute.xlu1 %1077 }
 0x17e   : > { %1157 = vst.msk [vmem:[#allocation3 + $0x88] sm:$0xff] %vm1139_vm6, %v1078_v61  ;;  %v1084_v60 = vpop.permute.xlu0 %1083 }
 0x17f   : > { %1452 = vrot.lane.b32.xlu1 %v5329_v2, %s5004_s30  ;;  %1160 = vst.msk [vmem:[#allocation3 + $0xa0] sm:$0xff] %vm1139_vm6, %v1084_v60  ;;  %v1568_v60 = vld [vmem:[#allocation2 + $0x99] sm:$0xff] }
 0x180   : > { %1458 = vrot.lane.b32.xlu0 %v5343_v5, %s5004_s30 }
 0x181   : > { %v1082_v1 = vpop.permute.xlu1 %1081 }
 0x182   : > { %1159 = vst.msk [vmem:[#allocation3 + $0x98] sm:$0xff] %vm1139_vm6, %v1082_v1  ;;  %v1088_v62 = vpop.permute.xlu0 %1087 }
 0x183   : > { %1456 = vrot.lane.b32.xlu1 %v5341_v4, %s5004_s30  ;;  %1162 = vst.msk [vmem:[#allocation3 + $0xb0] sm:$0xff] %vm1139_vm6, %v1088_v62  ;;  %v1569_v62 = vld [vmem:[#allocation2 + $0xa9] sm:$0xff] }
 0x184   : > { %1462 = vrot.lane.b32.xlu0 %v5353_v7, %s5004_s30 }
 0x185   : > { %v1086_v3 = vpop.permute.xlu1 %1085 }
 0x186   : > { %1161 = vst.msk [vmem:[#allocation3 + $0xa8] sm:$0xff] %vm1139_vm6, %v1086_v3  ;;  %v1092_v2 = vpop.permute.xlu0 %1091 }
 0x187   : > { %1460 = vrot.lane.b32.xlu1 %v5345_v6, %s5004_s30  ;;  %1164 = vst.msk [vmem:[#allocation3 + $0xc0] sm:$0xff] %vm1139_vm6, %v1092_v2  ;;  %v1761_v2 = vld [vmem:[#allocation2 + $0x9a] sm:$0xff] }
 0x188   : > { %1466 = vrot.lane.b32.xlu0 %v5357_v9, %s5004_s30 }
 0x189   : > { %v1090_v5 = vpop.permute.xlu1 %1089 }
 0x18a   : > { %1163 = vst.msk [vmem:[#allocation3 + $0xb8] sm:$0xff] %vm1139_vm6, %v1090_v5  ;;  %v1096_v4 = vpop.permute.xlu0 %1095 }
 0x18b   : > { %1464 = vrot.lane.b32.xlu1 %v5355_v8, %s5004_s30  ;;  %1166 = vst.msk [vmem:[#allocation3 + $0xd0] sm:$0xff] %vm1139_vm6, %v1096_v4  ;;  %v1762_v4 = vld [vmem:[#allocation2 + $0xaa] sm:$0xff] }
 0x18c   : > { %1470 = vrot.lane.b32.xlu0 %v5375_v12, %s5004_s30 }
 0x18d   : > { %v1094_v7 = vpop.permute.xlu1 %1093 }
 0x18e   : > { %1165 = vst.msk [vmem:[#allocation3 + $0xc8] sm:$0xff] %vm1139_vm6, %v1094_v7  ;;  %v1100_v6 = vpop.permute.xlu0 %1099 }
 0x18f   : > { %1468 = vrot.lane.b32.xlu1 %v5367_v10, %s5004_s30  ;;  %1168 = vst.msk [vmem:[#allocation3 + $0xe0] sm:$0xff] %vm1139_vm6, %v1100_v6  ;;  %v1570_v6 = vld [vmem:[#allocation2 + $0xb1] sm:$0xff] }
 0x190   : > { %1474 = vrot.lane.b32.xlu0 %v5391_v16, %s5004_s30 }
 0x191   : > { %v1098_v9 = vpop.permute.xlu1 %1097 }
 0x192   : > { %1167 = vst.msk [vmem:[#allocation3 + $0xd8] sm:$0xff] %vm1139_vm6, %v1098_v9  ;;  %v1104_v8 = vpop.permute.xlu0 %1103 }
 0x193   : > { %1472 = vrot.lane.b32.xlu1 %v5377_v13, %s5004_s30  ;;  %1170 = vst.msk [vmem:[#allocation3 + $0xf0] sm:$0xff] %vm1139_vm6, %v1104_v8  ;;  %v1977_v13 = vld [vmem:[%s7304_s1] sm:$0xff] }
 0x194   : > { %1478 = vrot.lane.b32.xlu0 %v5407_v20, %s5004_s30  ;;  %v1978_v20 = vld [vmem:[%s7304_s1 + $0x8] sm:$0xff] }
 0x195   : > { %v1102_v12 = vpop.permute.xlu1 %1101  ;;  %v4934_v41 = vpack.c.bf16 %v1978_v20, %v1977_v13  ;;  %v1571_v8 = vld [vmem:[#allocation2 + $0xc1] sm:$0xff] }
 0x196   : > { %1169 = vst.msk [vmem:[#allocation3 + $0xe8] sm:$0xff] %vm1139_vm6, %v1102_v12  ;;  %v1237_v10 = vpop.permute.xlu0 %1236  ;;  %v1764_v13 = vld [vmem:[#allocation2 + $0xc2] sm:$0xff] }
 0x197   : > { %1476 = vrot.lane.b32.xlu1 %v5393_v17, %s5004_s30  ;;  %1333 = vst.msk [vmem:[#allocation3] sm:$0xff] %vm1332_vm7, %v1237_v10  ;;  %4935 = vmatprep.subr.bf16.mxu0 %v4934_v41  ;;  %v1763_v10 = vld [vmem:[#allocation2 + $0xb2] sm:$0xff] }
 0x198   : > { %1482 = vrot.lane.b32.xlu0 %v5423_v24, %s5004_s30  ;;  %4937 = vmatpush3.bf16.msra.mxu0 %v4934_v41  ;;  %v1979_v24 = vld [vmem:[%s7304_s1 + $0x10] sm:$0xff] }
 0x199   : > { %v1106_v16 = vpop.permute.xlu1 %1105  ;;  %v4938_v44 = vpack.c.bf16 %v1980_v43, %v1979_v24  ;;  %v1572_v41 = vld [vmem:[#allocation2 + $0xc9] sm:$0xff] }
 0x19a   : > { %1171 = vst.msk [vmem:[#allocation3 + $0xf8] sm:$0xff] %vm1139_vm6, %v1106_v16  ;;  %v1241_v17 = vpop.permute.xlu0 %1240  ;;  %v1765_v43 = vld [vmem:[#allocation2 + $0xca] sm:$0xff] }
 0x19b   : > { %1480 = vrot.lane.b32.xlu1 %v5409_v21, %s5004_s30  ;;  %1335 = vst.msk [vmem:[#allocation3 + $0x10] sm:$0xff] %vm1332_vm7, %v1241_v17  ;;  %v1559_v21 = vld [vmem:[#allocation2 + $0x31] sm:$0xff]  ;;  %4939 = vmatprep.subr.bf16.mxu0 %v4938_v44 }
 0x19c   : > { %1486 = vrot.lane.b32.xlu0 %v5674_v0, %s5004_s30  ;;  %4941 = vmatpush3.bf16.msra.mxu0 %v4938_v44  ;;  %v1766_v44 = vld [vmem:[#allocation2 + $0xda] sm:$0xff] }
 0x19d   : > { %v1239_v42 = vpop.permute.xlu1 %1238  ;;  %4818 = vmatprep.subr.msk.mxu0 %vm2086_vm8, %v1981_v53 }
 0x19e   : > { %1334 = vst.msk [vmem:[#allocation3 + $0x8] sm:$0xff] %vm1332_vm7, %v1239_v42  ;;  %v1245_v47 = vpop.permute.xlu0 %1244  ;;  %v1573_v42 = vld [vmem:[#allocation2 + $0xd9] sm:$0xff] }
 0x19f   : > { %1484 = vrot.lane.b32.xlu1 %v5425_v28, %s5004_s30  ;;  %1337 = vst.msk [vmem:[#allocation3 + $0x20] sm:$0xff] %vm1332_vm7, %v1245_v47 }
 0x1a0   : > { %1623 = vrot.lane.b32.xlu0 %v1559_v21, %s5005_s14  ;;  %4819 = vmatpush3.msk.msra.mxu0 %vm2086_vm8, %v1981_v53  ;;  %v1575_v53 = vld [vmem:[#allocation2 + $0xf1] sm:$0xff] }
 0x1a1   : > { %v1243_v0 = vpop.permute.xlu1 %1242 }
 0x1a2   : > { %1336 = vst.msk [vmem:[#allocation3 + $0x18] sm:$0xff] %vm1332_vm7, %v1243_v0  ;;  %v1249_v28 = vpop.permute.xlu0 %1248  ;;  %v1574_v0 = vld [vmem:[#allocation2 + $0xe1] sm:$0xff] }
 0x1a3   : > { %1488 = vrot.lane.b32.xlu1 %v5684_v34, %s5004_s30  ;;  %1339 = vst.msk [vmem:[#allocation3 + $0x30] sm:$0xff] %vm1332_vm7, %v1249_v28 }
 0x1a4   : > { %1816 = vrot.lane.b32.xlu0 %v1752_v50, %s5006_s17 }
 0x1a5   : > { %v1247_v63 = vpop.permute.xlu1 %1246 }
 0x1a6   : > { %1338 = vst.msk [vmem:[#allocation3 + $0x28] sm:$0xff] %vm1332_vm7, %v1247_v63  ;;  %v1253_v14 = vpop.permute.xlu0 %1252 }
 0x1a7   : > { %1625 = vrot.lane.b32.xlu1 %v1560_v56, %s5005_s14  ;;  %1341 = vst.msk [vmem:[#allocation3 + $0x40] sm:$0xff] %vm1332_vm7, %v1253_v14  ;;  %v1767_v56 = vld [vmem:[#allocation2 + $0xe2] sm:$0xff] }
 0x1a8   : > { %1627 = vrot.lane.b32.xlu0 %v1561_v11, %s5005_s14  ;;  %v1768_v11 = vld [vmem:[#allocation2 + $0xf2] sm:$0xff] }
 0x1a9   : > { %v1251_v34 = vpop.permute.xlu1 %1250 }
 0x1aa   : > { %1340 = vst.msk [vmem:[#allocation3 + $0x38] sm:$0xff] %vm1332_vm7, %v1251_v34  ;;  %v1257_v19 = vpop.permute.xlu0 %1256 }
 0x1ab   : > { %1818 = vrot.lane.b32.xlu1 %v1753_v15, %s5006_s17  ;;  %1343 = vst.msk [vmem:[#allocation3 + $0x50] sm:$0xff] %vm1332_vm7, %v1257_v19  ;;  %v1576_v15 = vld [vmem:[#allocation2 + $0xf9] sm:$0xff] }
 0x1ac   : > { %1820 = vrot.lane.b32.xlu0 %v1754_v18, %s5006_s17  ;;  %v1577_v18 = vld [vmem:[#allocation2 + $0x109] sm:$0xff] }
 0x1ad   : > { %v1255_v35 = vpop.permute.xlu1 %1254 }
 0x1ae   : > { %1342 = vst.msk [vmem:[#allocation3 + $0x48] sm:$0xff] %vm1332_vm7, %v1255_v35  ;;  %v1261_v49 = vpop.permute.xlu0 %1260 }
 0x1af   : > { %1629 = vrot.lane.b32.xlu1 %v1562_v22, %s5005_s14  ;;  %1345 = vst.msk [vmem:[#allocation3 + $0x60] sm:$0xff] %vm1332_vm7, %v1261_v49  ;;  %v1769_v22 = vld [vmem:[#allocation2 + $0xfa] sm:$0xff] }
 0x1b0   : > { %1631 = vrot.lane.b32.xlu0 %v1563_v23, %s5005_s14  ;;  %v1770_v23 = vld [vmem:[#allocation2 + $0x10a] sm:$0xff] }
 0x1b1   : > { %v1259_v33 = vpop.permute.xlu1 %1258 }
 0x1b2   : > { %1344 = vst.msk [vmem:[#allocation3 + $0x58] sm:$0xff] %vm1332_vm7, %v1259_v33  ;;  %v1265_v46 = vpop.permute.xlu0 %1264 }
 0x1b3   : > { %1822 = vrot.lane.b32.xlu1 %v1755_v48, %s5006_s17  ;;  %1347 = vst.msk [vmem:[#allocation3 + $0x70] sm:$0xff] %vm1332_vm7, %v1265_v46  ;;  %v1578_v48 = vld [vmem:[#allocation2 + $0x111] sm:$0xff] }
 0x1b4   : > { %1824 = vrot.lane.b32.xlu0 %v1756_v25, %s5006_s17  ;;  %v1579_v25 = vld [vmem:[#allocation2 + $0x121] sm:$0xff] }
 0x1b5   : > { %v1263_v30 = vpop.permute.xlu1 %1262 }
 0x1b6   : > { %1346 = vst.msk [vmem:[#allocation3 + $0x68] sm:$0xff] %vm1332_vm7, %v1263_v30  ;;  %v1269_v32 = vpop.permute.xlu0 %1268 }
 0x1b7   : > { %1633 = vrot.lane.b32.xlu1 %v1564_v36, %s5005_s14  ;;  %1349 = vst.msk [vmem:[#allocation3 + $0x80] sm:$0xff] %vm1332_vm7, %v1269_v32  ;;  %v1771_v36 = vld [vmem:[#allocation2 + $0x112] sm:$0xff] }
 0x1b8   : > { %1635 = vrot.lane.b32.xlu0 %v1565_v37, %s5005_s14  ;;  %v1772_v37 = vld [vmem:[#allocation2 + $0x122] sm:$0xff] }
 0x1b9   : > { %v1267_v39 = vpop.permute.xlu1 %1266 }
 0x1ba   : > { %1348 = vst.msk [vmem:[#allocation3 + $0x78] sm:$0xff] %vm1332_vm7, %v1267_v39  ;;  %v1273_v51 = vpop.permute.xlu0 %1272 }
 0x1bb   : > { %1826 = vrot.lane.b32.xlu1 %v1757_v45, %s5006_s17  ;;  %1351 = vst.msk [vmem:[#allocation3 + $0x90] sm:$0xff] %vm1332_vm7, %v1273_v51  ;;  %v1580_v45 = vld [vmem:[#allocation2 + $0x129] sm:$0xff] }
 0x1bc   : > { %1828 = vrot.lane.b32.xlu0 %v1758_v38, %s5006_s17  ;;  %v1581_v38 = vld [vmem:[#allocation2 + $0x139] sm:$0xff] }
 0x1bd   : > { %v1271_v54 = vpop.permute.xlu1 %1270 }
 0x1be   : > { %1350 = vst.msk [vmem:[#allocation3 + $0x88] sm:$0xff] %vm1332_vm7, %v1271_v54  ;;  %v1277_v57 = vpop.permute.xlu0 %1276 }
 0x1bf   : > { %1637 = vrot.lane.b32.xlu1 %v1566_v40, %s5005_s14  ;;  %1353 = vst.msk [vmem:[#allocation3 + $0xa0] sm:$0xff] %vm1332_vm7, %v1277_v57  ;;  %v1773_v40 = vld [vmem:[#allocation2 + $0x12a] sm:$0xff] }
 0x1c0   : > { %1639 = vrot.lane.b32.xlu0 %v1567_v52, %s5005_s14  ;;  %v1774_v52 = vld [vmem:[#allocation2 + $0x13a] sm:$0xff] }
 0x1c1   : > { %v1275_v59 = vpop.permute.xlu1 %1274 }
 0x1c2   : > { %1352 = vst.msk [vmem:[#allocation3 + $0x98] sm:$0xff] %vm1332_vm7, %v1275_v59  ;;  %v1281_v61 = vpop.permute.xlu0 %1280 }
 0x1c3   : > { %1830 = vrot.lane.b32.xlu1 %v1759_v55, %s5006_s17  ;;  %1355 = vst.msk [vmem:[#allocation3 + $0xb0] sm:$0xff] %vm1332_vm7, %v1281_v61  ;;  %v1582_v55 = vld [vmem:[#allocation2 + $0x141] sm:$0xff] }
 0x1c4   : > { %1832 = vrot.lane.b32.xlu0 %v1760_v58, %s5006_s17  ;;  %v1583_v58 = vld [vmem:[#allocation2 + $0x151] sm:$0xff] }
 0x1c5   : > { %v1279_v1 = vpop.permute.xlu1 %1278 }
 0x1c6   : > { %1354 = vst.msk [vmem:[#allocation3 + $0xa8] sm:$0xff] %vm1332_vm7, %v1279_v1  ;;  %v1285_v3 = vpop.permute.xlu0 %1284 }
 0x1c7   : > { %1641 = vrot.lane.b32.xlu1 %v1568_v60, %s5005_s14  ;;  %1357 = vst.msk [vmem:[#allocation3 + $0xc0] sm:$0xff] %vm1332_vm7, %v1285_v3  ;;  %v1775_v60 = vld [vmem:[#allocation2 + $0x142] sm:$0xff] }
 0x1c8   : > { %1643 = vrot.lane.b32.xlu0 %v1569_v62, %s5005_s14  ;;  %v1776_v62 = vld [vmem:[#allocation2 + $0x152] sm:$0xff] }
 0x1c9   : > { %v1283_v5 = vpop.permute.xlu1 %1282 }
 0x1ca   : > { %1356 = vst.msk [vmem:[#allocation3 + $0xb8] sm:$0xff] %vm1332_vm7, %v1283_v5  ;;  %v1289_v7 = vpop.permute.xlu0 %1288 }
 0x1cb   : > { %1834 = vrot.lane.b32.xlu1 %v1761_v2, %s5006_s17  ;;  %1359 = vst.msk [vmem:[#allocation3 + $0xd0] sm:$0xff] %vm1332_vm7, %v1289_v7  ;;  %v1584_v2 = vld [vmem:[#allocation2 + $0x159] sm:$0xff] }
 0x1cc   : > { %1836 = vrot.lane.b32.xlu0 %v1762_v4, %s5006_s17  ;;  %v1585_v4 = vld [vmem:[#allocation2 + $0x169] sm:$0xff] }
 0x1cd   : > { %v1287_v9 = vpop.permute.xlu1 %1286 }
 0x1ce   : > { %1358 = vst.msk [vmem:[#allocation3 + $0xc8] sm:$0xff] %vm1332_vm7, %v1287_v9  ;;  %v1293_v12 = vpop.permute.xlu0 %1292 }
 0x1cf   : > { %1645 = vrot.lane.b32.xlu1 %v1570_v6, %s5005_s14  ;;  %1361 = vst.msk [vmem:[#allocation3 + $0xe0] sm:$0xff] %vm1332_vm7, %v1293_v12  ;;  %v1777_v6 = vld [vmem:[#allocation2 + $0x15a] sm:$0xff] }
 0x1d0   : > { %1647 = vrot.lane.b32.xlu0 %v1571_v8, %s5005_s14  ;;  %v1778_v8 = vld [vmem:[#allocation2 + $0x16a] sm:$0xff] }
 0x1d1   : > { %v1291_v16 = vpop.permute.xlu1 %1290 }
 0x1d2   : > { %1360 = vst.msk [vmem:[#allocation3 + $0xd8] sm:$0xff] %vm1332_vm7, %v1291_v16  ;;  %v1297_v20 = vpop.permute.xlu0 %1296 }
 0x1d3   : > { %1838 = vrot.lane.b32.xlu1 %v1763_v10, %s5006_s17  ;;  %1363 = vst.msk [vmem:[#allocation3 + $0xf0] sm:$0xff] %vm1332_vm7, %v1297_v20  ;;  %v1586_v10 = vld [vmem:[#allocation2 + $0x171] sm:$0xff] }
 0x1d4   : > { %1840 = vrot.lane.b32.xlu0 %v1764_v13, %s5006_s17  ;;  %v1779_v20 = vld [vmem:[#allocation2 + $0x172] sm:$0xff] }
 0x1d5   : > { %v1295_v17 = vpop.permute.xlu1 %1294 }
 0x1d6   : > { %1362 = vst.msk [vmem:[#allocation3 + $0xe8] sm:$0xff] %vm1332_vm7, %v1295_v17  ;;  %v1431_v24 = vpop.permute.xlu0 %1430 }
 0x1d7   : > { %1649 = vrot.lane.b32.xlu1 %v1572_v41, %s5005_s14  ;;  %1527 = vst.msk [vmem:[#allocation3] sm:$0xff] %vm1526_vm9, %v1431_v24  ;;  %v1396_v24 = vld [vmem:[#allocation2 + $0x198] sm:$0xff] }
 0x1d8   : > { %1651 = vrot.lane.b32.xlu0 %v1573_v42, %s5005_s14 }
 0x1d9   : > { %v1299_v21 = vpop.permute.xlu1 %1298 }
 0x1da   : > { %1364 = vst.msk [vmem:[#allocation3 + $0xf8] sm:$0xff] %vm1332_vm7, %v1299_v21  ;;  %v1435_v47 = vpop.permute.xlu0 %1434 }
 0x1db   : > { %1842 = vrot.lane.b32.xlu1 %v1765_v43, %s5006_s17  ;;  %1529 = vst.msk [vmem:[#allocation3 + $0x10] sm:$0xff] %vm1526_vm9, %v1435_v47 }
 0x1dc   : > { %1844 = vrot.lane.b32.xlu0 %v1766_v44, %s5006_s17 }
 0x1dd   : > { %v1433_v50 = vpop.permute.xlu1 %1432 }
 0x1de   : > { %1528 = vst.msk [vmem:[#allocation3 + $0x8] sm:$0xff] %vm1526_vm9, %v1433_v50  ;;  %v1439_v28 = vpop.permute.xlu0 %1438 }
 0x1df   : > { %1653 = vrot.lane.b32.xlu1 %v1574_v0, %s5005_s14  ;;  %1531 = vst.msk [vmem:[#allocation3 + $0x20] sm:$0xff] %vm1526_vm9, %v1439_v28 }
 0x1e0   : > { %1655 = vrot.lane.b32.xlu0 %v1575_v53, %s5005_s14 }
 0x1e1   : > { %v1437_v63 = vpop.permute.xlu1 %1436 }
 0x1e2   : > { %1530 = vst.msk [vmem:[#allocation3 + $0x18] sm:$0xff] %vm1526_vm9, %v1437_v63  ;;  %v1443_v14 = vpop.permute.xlu0 %1442 }
 0x1e3   : > { %1846 = vrot.lane.b32.xlu1 %v1767_v56, %s5006_s17  ;;  %1533 = vst.msk [vmem:[#allocation3 + $0x30] sm:$0xff] %vm1526_vm9, %v1443_v14 }
 0x1e4   : > { %1848 = vrot.lane.b32.xlu0 %v1768_v11, %s5006_s17 }
 0x1e5   : > { %v1441_v34 = vpop.permute.xlu1 %1440 }
 0x1e6   : > { %1532 = vst.msk [vmem:[#allocation3 + $0x28] sm:$0xff] %vm1526_vm9, %v1441_v34  ;;  %v1447_v19 = vpop.permute.xlu0 %1446 }
 0x1e7   : > { %1657 = vrot.lane.b32.xlu1 %v1576_v15, %s5005_s14  ;;  %1535 = vst.msk [vmem:[#allocation3 + $0x40] sm:$0xff] %vm1526_vm9, %v1447_v19 }
 0x1e8   : > { %1659 = vrot.lane.b32.xlu0 %v1577_v18, %s5005_s14 }
 0x1e9   : > { %v1445_v35 = vpop.permute.xlu1 %1444 }
 0x1ea   : > { %1534 = vst.msk [vmem:[#allocation3 + $0x38] sm:$0xff] %vm1526_vm9, %v1445_v35  ;;  %v1451_v49 = vpop.permute.xlu0 %1450 }
 0x1eb   : > { %1850 = vrot.lane.b32.xlu1 %v1769_v22, %s5006_s17  ;;  %1537 = vst.msk [vmem:[#allocation3 + $0x50] sm:$0xff] %vm1526_vm9, %v1451_v49 }
 0x1ec   : > { %1852 = vrot.lane.b32.xlu0 %v1770_v23, %s5006_s17 }
 0x1ed   : > { %v1449_v33 = vpop.permute.xlu1 %1448 }
 0x1ee   : > { %1536 = vst.msk [vmem:[#allocation3 + $0x48] sm:$0xff] %vm1526_vm9, %v1449_v33  ;;  %v1455_v46 = vpop.permute.xlu0 %1454 }
 0x1ef   : > { %1661 = vrot.lane.b32.xlu1 %v1578_v48, %s5005_s14  ;;  %1539 = vst.msk [vmem:[#allocation3 + $0x60] sm:$0xff] %vm1526_vm9, %v1455_v46 }
 0x1f0   : > { %1663 = vrot.lane.b32.xlu0 %v1579_v25, %s5005_s14 }
 0x1f1   : > { %v1453_v30 = vpop.permute.xlu1 %1452 }
 0x1f2   : > { %1538 = vst.msk [vmem:[#allocation3 + $0x58] sm:$0xff] %vm1526_vm9, %v1453_v30  ;;  %v1459_v32 = vpop.permute.xlu0 %1458 }
 0x1f3   : > { %1854 = vrot.lane.b32.xlu1 %v1771_v36, %s5006_s17  ;;  %1541 = vst.msk [vmem:[#allocation3 + $0x70] sm:$0xff] %vm1526_vm9, %v1459_v32 }
 0x1f4   : > { %1856 = vrot.lane.b32.xlu0 %v1772_v37, %s5006_s17 }
 0x1f5   : > { %v1457_v39 = vpop.permute.xlu1 %1456 }
 0x1f6   : > { %1540 = vst.msk [vmem:[#allocation3 + $0x68] sm:$0xff] %vm1526_vm9, %v1457_v39  ;;  %v1463_v51 = vpop.permute.xlu0 %1462 }
 0x1f7   : > { %1665 = vrot.lane.b32.xlu1 %v1580_v45, %s5005_s14  ;;  %1543 = vst.msk [vmem:[#allocation3 + $0x80] sm:$0xff] %vm1526_vm9, %v1463_v51 }
 0x1f8   : > { %1667 = vrot.lane.b32.xlu0 %v1581_v38, %s5005_s14 }
 0x1f9   : > { %v1461_v54 = vpop.permute.xlu1 %1460 }
 0x1fa   : > { %1542 = vst.msk [vmem:[#allocation3 + $0x78] sm:$0xff] %vm1526_vm9, %v1461_v54  ;;  %v1467_v57 = vpop.permute.xlu0 %1466 }
 0x1fb   : > { %1858 = vrot.lane.b32.xlu1 %v1773_v40, %s5006_s17  ;;  %1545 = vst.msk [vmem:[#allocation3 + $0x90] sm:$0xff] %vm1526_vm9, %v1467_v57 }
 0x1fc   : > { %1860 = vrot.lane.b32.xlu0 %v1774_v52, %s5006_s17 }
 0x1fd   : > { %v1465_v59 = vpop.permute.xlu1 %1464 }
 0x1fe   : > { %1544 = vst.msk [vmem:[#allocation3 + $0x88] sm:$0xff] %vm1526_vm9, %v1465_v59  ;;  %v1471_v61 = vpop.permute.xlu0 %1470 }
 0x1ff   : > { %1669 = vrot.lane.b32.xlu1 %v1582_v55, %s5005_s14  ;;  %1547 = vst.msk [vmem:[#allocation3 + $0xa0] sm:$0xff] %vm1526_vm9, %v1471_v61 }
 0x200   : > { %1671 = vrot.lane.b32.xlu0 %v1583_v58, %s5005_s14 }
 0x201   : > { %v1469_v1 = vpop.permute.xlu1 %1468 }
 0x202   : > { %1546 = vst.msk [vmem:[#allocation3 + $0x98] sm:$0xff] %vm1526_vm9, %v1469_v1  ;;  %v1475_v3 = vpop.permute.xlu0 %1474 }
 0x203   : > { %1862 = vrot.lane.b32.xlu1 %v1775_v60, %s5006_s17  ;;  %1549 = vst.msk [vmem:[#allocation3 + $0xb0] sm:$0xff] %vm1526_vm9, %v1475_v3 }
 0x204   : > { %1864 = vrot.lane.b32.xlu0 %v1776_v62, %s5006_s17 }
 0x205   : > { %v1473_v5 = vpop.permute.xlu1 %1472 }
 0x206   : > { %1548 = vst.msk [vmem:[#allocation3 + $0xa8] sm:$0xff] %vm1526_vm9, %v1473_v5  ;;  %v1479_v7 = vpop.permute.xlu0 %1478 }
 0x207   : > { %1673 = vrot.lane.b32.xlu1 %v1584_v2, %s5005_s14  ;;  %1551 = vst.msk [vmem:[#allocation3 + $0xc0] sm:$0xff] %vm1526_vm9, %v1479_v7 }
 0x208   : > { %1675 = vrot.lane.b32.xlu0 %v1585_v4, %s5005_s14 }
 0x209   : > { %v1477_v9 = vpop.permute.xlu1 %1476 }
 0x20a   : > { %1550 = vst.msk [vmem:[#allocation3 + $0xb8] sm:$0xff] %vm1526_vm9, %v1477_v9  ;;  %v1483_v12 = vpop.permute.xlu0 %1482 }
 0x20b   : > { %1866 = vrot.lane.b32.xlu1 %v1777_v6, %s5006_s17  ;;  %1553 = vst.msk [vmem:[#allocation3 + $0xd0] sm:$0xff] %vm1526_vm9, %v1483_v12 }
 0x20c   : > { %1868 = vrot.lane.b32.xlu0 %v1778_v8, %s5006_s17 }
 0x20d   : > { %v1481_v16 = vpop.permute.xlu1 %1480 }
 0x20e   : > { %1552 = vst.msk [vmem:[#allocation3 + $0xc8] sm:$0xff] %vm1526_vm9, %v1481_v16  ;;  %v1487_v13 = vpop.permute.xlu0 %1486 }
 0x20f   : > { %1677 = vrot.lane.b32.xlu1 %v1586_v10, %s5005_s14  ;;  %1555 = vst.msk [vmem:[#allocation3 + $0xe0] sm:$0xff] %vm1526_vm9, %v1487_v13 }
 0x210   : > { %1679 = vrot.lane.b32.xlu0 %v5774_v29, %s5005_s14 }
 0x211   : > { %v1485_v41 = vpop.permute.xlu1 %1484 }
 0x212   : > { %1554 = vst.msk [vmem:[#allocation3 + $0xd8] sm:$0xff] %vm1526_vm9, %v1485_v41  ;;  %v1624_v17 = vpop.permute.xlu0 %1623 }
 0x213   : > { %1870 = vrot.lane.b32.xlu1 %v1779_v20, %s5006_s17  ;;  %1720 = vst.msk [vmem:[#allocation3] sm:$0xff] %vm1719_vm10, %v1624_v17 }
 0x214   : > { %1872 = vrot.lane.b32.xlu0 %v5874_v26, %s5006_s17  ;;  %v1397_v26 = vld [vmem:[#allocation2 + $0x1a0] sm:$0xff] }
 0x215   : > { %v1489_v42 = vpop.permute.xlu1 %1488 }
 0x216   : > { %1556 = vst.msk [vmem:[#allocation3 + $0xe8] sm:$0xff] %vm1526_vm9, %v1489_v42  ;;  %v1817_v29 = vpop.permute.xlu0 %1816 }
 0x217   : > { %1681 = vrot.lane.b32.xlu1 %v5784_v27, %s5005_s14  ;;  %1913 = vst.msk [vmem:[#allocation3] sm:$0xff] %vm1912_vm11, %v1817_v29 }
 0x218   : > { %1490 = vrot.lane.b32.xlu0 %v1396_v24, %s5004_s30 }
 0x219   : > { %v1626_v43 = vpop.permute.xlu1 %1625 }
 0x21a   : > { %1721 = vst.msk [vmem:[#allocation3 + $0x8] sm:$0xff] %vm1719_vm10, %v1626_v43  ;;  %v1628_v21 = vpop.permute.xlu0 %1627 }
 0x21b   : > { %1874 = vrot.lane.b32.xlu1 %v5884_v31, %s5006_s17  ;;  %1722 = vst.msk [vmem:[#allocation3 + $0x10] sm:$0xff] %vm1719_vm10, %v1628_v21 }
 0x21d   : > { %v1819_v44 = vpop.permute.xlu1 %1818 }
 0x21e   : > { %1914 = vst.msk [vmem:[#allocation3 + $0x8] sm:$0xff] %vm1912_vm11, %v1819_v44  ;;  %v1821_v27 = vpop.permute.xlu0 %1820  ;;  %v1945_v47 = vld [vmem:[#allocation3] sm:$0xff] }
 0x21f   : > { %1492 = vrot.lane.b32.xlu1 %v1397_v26, %s5004_s30  ;;  %1915 = vst.msk [vmem:[#allocation3 + $0x10] sm:$0xff] %vm1912_vm11, %v1821_v27  ;;  %4820 = vmatprep.mubr.msk.f32.mxu0 %vm1989_vm12, %v1945_v47 }
 0x221   : > { %v1630_v0 = vpop.permute.xlu1 %1629 }
 0x222   : > { %1723 = vst.msk [vmem:[#allocation3 + $0x18] sm:$0xff] %vm1719_vm10, %v1630_v0  ;;  %v1632_v31 = vpop.permute.xlu0 %1631 }
 0x223   : > { %1724 = vst.msk [vmem:[#allocation3 + $0x20] sm:$0xff] %vm1719_vm10, %v1632_v31 }
 0x225   : > { %v1823_v50 = vpop.permute.xlu1 %1822  ;;  %v1946_v53 = vld [vmem:[#allocation3 + $0x8] sm:$0xff] }
 0x226   : > { %1916 = vst.msk [vmem:[#allocation3 + $0x18] sm:$0xff] %vm1912_vm11, %v1823_v50  ;;  %4821 = vmatmul.mubr.msk.f32.vlgmr.msra.gmra.mrb[0].mxu0 %vm1989_vm12, %v1946_v53  ;;  %v1825_v28 = vpop.permute.xlu0 %1824  ;;  %v1947_v56 = vld [vmem:[#allocation3 + $0x10] sm:$0xff] }
 0x227   : > { %1917 = vst.msk [vmem:[#allocation3 + $0x20] sm:$0xff] %vm1912_vm11, %v1825_v28  ;;  %4823 = vmatprep.mubr.msk.f32.mxu0 %vm1989_vm12, %v1947_v56  ;;  %v1590_v53 = vld [vmem:[#allocation2 + $0x1a1] sm:$0xff]  ;;  %v7402_v56 = vmov 0.0  }
 0x228   : > { %2412 = vst.msk [vmem:[#allocation4] sm:$0xff] %vm2411_vm13, %v7402_v56  ;;  %2413 = vst.msk [vmem:[#allocation4 + $0x8] sm:$0xff] %vm2411_vm13, %v7402_v56  ;;  %1685 = vrot.lane.b32.xlu1 %v1590_v53, %s5005_s14 }
 0x229   : > { %v1634_v63 = vpop.permute.xlu1 %1633  ;;  %2417 = vst.msk [vmem:[#allocation4 + $0x198] sm:$0xff] %vm2411_vm13, %v7402_v56  ;;  %2418 = vst.msk [vmem:[#allocation4 + $0x1a0] sm:$0xff] %vm2411_vm13, %v7402_v56 }
 0x22a   : > { %1725 = vst.msk [vmem:[#allocation3 + $0x28] sm:$0xff] %vm1719_vm10, %v1634_v63  ;;  %v1636_v11 = vpop.permute.xlu0 %1635  ;;  %v1589_v63 = vld [vmem:[#allocation2 + $0x199] sm:$0xff] }
 0x22b   : > { %1726 = vst.msk [vmem:[#allocation3 + $0x30] sm:$0xff] %vm1719_vm10, %v1636_v11  ;;  %1683 = vrot.lane.b32.xlu0 %v1589_v63, %s5005_s14 }
 0x22c   : > { %2415 = vst.msk [vmem:[#allocation4 + $0x10] sm:$0x3] %vm2414_vm14, %v7402_v56  ;;  %2419 = vst.msk [vmem:[#allocation4 + $0x1a8] sm:$0x3] %vm2414_vm14, %v7402_v56 }
 0x22d   : > { %v1827_v14 = vpop.permute.xlu1 %1826  ;;  %v1948_v15 = vld [vmem:[#allocation3 + $0x18] sm:$0xff]  ;;  %2421 = vst.msk [vmem:[#allocation4] sm:$0x1] %vm2420_vm15, %v7402_v56  ;;  %2422 = vst.msk [vmem:[#allocation4 + $0x18] sm:$0x1] %vm2420_vm15, %v7402_v56 }
 0x22e   : > { %1918 = vst.msk [vmem:[#allocation3 + $0x28] sm:$0xff] %vm1912_vm11, %v1827_v14  ;;  %4824 = vmatmul.mubr.msk.f32.gmra.mrb[2].mxu0 %vm1989_vm12, %v1948_v15  ;;  %v1829_v34 = vpop.permute.xlu0 %1828  ;;  %v1949_v18 = vld [vmem:[#allocation3 + $0x20] sm:$0xff]  ;;  %v1783_v15 = vld [vmem:[#allocation2 + $0x1a2] sm:$0xff] }
 0x22f   : > { %1919 = vst.msk [vmem:[#allocation3 + $0x30] sm:$0xff] %vm1912_vm11, %v1829_v34  ;;  %4826 = vmatprep.mubr.msk.f32.mxu0 %vm1989_vm12, %v1949_v18  ;;  %1878 = vrot.lane.b32.xlu1 %v1783_v15, %s5006_s17 }
 0x230   : > { %2423 = vst.msk [vmem:[#allocation4 + $0x30] sm:$0x1] %vm2420_vm15, %v7402_v56  ;;  %2424 = vst.msk [vmem:[#allocation4 + $0x48] sm:$0x1] %vm2420_vm15, %v7402_v56 }
 0x231   : > { %v1638_v19 = vpop.permute.xlu1 %1637  ;;  %2425 = vst.msk [vmem:[#allocation4 + $0x60] sm:$0x1] %vm2420_vm15, %v7402_v56  ;;  %2426 = vst.msk [vmem:[#allocation4 + $0x78] sm:$0x1] %vm2420_vm15, %v7402_v56 }
 0x232   : > { %1727 = vst.msk [vmem:[#allocation3 + $0x38] sm:$0xff] %vm1719_vm10, %v1638_v19  ;;  %v1640_v22 = vpop.permute.xlu0 %1639  ;;  %v1782_v19 = vld [vmem:[#allocation2 + $0x19a] sm:$0xff] }
 0x233   : > { %1728 = vst.msk [vmem:[#allocation3 + $0x40] sm:$0xff] %vm1719_vm10, %v1640_v22  ;;  %1876 = vrot.lane.b32.xlu0 %v1782_v19, %s5006_s17 }
 0x234   : > { %2427 = vst.msk [vmem:[#allocation4 + $0x90] sm:$0x1] %vm2420_vm15, %v7402_v56  ;;  %2428 = vst.msk [vmem:[#allocation4 + $0xa8] sm:$0x1] %vm2420_vm15, %v7402_v56 }
 0x235   : > { %v1831_v35 = vpop.permute.xlu1 %1830  ;;  %v1950_v23 = vld [vmem:[#allocation3 + $0x28] sm:$0xff]  ;;  %2429 = vst.msk [vmem:[#allocation4 + $0xc0] sm:$0x1] %vm2420_vm15, %v7402_v56  ;;  %2430 = vst.msk [vmem:[#allocation4 + $0xd8] sm:$0x1] %vm2420_vm15, %v7402_v56 }
 0x236   : > { %1920 = vst.msk [vmem:[#allocation3 + $0x38] sm:$0xff] %vm1912_vm11, %v1831_v35  ;;  %4827 = vmatmul.mubr.msk.f32.gmra.mrb[4].mxu0 %vm1989_vm12, %v1950_v23  ;;  %v1833_v49 = vpop.permute.xlu0 %1832  ;;  %v1951_v48 = vld [vmem:[#allocation3 + $0x30] sm:$0xff] }
 0x237   : > { %1921 = vst.msk [vmem:[#allocation3 + $0x40] sm:$0xff] %vm1912_vm11, %v1833_v49  ;;  %4829 = vmatprep.mubr.msk.f32.mxu0 %vm1989_vm12, %v1951_v48  ;;  %v2555_v35 = vld [vmem:[#allocation4 + $0x9] sm:$0xff]  ;;  %v2554_v49 = vld [vmem:[#allocation4 + $0x1] sm:$0xff] }
 0x238   : > { %2431 = vst.msk [vmem:[#allocation4 + $0xf0] sm:$0x1] %vm2420_vm15, %v7402_v56  ;;  %2432 = vst.msk [vmem:[#allocation4 + $0x108] sm:$0x1] %vm2420_vm15, %v7402_v56  ;;  %2620 = vrot.lane.b32.xlu1 %v2555_v35, %s5000_s26  ;;  %2618 = vrot.lane.b32.xlu0 %v2554_v49, %s5000_s26 }
 0x239   : > { %v1642_v33 = vpop.permute.xlu1 %1641  ;;  %2433 = vst.msk [vmem:[#allocation4 + $0x120] sm:$0x1] %vm2420_vm15, %v7402_v56  ;;  %2434 = vst.msk [vmem:[#allocation4 + $0x138] sm:$0x1] %vm2420_vm15, %v7402_v56 }
 0x23a   : > { %1729 = vst.msk [vmem:[#allocation3 + $0x48] sm:$0xff] %vm1719_vm10, %v1642_v33  ;;  %v1644_v25 = vpop.permute.xlu0 %1643 }
 0x23b   : > { %1730 = vst.msk [vmem:[#allocation3 + $0x50] sm:$0xff] %vm1719_vm10, %v1644_v25 }
 0x23c   : > { %2435 = vst.msk [vmem:[#allocation4 + $0x150] sm:$0x1] %vm2420_vm15, %v7402_v56  ;;  %2436 = vst.msk [vmem:[#allocation4 + $0x168] sm:$0x1] %vm2420_vm15, %v7402_v56 }
 0x23d   : > { %v1835_v46 = vpop.permute.xlu1 %1834  ;;  %v1952_v36 = vld [vmem:[#allocation3 + $0x38] sm:$0xff]  ;;  %2437 = vst.msk [vmem:[#allocation4 + $0x180] sm:$0x1] %vm2420_vm15, %v7402_v56  ;;  %2438 = vst.msk [vmem:[#allocation4 + $0x198] sm:$0x1] %vm2420_vm15, %v7402_v56 }
 0x23e   : > { %1922 = vst.msk [vmem:[#allocation3 + $0x48] sm:$0xff] %vm1912_vm11, %v1835_v46  ;;  %4830 = vmatmul.mubr.msk.f32.gmra.mrb[6].mxu0 %vm1989_vm12, %v1952_v36  ;;  %v1837_v30 = vpop.permute.xlu0 %1836  ;;  %v1953_v37 = vld [vmem:[#allocation3 + $0x40] sm:$0xff] }
 0x23f   : > { %1923 = vst.msk [vmem:[#allocation3 + $0x50] sm:$0xff] %vm1912_vm11, %v1837_v30  ;;  %4832 = vmatprep.mubr.msk.f32.mxu0 %vm1989_vm12, %v1953_v37 }
 0x240   : > { %2439 = vst.msk [vmem:[#allocation4 + $0x11] sm:$0x1] %vm2420_vm15, %v7402_v56  ;;  %2440 = vst.msk [vmem:[#allocation4 + $0x29] sm:$0x1] %vm2420_vm15, %v7402_v56 }
 0x241   : > { %v1646_v32 = vpop.permute.xlu1 %1645  ;;  %2441 = vst.msk [vmem:[#allocation4 + $0x41] sm:$0x1] %vm2420_vm15, %v7402_v56  ;;  %2442 = vst.msk [vmem:[#allocation4 + $0x59] sm:$0x1] %vm2420_vm15, %v7402_v56 }
 0x242   : > { %1731 = vst.msk [vmem:[#allocation3 + $0x58] sm:$0xff] %vm1719_vm10, %v1646_v32  ;;  %v1648_v45 = vpop.permute.xlu0 %1647 }
 0x243   : > { %1732 = vst.msk [vmem:[#allocation3 + $0x60] sm:$0xff] %vm1719_vm10, %v1648_v45 }
 0x244   : > { %2443 = vst.msk [vmem:[#allocation4 + $0x71] sm:$0x1] %vm2420_vm15, %v7402_v56  ;;  %2444 = vst.msk [vmem:[#allocation4 + $0x89] sm:$0x1] %vm2420_vm15, %v7402_v56 }
 0x245   : > { %v1839_v39 = vpop.permute.xlu1 %1838  ;;  %v1954_v38 = vld [vmem:[#allocation3 + $0x48] sm:$0xff]  ;;  %2445 = vst.msk [vmem:[#allocation4 + $0xa1] sm:$0x1] %vm2420_vm15, %v7402_v56  ;;  %2446 = vst.msk [vmem:[#allocation4 + $0xb9] sm:$0x1] %vm2420_vm15, %v7402_v56 }
 0x246   : > { %1924 = vst.msk [vmem:[#allocation3 + $0x58] sm:$0xff] %vm1912_vm11, %v1839_v39  ;;  %4833 = vmatmul.mubr.msk.f32.gmra.mrb[8].mxu0 %vm1989_vm12, %v1954_v38  ;;  %v1841_v51 = vpop.permute.xlu0 %1840  ;;  %v1955_v40 = vld [vmem:[#allocation3 + $0x50] sm:$0xff] }
 0x247   : > { %1925 = vst.msk [vmem:[#allocation3 + $0x60] sm:$0xff] %vm1912_vm11, %v1841_v51  ;;  %4835 = vmatprep.mubr.msk.f32.mxu0 %vm1989_vm12, %v1955_v40 }
 0x248   : > { %2447 = vst.msk [vmem:[#allocation4 + $0xd1] sm:$0x1] %vm2420_vm15, %v7402_v56  ;;  %2448 = vst.msk [vmem:[#allocation4 + $0xe9] sm:$0x1] %vm2420_vm15, %v7402_v56 }
 0x249   : > { %v1650_v54 = vpop.permute.xlu1 %1649  ;;  %2449 = vst.msk [vmem:[#allocation4 + $0x101] sm:$0x1] %vm2420_vm15, %v7402_v56  ;;  %2450 = vst.msk [vmem:[#allocation4 + $0x119] sm:$0x1] %vm2420_vm15, %v7402_v56 }
 0x24a   : > { %1733 = vst.msk [vmem:[#allocation3 + $0x68] sm:$0xff] %vm1719_vm10, %v1650_v54  ;;  %v1652_v52 = vpop.permute.xlu0 %1651  ;;  %v2491_v54 = vld [vmem:[#allocation4 + $0x8] sm:$0xff] }
 0x24b   : > { %1734 = vst.msk [vmem:[#allocation3 + $0x70] sm:$0xff] %vm1719_vm10, %v1652_v52  ;;  %v2490_v52 = vld [vmem:[#allocation4] sm:$0xff] }
 0x24c   : > { %2451 = vst.msk [vmem:[#allocation4 + $0x131] sm:$0x1] %vm2420_vm15, %v7402_v56  ;;  %2452 = vst.msk [vmem:[#allocation4 + $0x149] sm:$0x1] %vm2420_vm15, %v7402_v56 }
 0x24d   : > { %v1843_v57 = vpop.permute.xlu1 %1842  ;;  %v1956_v55 = vld [vmem:[#allocation3 + $0x58] sm:$0xff]  ;;  %2453 = vst.msk [vmem:[#allocation4 + $0x161] sm:$0x1] %vm2420_vm15, %v7402_v56  ;;  %2454 = vst.msk [vmem:[#allocation4 + $0x179] sm:$0x1] %vm2420_vm15, %v7402_v56 }
 0x24e   : > { %1926 = vst.msk [vmem:[#allocation3 + $0x68] sm:$0xff] %vm1912_vm11, %v1843_v57  ;;  %4836 = vmatmul.mubr.msk.f32.gmra.mrb[10].mxu0 %vm1989_vm12, %v1956_v55  ;;  %v1845_v59 = vpop.permute.xlu0 %1844  ;;  %v1957_v58 = vld [vmem:[#allocation3 + $0x60] sm:$0xff] }
 0x24f   : > { %1927 = vst.msk [vmem:[#allocation3 + $0x70] sm:$0xff] %vm1912_vm11, %v1845_v59  ;;  %4838 = vmatprep.mubr.msk.f32.mxu0 %vm1989_vm12, %v1957_v58 }
 0x250   : > { %2455 = vst.msk [vmem:[#allocation4 + $0x191] sm:$0x1] %vm2420_vm15, %v7402_v56  ;;  %2456 = vst.msk [vmem:[#allocation4 + $0x1a9] sm:$0x1] %vm2420_vm15, %v7402_v56 }
 0x251   : > { %v1654_v61 = vpop.permute.xlu1 %1653  ;;  %2523 = vst.msk [vmem:[#allocation5 + $0x8] sm:$0xff] %vm2411_vm13, %v2491_v54  ;;  %2522 = vst.msk [vmem:[#allocation5] sm:$0xff] %vm2411_vm13, %v2490_v52 }
 0x252   : > { %1735 = vst.msk [vmem:[#allocation3 + $0x78] sm:$0xff] %vm1719_vm10, %v1654_v61  ;;  %v1656_v60 = vpop.permute.xlu0 %1655  ;;  %v6308_v61 = vld [vmem:[%s7305_s2] ss:$0 sm:$0xff] }
 0x253   : > { %1736 = vst.msk [vmem:[#allocation3 + $0x80] sm:$0xff] %vm1719_vm10, %v1656_v60 }
 0x255   : > { %v1847_v1 = vpop.permute.xlu1 %1846  ;;  %v1958_v62 = vld [vmem:[#allocation3 + $0x68] sm:$0xff] }
 0x256   : > { %1928 = vst.msk [vmem:[#allocation3 + $0x78] sm:$0xff] %vm1912_vm11, %v1847_v1  ;;  %4839 = vmatmul.mubr.msk.f32.gmra.mrb[12].mxu0 %vm1989_vm12, %v1958_v62  ;;  %v1849_v3 = vpop.permute.xlu0 %1848  ;;  %v1959_v2 = vld [vmem:[#allocation3 + $0x70] sm:$0xff] }
 0x257   : > { %1929 = vst.msk [vmem:[#allocation3 + $0x80] sm:$0xff] %vm1912_vm11, %v1849_v3  ;;  %4841 = vmatprep.mubr.msk.f32.mxu0 %vm1989_vm12, %v1959_v2 }
 0x259   : > { %v1658_v5 = vpop.permute.xlu1 %1657 }
 0x25a   : > { %1737 = vst.msk [vmem:[#allocation3 + $0x88] sm:$0xff] %vm1719_vm10, %v1658_v5  ;;  %v1660_v4 = vpop.permute.xlu0 %1659 }
 0x25b   : > { %1738 = vst.msk [vmem:[#allocation3 + $0x90] sm:$0xff] %vm1719_vm10, %v1660_v4 }
 0x25d   : > { %v1851_v7 = vpop.permute.xlu1 %1850  ;;  %v1960_v6 = vld [vmem:[#allocation3 + $0x78] sm:$0xff] }
 0x25e   : > { %1930 = vst.msk [vmem:[#allocation3 + $0x88] sm:$0xff] %vm1912_vm11, %v1851_v7  ;;  %4842 = vmatmul.mubr.msk.f32.gmra.mrb[14].mxu0 %vm1989_vm12, %v1960_v6  ;;  %v1853_v9 = vpop.permute.xlu0 %1852  ;;  %v1961_v8 = vld [vmem:[#allocation3 + $0x80] sm:$0xff] }
 0x25f   : > { %1931 = vst.msk [vmem:[#allocation3 + $0x90] sm:$0xff] %vm1912_vm11, %v1853_v9  ;;  %4844 = vmatprep.mubr.msk.f32.mxu0 %vm1989_vm12, %v1961_v8 }
 0x261   : > { %v1662_v12 = vpop.permute.xlu1 %1661 }
 0x262   : > { %1739 = vst.msk [vmem:[#allocation3 + $0x98] sm:$0xff] %vm1719_vm10, %v1662_v12  ;;  %v1664_v10 = vpop.permute.xlu0 %1663 }
 0x263   : > { %1740 = vst.msk [vmem:[#allocation3 + $0xa0] sm:$0xff] %vm1719_vm10, %v1664_v10 }
 0x265   : > { %v1855_v16 = vpop.permute.xlu1 %1854  ;;  %v1962_v13 = vld [vmem:[#allocation3 + $0x88] sm:$0xff] }
 0x266   : > { %1932 = vst.msk [vmem:[#allocation3 + $0x98] sm:$0xff] %vm1912_vm11, %v1855_v16  ;;  %4845 = vmatmul.mubr.msk.f32.gmra.mrb[16].mxu0 %vm1989_vm12, %v1962_v13  ;;  %v1857_v20 = vpop.permute.xlu0 %1856  ;;  %v1963_v41 = vld [vmem:[#allocation3 + $0x90] sm:$0xff] }
 0x267   : > { %1933 = vst.msk [vmem:[#allocation3 + $0xa0] sm:$0xff] %vm1912_vm11, %v1857_v20  ;;  %4847 = vmatprep.mubr.msk.f32.mxu0 %vm1989_vm12, %v1963_v41 }
 0x269   : > { %v1666_v17 = vpop.permute.xlu1 %1665 }
 0x26a   : > { %1741 = vst.msk [vmem:[#allocation3 + $0xa8] sm:$0xff] %vm1719_vm10, %v1666_v17  ;;  %v1668_v42 = vpop.permute.xlu0 %1667 }
 0x26b   : > { %1742 = vst.msk [vmem:[#allocation3 + $0xb0] sm:$0xff] %vm1719_vm10, %v1668_v42 }
 0x26d   : > { %v1859_v24 = vpop.permute.xlu1 %1858  ;;  %v1964_v29 = vld [vmem:[#allocation3 + $0x98] sm:$0xff] }
 0x26e   : > { %1934 = vst.msk [vmem:[#allocation3 + $0xa8] sm:$0xff] %vm1912_vm11, %v1859_v24  ;;  %4848 = vmatmul.mubr.msk.f32.gmra.mrb[18].mxu0 %vm1989_vm12, %v1964_v29  ;;  %v1861_v43 = vpop.permute.xlu0 %1860  ;;  %v1965_v21 = vld [vmem:[#allocation3 + $0xa0] sm:$0xff] }
 0x26f   : > { %1935 = vst.msk [vmem:[#allocation3 + $0xb0] sm:$0xff] %vm1912_vm11, %v1861_v43  ;;  %4850 = vmatprep.mubr.msk.f32.mxu0 %vm1989_vm12, %v1965_v21 }
 0x271   : > { %v1670_v26 = vpop.permute.xlu1 %1669 }
 0x272   : > { %1743 = vst.msk [vmem:[#allocation3 + $0xb8] sm:$0xff] %vm1719_vm10, %v1670_v26  ;;  %v1672_v44 = vpop.permute.xlu0 %1671 }
 0x273   : > { %1744 = vst.msk [vmem:[#allocation3 + $0xc0] sm:$0xff] %vm1719_vm10, %v1672_v44 }
 0x275   : > { %v1863_v27 = vpop.permute.xlu1 %1862  ;;  %v1966_v47 = vld [vmem:[#allocation3 + $0xa8] sm:$0xff] }
 0x276   : > { %1936 = vst.msk [vmem:[#allocation3 + $0xb8] sm:$0xff] %vm1912_vm11, %v1863_v27  ;;  %4851 = vmatmul.mubr.msk.f32.gmra.mrb[20].mxu0 %vm1989_vm12, %v1966_v47  ;;  %v1865_v0 = vpop.permute.xlu0 %1864  ;;  %v1967_v31 = vld [vmem:[#allocation3 + $0xb0] sm:$0xff] }
 0x277   : > { %1937 = vst.msk [vmem:[#allocation3 + $0xc0] sm:$0xff] %vm1912_vm11, %v1865_v0  ;;  %4853 = vmatprep.mubr.msk.f32.mxu0 %vm1989_vm12, %v1967_v31 }
 0x279   : > { %v1674_v50 = vpop.permute.xlu1 %1673 }
 0x27a   : > { %1745 = vst.msk [vmem:[#allocation3 + $0xc8] sm:$0xff] %vm1719_vm10, %v1674_v50  ;;  %v1676_v28 = vpop.permute.xlu0 %1675 }
 0x27b   : > { %1746 = vst.msk [vmem:[#allocation3 + $0xd0] sm:$0xff] %vm1719_vm10, %v1676_v28 }
 0x27d   : > { %v1867_v11 = vpop.permute.xlu1 %1866  ;;  %v1968_v14 = vld [vmem:[#allocation3 + $0xb8] sm:$0xff] }
 0x27e   : > { %1938 = vst.msk [vmem:[#allocation3 + $0xc8] sm:$0xff] %vm1912_vm11, %v1867_v11  ;;  %4854 = vmatmul.mubr.msk.f32.gmra.mrb[22].mxu0 %vm1989_vm12, %v1968_v14  ;;  %v1869_v34 = vpop.permute.xlu0 %1868  ;;  %v1969_v18 = vld [vmem:[#allocation3 + $0xc0] sm:$0xff] }
 0x27f   : > { %1939 = vst.msk [vmem:[#allocation3 + $0xd0] sm:$0xff] %vm1912_vm11, %v1869_v34  ;;  %4856 = vmatprep.mubr.msk.f32.mxu0 %vm1989_vm12, %v1969_v18 }
 0x281   : > { %v1678_v22 = vpop.permute.xlu1 %1677 }
 0x282   : > { %1747 = vst.msk [vmem:[#allocation3 + $0xd8] sm:$0xff] %vm1719_vm10, %v1678_v22  ;;  %v1680_v23 = vpop.permute.xlu0 %1679 }
 0x283   : > { %1748 = vst.msk [vmem:[#allocation3 + $0xe0] sm:$0xff] %vm1719_vm10, %v1680_v23 }
 0x285   : > { %v1871_v48 = vpop.permute.xlu1 %1870  ;;  %v1970_v33 = vld [vmem:[#allocation3 + $0xc8] sm:$0xff] }
 0x286   : > { %1940 = vst.msk [vmem:[#allocation3 + $0xd8] sm:$0xff] %vm1912_vm11, %v1871_v48  ;;  %4857 = vmatmul.mubr.msk.f32.gmra.mrb[24].mxu0 %vm1989_vm12, %v1970_v33  ;;  %v1873_v25 = vpop.permute.xlu0 %1872  ;;  %v1971_v46 = vld [vmem:[#allocation3 + $0xd0] sm:$0xff] }
 0x287   : > { %1941 = vst.msk [vmem:[#allocation3 + $0xe0] sm:$0xff] %vm1912_vm11, %v1873_v25  ;;  %4859 = vmatprep.mubr.msk.f32.mxu0 %vm1989_vm12, %v1971_v46 }
 0x289   : > { %v1682_v36 = vpop.permute.xlu1 %1681 }
 0x28a   : > { %1749 = vst.msk [vmem:[#allocation3 + $0xe8] sm:$0xff] %vm1719_vm10, %v1682_v36  ;;  %v1491_v38 = vpop.permute.xlu0 %1490 }
 0x28b   : > { %1557 = vst.msk [vmem:[#allocation3 + $0xf0] sm:$0xff] %vm1526_vm9, %v1491_v38 }
 0x28d   : > { %v1875_v30 = vpop.permute.xlu1 %1874  ;;  %v1972_v37 = vld [vmem:[#allocation3 + $0xd8] sm:$0xff] }
 0x28e   : > { %1942 = vst.msk [vmem:[#allocation3 + $0xe8] sm:$0xff] %vm1912_vm11, %v1875_v30  ;;  %4860 = vmatmul.mubr.msk.f32.gmra.mrb[26].mxu0 %vm1989_vm12, %v1972_v37  ;;  %v1973_v32 = vld [vmem:[#allocation3 + $0xe0] sm:$0xff] }
 0x28f   : > { %4862 = vmatprep.mubr.msk.f32.mxu0 %vm1989_vm12, %v1973_v32 }
 0x291   : > { %v1493_v39 = vpop.permute.xlu1 %1492 }
 0x292   : > { %1558 = vst.msk [vmem:[#allocation3 + $0xf8] sm:$0xff] %vm1526_vm9, %v1493_v39 }
 0x295   : > { %v1974_v45 = vld [vmem:[#allocation3 + $0xe8] sm:$0xff] }
 0x296   : > { %4863 = vmatmul.mubr.msk.f32.gmra.mrb[28].mxu0 %vm1989_vm12, %v1974_v45 }
 0x29a   : > { %v1686_v51 = vpop.permute.xlu1 %1685 }
 0x29b   : > { %1751 = vst.msk [vmem:[#allocation3 + $0xf8] sm:$0xff] %vm1719_vm10, %v1686_v51 }
 0x29d   : > { %v1684_v40 = vpop.permute.xlu0 %1683 }
 0x29e   : > { %1750 = vst.msk [vmem:[#allocation3 + $0xf0] sm:$0xff] %vm1719_vm10, %v1684_v40 }
 0x2a1   : > { %v1879_v57 = vpop.permute.xlu1 %1878 }
 0x2a2   : > { %1944 = vst.msk [vmem:[#allocation3 + $0xf8] sm:$0xff] %vm1912_vm11, %v1879_v57 }
 0x2a5   : > { %v1877_v55 = vpop.permute.xlu0 %1876 }
 0x2a6   : > { %1943 = vst.msk [vmem:[#allocation3 + $0xf0] sm:$0xff] %vm1912_vm11, %v1877_v55 }
 0x2aa   : > { %v2621_v59 = vpop.permute.xlu1 %2620  ;;  %v2619_v58 = vpop.permute.xlu0 %2618 }
 0x2ab   : > { %2716 = vst.msk [vmem:[#allocation5 + $0x8] sm:$0xff] %vm2714_vm0, %v2621_v59  ;;  %2715 = vst.msk [vmem:[#allocation5] sm:$0xff] %vm2714_vm0, %v2619_v58 }
 0x2f9   : > { %v4822_v60 = vpop.f32.mrb[0].mxu0 }
 0x2fa   : > { %v2162_v1 = vadd.f32 %v4822_v60, %v6308_v61  ;;  %v2156_v62 = vpop.f32.mrb[1].mxu0 }
 0x2fb   : > { %v2157_v3 = vadd.f32 %v6308_v61, %v2156_v62 }
 0x2fc   : > { %vm2316_vm1 = vcmp.ge.f32.partialorder %v2162_v1, 0.0  ;;  %v2348_v2 = vmul.f32 0.2, %v2162_v1 }
 0x2fd   : > { %vm2315_vm2 = vcmp.ge.f32.partialorder %v2157_v3, 0.0  ;;  %v2347_v5 = vmul.f32 0.2, %v2157_v3 }
 0x2fe   : > { %v2380_v4 = vsel %vm2316_vm1, %v2162_v1, %v2348_v2 }
 0x2ff   : > { %2459 = vst.msk [vmem:[#allocation4 + $0x21] sm:$0xff] %vm2411_vm13, %v2380_v4  ;;  %v2379_v7 = vsel %vm2315_vm2, %v2157_v3, %v2347_v5 }
 0x300   : > { %2458 = vst.msk [vmem:[#allocation4 + $0x19] sm:$0xff] %vm2411_vm13, %v2379_v7 }
 0x301   : > { %v4825_v6 = vpop.f32.mrb[2].mxu0 }
 0x302   : > { %v2172_v9 = vadd.f32 %v4825_v6, %v6308_v61  ;;  %v2166_v8 = vpop.f32.mrb[3].mxu0 }
 0x303   : > { %v2167_v12 = vadd.f32 %v6308_v61, %v2166_v8  ;;  %v1975_v8 = vld [vmem:[#allocation3 + $0xf0] sm:$0xff] }
 0x304   : > { %vm2318_vm3 = vcmp.ge.f32.partialorder %v2172_v9, 0.0  ;;  %v2350_v10 = vmul.f32 0.2, %v2172_v9  ;;  %4865 = vmatprep.mubr.msk.f32.mxu0 %vm1989_vm12, %v1975_v8 }
 0x305   : > { %vm2317_vm4 = vcmp.ge.f32.partialorder %v2167_v12, 0.0  ;;  %v2349_v16 = vmul.f32 0.2, %v2167_v12 }
 0x306   : > { %v2382_v13 = vsel %vm2318_vm3, %v2172_v9, %v2350_v10  ;;  %v2557_v20 = vld [vmem:[#allocation4 + $0x21] sm:$0xff] }
 0x307   : > { %2461 = vst.msk [vmem:[#allocation4 + $0x39] sm:$0xff] %vm2411_vm13, %v2382_v13  ;;  %v2381_v41 = vsel %vm2317_vm4, %v2167_v12, %v2349_v16  ;;  %2624 = vrot.lane.b32.xlu1 %v2557_v20, %s5000_s26  ;;  %v2556_v17 = vld [vmem:[#allocation4 + $0x19] sm:$0xff] }
 0x308   : > { %v6319_v42 = vld [vmem:[#allocation4 + $0x20] sm:$0xff]  ;;  %v6321_v24 = vld [vmem:[#allocation4 + $0x18] sm:$0xff]  ;;  %2460 = vst.msk [vmem:[#allocation4 + $0x31] sm:$0xff] %vm2411_vm13, %v2381_v41  ;;  %2622 = vrot.lane.b32.xlu0 %v2556_v17, %s5000_s26 }
 0x309   : > { %2525 = vst.msk [vmem:[#allocation5 + $0x18] sm:$0xff] %vm2411_vm13, %v6319_v42  ;;  %2524 = vst.msk [vmem:[#allocation5 + $0x10] sm:$0xff] %vm2411_vm13, %v6321_v24  ;;  %v4828_v29 = vpop.f32.mrb[4].mxu0 }
 0x30a   : > { %v2182_v43 = vadd.f32 %v4828_v29, %v6308_v61  ;;  %v2176_v21 = vpop.f32.mrb[5].mxu0  ;;  %v1976_v29 = vld [vmem:[#allocation3 + $0xf8] sm:$0xff] }
 0x30b   : > { %v2177_v26 = vadd.f32 %v6308_v61, %v2176_v21  ;;  %4866 = vmatmul.mubr.msk.f32.gmra.mrb[30].mxu0 %vm1989_vm12, %v1976_v29 }
 0x30c   : > { %vm2320_vm5 = vcmp.ge.f32.partialorder %v2182_v43, 0.0  ;;  %v2352_v44 = vmul.f32 0.2, %v2182_v43 }
 0x30d   : > { %vm2319_vm6 = vcmp.ge.f32.partialorder %v2177_v26, 0.0  ;;  %v2351_v27 = vmul.f32 0.2, %v2177_v26 }
 0x30e   : > { %v2384_v47 = vsel %vm2320_vm5, %v2182_v43, %v2352_v44  ;;  %v6331_v0 = vld [vmem:[#allocation4 + $0x39] sm:$0xff] }
 0x30f   : > { %2463 = vst.msk [vmem:[#allocation4 + $0x51] sm:$0xff] %vm2411_vm13, %v2384_v47  ;;  %v2383_v31 = vsel %vm2319_vm6, %v2177_v26, %v2351_v27  ;;  %2628 = vrot.lane.b32.xlu1 %v6331_v0, %s5000_s26  ;;  %v6336_v50 = vld [vmem:[#allocation4 + $0x31] sm:$0xff] }
 0x310   : > { %v6338_v53 = vld [vmem:[#allocation4 + $0x38] sm:$0xff]  ;;  %v6340_v28 = vld [vmem:[#allocation4 + $0x30] sm:$0xff]  ;;  %2462 = vst.msk [vmem:[#allocation4 + $0x49] sm:$0xff] %vm2411_vm13, %v2383_v31  ;;  %2626 = vrot.lane.b32.xlu0 %v6336_v50, %s5000_s26 }
 0x311   : > { %2527 = vst.msk [vmem:[#allocation5 + $0x28] sm:$0xff] %vm2411_vm13, %v6338_v53  ;;  %2526 = vst.msk [vmem:[#allocation5 + $0x20] sm:$0xff] %vm2411_vm13, %v6340_v28  ;;  %v4831_v56 = vpop.f32.mrb[6].mxu0 }
 0x312   : > { %v2192_v63 = vadd.f32 %v4831_v56, %v6308_v61  ;;  %v2186_v11 = vpop.f32.mrb[7].mxu0 }
 0x313   : > { %v2187_v14 = vadd.f32 %v6308_v61, %v2186_v11 }
 0x314   : > { %vm2322_vm7 = vcmp.ge.f32.partialorder %v2192_v63, 0.0  ;;  %v2354_v15 = vmul.f32 0.2, %v2192_v63 }
 0x315   : > { %vm2321_vm8 = vcmp.ge.f32.partialorder %v2187_v14, 0.0  ;;  %v2353_v34 = vmul.f32 0.2, %v2187_v14 }
 0x316   : > { %v2386_v18 = vsel %vm2322_vm7, %v2192_v63, %v2354_v15  ;;  %v6351_v19 = vld [vmem:[#allocation4 + $0x51] sm:$0xff] }
 0x317   : > { %2465 = vst.msk [vmem:[#allocation4 + $0x69] sm:$0xff] %vm2411_vm13, %v2386_v18  ;;  %v2385_v22 = vsel %vm2321_vm8, %v2187_v14, %v2353_v34  ;;  %2632 = vrot.lane.b32.xlu1 %v6351_v19, %s5000_s26  ;;  %v6356_v35 = vld [vmem:[#allocation4 + $0x49] sm:$0xff] }
 0x318   : > { %v6358_v23 = vld [vmem:[#allocation4 + $0x50] sm:$0xff]  ;;  %2464 = vst.msk [vmem:[#allocation4 + $0x61] sm:$0xff] %vm2411_vm13, %v2385_v22  ;;  %2630 = vrot.lane.b32.xlu0 %v6356_v35, %s5000_s26  ;;  %v6365_v49 = vld [vmem:[#allocation4 + $0x48] sm:$0xff] }
 0x319   : > { %2529 = vst.msk [vmem:[#allocation5 + $0x38] sm:$0xff] %vm2411_vm13, %v6358_v23  ;;  %v4834_v48 = vpop.f32.mrb[8].mxu0  ;;  %2528 = vst.msk [vmem:[#allocation5 + $0x30] sm:$0xff] %vm2411_vm13, %v6365_v49 }
 0x31a   : > { %v2202_v33 = vadd.f32 %v4834_v48, %v6308_v61  ;;  %v2196_v25 = vpop.f32.mrb[9].mxu0 }
 0x31b   : > { %v2197_v46 = vadd.f32 %v6308_v61, %v2196_v25 }
 0x31c   : > { %vm2324_vm9 = vcmp.ge.f32.partialorder %v2202_v33, 0.0  ;;  %v2356_v36 = vmul.f32 0.2, %v2202_v33 }
 0x31d   : > { %vm2323_vm10 = vcmp.ge.f32.partialorder %v2197_v46, 0.0  ;;  %v2355_v30 = vmul.f32 0.2, %v2197_v46 }
 0x31e   : > { %v2388_v37 = vsel %vm2324_vm9, %v2202_v33, %v2356_v36  ;;  %v2563_v32 = vld [vmem:[#allocation4 + $0x69] sm:$0xff] }
 0x31f   : > { %2467 = vst.msk [vmem:[#allocation4 + $0x81] sm:$0xff] %vm2411_vm13, %v2388_v37  ;;  %v2387_v45 = vsel %vm2323_vm10, %v2197_v46, %v2355_v30  ;;  %2636 = vrot.lane.b32.xlu1 %v2563_v32, %s5000_s26  ;;  %v2562_v39 = vld [vmem:[#allocation4 + $0x61] sm:$0xff] }
 0x320   : > { %v6373_v38 = vld [vmem:[#allocation4 + $0x68] sm:$0xff]  ;;  %2466 = vst.msk [vmem:[#allocation4 + $0x79] sm:$0xff] %vm2411_vm13, %v2387_v45  ;;  %2634 = vrot.lane.b32.xlu0 %v2562_v39, %s5000_s26  ;;  %v6379_v51 = vld [vmem:[#allocation4 + $0x60] sm:$0xff] }
 0x321   : > { %2531 = vst.msk [vmem:[#allocation5 + $0x48] sm:$0xff] %vm2411_vm13, %v6373_v38  ;;  %v4837_v40 = vpop.f32.mrb[10].mxu0  ;;  %2530 = vst.msk [vmem:[#allocation5 + $0x40] sm:$0xff] %vm2411_vm13, %v6379_v51 }
 0x322   : > { %v2212_v54 = vadd.f32 %v4837_v40, %v6308_v61  ;;  %v2206_v52 = vpop.f32.mrb[11].mxu0 }
 0x323   : > { %v2207_v57 = vadd.f32 %v6308_v61, %v2206_v52 }
 0x324   : > { %vm2326_vm11 = vcmp.ge.f32.partialorder %v2212_v54, 0.0  ;;  %v2358_v55 = vmul.f32 0.2, %v2212_v54 }
 0x325   : > { %vm2325_vm14 = vcmp.ge.f32.partialorder %v2207_v57, 0.0  ;;  %v2357_v59 = vmul.f32 0.2, %v2207_v57 }
 0x326   : > { %v2390_v58 = vsel %vm2326_vm11, %v2212_v54, %v2358_v55  ;;  %v2565_v60 = vld [vmem:[#allocation4 + $0x81] sm:$0xff] }
 0x327   : > { %2469 = vst.msk [vmem:[#allocation4 + $0x99] sm:$0xff] %vm2411_vm13, %v2390_v58  ;;  %v2389_v1 = vsel %vm2325_vm14, %v2207_v57, %v2357_v59  ;;  %2640 = vrot.lane.b32.xlu1 %v2565_v60, %s5000_s26  ;;  %v2564_v62 = vld [vmem:[#allocation4 + $0x79] sm:$0xff] }
 0x328   : > { %v6387_v3 = vld [vmem:[#allocation4 + $0x80] sm:$0xff]  ;;  %2468 = vst.msk [vmem:[#allocation4 + $0x91] sm:$0xff] %vm2411_vm13, %v2389_v1  ;;  %2638 = vrot.lane.b32.xlu0 %v2564_v62, %s5000_s26  ;;  %v6393_v2 = vld [vmem:[#allocation4 + $0x78] sm:$0xff] }
 0x329   : > { %2533 = vst.msk [vmem:[#allocation5 + $0x58] sm:$0xff] %vm2411_vm13, %v6387_v3  ;;  %v4840_v5 = vpop.f32.mrb[12].mxu0  ;;  %2532 = vst.msk [vmem:[#allocation5 + $0x50] sm:$0xff] %vm2411_vm13, %v6393_v2 }
 0x32a   : > { %v2222_v4 = vadd.f32 %v4840_v5, %v6308_v61  ;;  %v2216_v7 = vpop.f32.mrb[13].mxu0 }
 0x32b   : > { %v2217_v6 = vadd.f32 %v6308_v61, %v2216_v7 }
 0x32c   : > { %vm2328_vm15 = vcmp.ge.f32.partialorder %v2222_v4, 0.0  ;;  %v2360_v9 = vmul.f32 0.2, %v2222_v4 }
 0x32d   : > { %vm2327_vm1 = vcmp.ge.f32.partialorder %v2217_v6, 0.0  ;;  %v2359_v12 = vmul.f32 0.2, %v2217_v6 }
 0x32e   : > { %v2392_v10 = vsel %vm2328_vm15, %v2222_v4, %v2360_v9  ;;  %v2567_v16 = vld [vmem:[#allocation4 + $0x99] sm:$0xff] }
 0x32f   : > { %2471 = vst.msk [vmem:[#allocation4 + $0xb1] sm:$0xff] %vm2411_vm13, %v2392_v10  ;;  %v2391_v13 = vsel %vm2327_vm1, %v2217_v6, %v2359_v12  ;;  %2644 = vrot.lane.b32.xlu1 %v2567_v16, %s5000_s26  ;;  %v2566_v20 = vld [vmem:[#allocation4 + $0x91] sm:$0xff] }
 0x330   : > { %v6402_v41 = vld [vmem:[#allocation4 + $0x98] sm:$0xff]  ;;  %2470 = vst.msk [vmem:[#allocation4 + $0xa9] sm:$0xff] %vm2411_vm13, %v2391_v13  ;;  %2642 = vrot.lane.b32.xlu0 %v2566_v20, %s5000_s26  ;;  %v6408_v17 = vld [vmem:[#allocation4 + $0x90] sm:$0xff] }
 0x331   : > { %2535 = vst.msk [vmem:[#allocation5 + $0x68] sm:$0xff] %vm2411_vm13, %v6402_v41  ;;  %v4843_v43 = vpop.f32.mrb[14].mxu0  ;;  %2534 = vst.msk [vmem:[#allocation5 + $0x60] sm:$0xff] %vm2411_vm13, %v6408_v17 }
 0x332   : > { %v2232_v21 = vadd.f32 %v4843_v43, %v6308_v61  ;;  %v2226_v26 = vpop.f32.mrb[15].mxu0 }
 0x333   : > { %v2227_v44 = vadd.f32 %v6308_v61, %v2226_v26 }
 0x334   : > { %vm2330_vm2 = vcmp.ge.f32.partialorder %v2232_v21, 0.0  ;;  %v2362_v27 = vmul.f32 0.2, %v2232_v21 }
 0x335   : > { %vm2329_vm3 = vcmp.ge.f32.partialorder %v2227_v44, 0.0  ;;  %v2361_v47 = vmul.f32 0.2, %v2227_v44 }
 0x336   : > { %v2394_v31 = vsel %vm2330_vm2, %v2232_v21, %v2362_v27  ;;  %v2569_v56 = vld [vmem:[#allocation4 + $0xb1] sm:$0xff] }
 0x337   : > { %2473 = vst.msk [vmem:[#allocation4 + $0xc9] sm:$0xff] %vm2411_vm13, %v2394_v31  ;;  %v2393_v63 = vsel %vm2329_vm3, %v2227_v44, %v2361_v47  ;;  %2648 = vrot.lane.b32.xlu1 %v2569_v56, %s5000_s26  ;;  %v2568_v11 = vld [vmem:[#allocation4 + $0xa9] sm:$0xff] }
 0x338   : > { %v6417_v14 = vld [vmem:[#allocation4 + $0xb0] sm:$0xff]  ;;  %2472 = vst.msk [vmem:[#allocation4 + $0xc1] sm:$0xff] %vm2411_vm13, %v2393_v63  ;;  %2646 = vrot.lane.b32.xlu0 %v2568_v11, %s5000_s26  ;;  %v6423_v15 = vld [vmem:[#allocation4 + $0xa8] sm:$0xff] }
 0x339   : > { %2537 = vst.msk [vmem:[#allocation5 + $0x78] sm:$0xff] %vm2411_vm13, %v6417_v14  ;;  %v4846_v34 = vpop.f32.mrb[16].mxu0  ;;  %2536 = vst.msk [vmem:[#allocation5 + $0x70] sm:$0xff] %vm2411_vm13, %v6423_v15 }
 0x33a   : > { %v2242_v18 = vadd.f32 %v4846_v34, %v6308_v61  ;;  %v2236_v22 = vpop.f32.mrb[17].mxu0 }
 0x33b   : > { %v2237_v48 = vadd.f32 %v6308_v61, %v2236_v22 }
 0x33c   : > { %vm2332_vm12 = vcmp.ge.f32.partialorder %v2242_v18, 0.0  ;;  %v2364_v33 = vmul.f32 0.2, %v2242_v18 }
 0x33d   : > { %vm2331_vm4 = vcmp.ge.f32.partialorder %v2237_v48, 0.0  ;;  %v2363_v25 = vmul.f32 0.2, %v2237_v48 }
 0x33e   : > { %v2396_v46 = vsel %vm2332_vm12, %v2242_v18, %v2364_v33  ;;  %v2571_v36 = vld [vmem:[#allocation4 + $0xc9] sm:$0xff]  ;;  %vm2907_vm12 = vcmask 195712  }
 0x33f   : > { %2475 = vst.msk [vmem:[#allocation4 + $0xe1] sm:$0xff] %vm2411_vm13, %v2396_v46  ;;  %v2395_v30 = vsel %vm2331_vm4, %v2237_v48, %v2363_v25  ;;  %2652 = vrot.lane.b32.xlu1 %v2571_v36, %s5000_s26  ;;  %v2570_v37 = vld [vmem:[#allocation4 + $0xc1] sm:$0xff] }
 0x340   : > { %v6431_v32 = vld [vmem:[#allocation4 + $0xc8] sm:$0xff]  ;;  %2474 = vst.msk [vmem:[#allocation4 + $0xd9] sm:$0xff] %vm2411_vm13, %v2395_v30  ;;  %2650 = vrot.lane.b32.xlu0 %v2570_v37, %s5000_s26  ;;  %v6437_v45 = vld [vmem:[#allocation4 + $0xc0] sm:$0xff] }
 0x341   : > { %2539 = vst.msk [vmem:[#allocation5 + $0x88] sm:$0xff] %vm2411_vm13, %v6431_v32  ;;  %v4849_v39 = vpop.f32.mrb[18].mxu0  ;;  %2538 = vst.msk [vmem:[#allocation5 + $0x80] sm:$0xff] %vm2411_vm13, %v6437_v45 }
 0x342   : > { %v2252_v40 = vadd.f32 %v4849_v39, %v6308_v61  ;;  %v2246_v54 = vpop.f32.mrb[19].mxu0 }
 0x343   : > { %v2247_v52 = vadd.f32 %v6308_v61, %v2246_v54 }
 0x344   : > { %vm2334_vm5 = vcmp.ge.f32.partialorder %v2252_v40, 0.0  ;;  %v2366_v57 = vmul.f32 0.2, %v2252_v40 }
 0x345   : > { %vm2333_vm6 = vcmp.ge.f32.partialorder %v2247_v52, 0.0  ;;  %v2365_v55 = vmul.f32 0.2, %v2247_v52 }
 0x346   : > { %v2398_v59 = vsel %vm2334_vm5, %v2252_v40, %v2366_v57  ;;  %v2573_v58 = vld [vmem:[#allocation4 + $0xe1] sm:$0xff]  ;;  %vm3100_vm5 = vcmask 261312  }
 0x347   : > { %2477 = vst.msk [vmem:[#allocation4 + $0xf9] sm:$0xff] %vm2411_vm13, %v2398_v59  ;;  %v2397_v60 = vsel %vm2333_vm6, %v2247_v52, %v2365_v55  ;;  %2656 = vrot.lane.b32.xlu1 %v2573_v58, %s5000_s26  ;;  %v2572_v1 = vld [vmem:[#allocation4 + $0xd9] sm:$0xff]  ;;  %vm3293_vm6 = vcmask 326912  }
 0x348   : > { %v6445_v62 = vld [vmem:[#allocation4 + $0xe0] sm:$0xff]  ;;  %2476 = vst.msk [vmem:[#allocation4 + $0xf1] sm:$0xff] %vm2411_vm13, %v2397_v60  ;;  %2654 = vrot.lane.b32.xlu0 %v2572_v1, %s5000_s26  ;;  %v6451_v5 = vld [vmem:[#allocation4 + $0xd8] sm:$0xff] }
 0x349   : > { %2541 = vst.msk [vmem:[#allocation5 + $0x98] sm:$0xff] %vm2411_vm13, %v6445_v62  ;;  %v4852_v4 = vpop.f32.mrb[20].mxu0  ;;  %2540 = vst.msk [vmem:[#allocation5 + $0x90] sm:$0xff] %vm2411_vm13, %v6451_v5 }
 0x34a   : > { %v2262_v7 = vadd.f32 %v4852_v4, %v6308_v61  ;;  %v2256_v6 = vpop.f32.mrb[21].mxu0 }
 0x34b   : > { %v2257_v9 = vadd.f32 %v6308_v61, %v2256_v6 }
 0x34c   : > { %vm2336_vm7 = vcmp.ge.f32.partialorder %v2262_v7, 0.0  ;;  %v2368_v8 = vmul.f32 0.2, %v2262_v7 }
 0x34d   : > { %vm2335_vm8 = vcmp.ge.f32.partialorder %v2257_v9, 0.0  ;;  %v2367_v12 = vmul.f32 0.2, %v2257_v9 }
 0x34e   : > { %v2400_v10 = vsel %vm2336_vm7, %v2262_v7, %v2368_v8  ;;  %v2575_v16 = vld [vmem:[#allocation4 + $0xf9] sm:$0xff]  ;;  %vm3486_vm7 = vcmask 392512  }
 0x34f   : > { %2479 = vst.msk [vmem:[#allocation4 + $0x111] sm:$0xff] %vm2411_vm13, %v2400_v10  ;;  %v2399_v13 = vsel %vm2335_vm8, %v2257_v9, %v2367_v12  ;;  %2660 = vrot.lane.b32.xlu1 %v2575_v16, %s5000_s26  ;;  %v2574_v20 = vld [vmem:[#allocation4 + $0xf1] sm:$0xff]  ;;  %vm3680_vm8 = vcmask 458112  }
 0x350   : > { %v6459_v29 = vld [vmem:[#allocation4 + $0xf8] sm:$0xff]  ;;  %2478 = vst.msk [vmem:[#allocation4 + $0x109] sm:$0xff] %vm2411_vm13, %v2399_v13  ;;  %2658 = vrot.lane.b32.xlu0 %v2574_v20, %s5000_s26  ;;  %v6465_v43 = vld [vmem:[#allocation4 + $0xf0] sm:$0xff] }
 0x351   : > { %2543 = vst.msk [vmem:[#allocation5 + $0xa8] sm:$0xff] %vm2411_vm13, %v6459_v29  ;;  %v4855_v21 = vpop.f32.mrb[22].mxu0  ;;  %2542 = vst.msk [vmem:[#allocation5 + $0xa0] sm:$0xff] %vm2411_vm13, %v6465_v43 }
 0x352   : > { %v2272_v26 = vadd.f32 %v4855_v21, %v6308_v61  ;;  %v2266_v44 = vpop.f32.mrb[23].mxu0 }
 0x353   : > { %v2267_v27 = vadd.f32 %v6308_v61, %v2266_v44 }
 0x354   : > { %vm2338_vm9 = vcmp.ge.f32.partialorder %v2272_v26, 0.0  ;;  %v2370_v47 = vmul.f32 0.2, %v2272_v26 }
 0x355   : > { %vm2337_vm10 = vcmp.ge.f32.partialorder %v2267_v27, 0.0  ;;  %v2369_v31 = vmul.f32 0.2, %v2267_v27 }
 0x356   : > { %v2402_v56 = vsel %vm2338_vm9, %v2272_v26, %v2370_v47  ;;  %v2577_v63 = vld [vmem:[#allocation4 + $0x111] sm:$0xff]  ;;  %vm3873_vm9 = vcmask 523712  }
 0x357   : > { %2481 = vst.msk [vmem:[#allocation4 + $0x129] sm:$0xff] %vm2411_vm13, %v2402_v56  ;;  %v2401_v11 = vsel %vm2337_vm10, %v2267_v27, %v2369_v31  ;;  %2664 = vrot.lane.b32.xlu1 %v2577_v63, %s5000_s26  ;;  %v2576_v34 = vld [vmem:[#allocation4 + $0x109] sm:$0xff]  ;;  %vm4066_vm10 = vcmask 589312  }
 0x358   : > { %v6473_v18 = vld [vmem:[#allocation4 + $0x110] sm:$0xff]  ;;  %2480 = vst.msk [vmem:[#allocation4 + $0x121] sm:$0xff] %vm2411_vm13, %v2401_v11  ;;  %2662 = vrot.lane.b32.xlu0 %v2576_v34, %s5000_s26  ;;  %v6479_v22 = vld [vmem:[#allocation4 + $0x108] sm:$0xff] }
 0x359   : > { %2545 = vst.msk [vmem:[#allocation5 + $0xb8] sm:$0xff] %vm2411_vm13, %v6473_v18  ;;  %v4858_v48 = vpop.f32.mrb[24].mxu0  ;;  %2544 = vst.msk [vmem:[#allocation5 + $0xb0] sm:$0xff] %vm2411_vm13, %v6479_v22 }
 0x35a   : > { %v2282_v33 = vadd.f32 %v4858_v48, %v6308_v61  ;;  %v2276_v25 = vpop.f32.mrb[25].mxu0 }
 0x35b   : > { %v2277_v46 = vadd.f32 %v6308_v61, %v2276_v25 }
 0x35c   : > { %vm2340_vm11 = vcmp.ge.f32.partialorder %v2282_v33, 0.0  ;;  %v2372_v36 = vmul.f32 0.2, %v2282_v33 }
 0x35d   : > { %vm2339_vm14 = vcmp.ge.f32.partialorder %v2277_v46, 0.0  ;;  %v2371_v30 = vmul.f32 0.2, %v2277_v46 }
 0x35e   : > { %v2404_v37 = vsel %vm2340_vm11, %v2282_v33, %v2372_v36  ;;  %v2579_v39 = vld [vmem:[#allocation4 + $0x129] sm:$0xff]  ;;  %vm4147_vm11 = vcmask 588800  }
 0x35f   : > { %2483 = vst.msk [vmem:[#allocation4 + $0x141] sm:$0xff] %vm2411_vm13, %v2404_v37  ;;  %v2403_v40 = vsel %vm2339_vm14, %v2277_v46, %v2371_v30  ;;  %2668 = vrot.lane.b32.xlu1 %v2579_v39, %s5000_s26  ;;  %v2578_v54 = vld [vmem:[#allocation4 + $0x121] sm:$0xff]  ;;  %v2748_v33 = vld [vmem:[#allocation4 + $0xa] sm:$0xff] }
 0x360   : > { %v6487_v52 = vld [vmem:[#allocation4 + $0x128] sm:$0xff]  ;;  %2482 = vst.msk [vmem:[#allocation4 + $0x139] sm:$0xff] %vm2411_vm13, %v2403_v40  ;;  %2666 = vrot.lane.b32.xlu0 %v2578_v54, %s5000_s26  ;;  %v6493_v57 = vld [vmem:[#allocation4 + $0x120] sm:$0xff] }
 0x361   : > { %2547 = vst.msk [vmem:[#allocation5 + $0xc8] sm:$0xff] %vm2411_vm13, %v6487_v52  ;;  %v4861_v55 = vpop.f32.mrb[26].mxu0  ;;  %2546 = vst.msk [vmem:[#allocation5 + $0xc0] sm:$0xff] %vm2411_vm13, %v6493_v57  ;;  %v2747_v36 = vld [vmem:[#allocation4 + $0x2] sm:$0xff]  ;;  %v2749_v39 = vld [vmem:[#allocation4 + $0x1a] sm:$0xff] }
 0x362   : > { %v2292_v59 = vadd.f32 %v4861_v55, %v6308_v61  ;;  %v2286_v58 = vpop.f32.mrb[27].mxu0  ;;  %v2750_v37 = vld [vmem:[#allocation4 + $0x22] sm:$0xff]  ;;  %v6524_v55 = vld [vmem:[#allocation4 + $0x3a] sm:$0xff] }
 0x363   : > { %v2287_v60 = vadd.f32 %v6308_v61, %v2286_v58  ;;  %v6533_v58 = vld [vmem:[#allocation4 + $0x52] sm:$0xff] }
 0x364   : > { %vm2342_vm15 = vcmp.ge.f32.partialorder %v2292_v59, 0.0  ;;  %v2374_v1 = vmul.f32 0.2, %v2292_v59 }
 0x365   : > { %vm2341_vm1 = vcmp.ge.f32.partialorder %v2287_v60, 0.0  ;;  %v2373_v4 = vmul.f32 0.2, %v2287_v60 }
 0x366   : > { %v2406_v7 = vsel %vm2342_vm15, %v2292_v59, %v2374_v1  ;;  %v2581_v6 = vld [vmem:[#allocation4 + $0x141] sm:$0xff]  ;;  %v6529_v59 = vld [vmem:[#allocation4 + $0x32] sm:$0xff] }
 0x367   : > { %2485 = vst.msk [vmem:[#allocation4 + $0x159] sm:$0xff] %vm2411_vm13, %v2406_v7  ;;  %v2405_v9 = vsel %vm2341_vm1, %v2287_v60, %v2373_v4  ;;  %2672 = vrot.lane.b32.xlu1 %v2581_v6, %s5000_s26  ;;  %v2580_v8 = vld [vmem:[#allocation4 + $0x139] sm:$0xff]  ;;  %v6537_v60 = vld [vmem:[#allocation4 + $0x4a] sm:$0xff]  ;;  %v6547_v6 = vld [vmem:[#allocation4 + $0x62] sm:$0xff] }
 0x368   : > { %v2517_v12 = vld [vmem:[#allocation4 + $0x140] sm:$0xff]  ;;  %2484 = vst.msk [vmem:[#allocation4 + $0x151] sm:$0xff] %vm2411_vm13, %v2405_v9  ;;  %2670 = vrot.lane.b32.xlu0 %v2580_v8, %s5000_s26  ;;  %v2516_v10 = vld [vmem:[#allocation4 + $0x138] sm:$0xff]  ;;  %v6542_v7 = vld [vmem:[#allocation4 + $0x6a] sm:$0xff] }
 0x369   : > { %2549 = vst.msk [vmem:[#allocation5 + $0xd8] sm:$0xff] %vm2411_vm13, %v2517_v12  ;;  %v4864_v16 = vpop.f32.mrb[28].mxu0  ;;  %2548 = vst.msk [vmem:[#allocation5 + $0xd0] sm:$0xff] %vm2411_vm13, %v2516_v10  ;;  %v6551_v9 = vld [vmem:[#allocation4 + $0x82] sm:$0xff]  ;;  %v6555_v8 = vld [vmem:[#allocation4 + $0x7a] sm:$0xff] }
 0x36a   : > { %v2302_v13 = vadd.f32 %v4864_v16, %v6308_v61  ;;  %v2296_v20 = vpop.f32.mrb[29].mxu0  ;;  %v6560_v16 = vld [vmem:[#allocation4 + $0x9a] sm:$0xff] }
 0x36b   : > { %v2297_v21 = vadd.f32 %v6308_v61, %v2296_v20  ;;  %v6569_v20 = vld [vmem:[#allocation4 + $0xb2] sm:$0xff] }
 0x36c   : > { %vm2344_vm2 = vcmp.ge.f32.partialorder %v2302_v13, 0.0  ;;  %v2376_v26 = vmul.f32 0.2, %v2302_v13 }
 0x36d   : > { %vm2343_vm3 = vcmp.ge.f32.partialorder %v2297_v21, 0.0  ;;  %v2375_v44 = vmul.f32 0.2, %v2297_v21 }
 0x36e   : > { %v2408_v27 = vsel %vm2344_vm2, %v2302_v13, %v2376_v26  ;;  %v2583_v47 = vld [vmem:[#allocation4 + $0x159] sm:$0xff] }
 0x36f   : > { %2487 = vst.msk [vmem:[#allocation4 + $0x171] sm:$0xff] %vm2411_vm13, %v2408_v27  ;;  %v2407_v31 = vsel %vm2343_vm3, %v2297_v21, %v2375_v44  ;;  %2676 = vrot.lane.b32.xlu1 %v2583_v47, %s5000_s26  ;;  %v2582_v56 = vld [vmem:[#allocation4 + $0x151] sm:$0xff]  ;;  %v6583_v47 = vld [vmem:[#allocation4 + $0xc2] sm:$0xff] }
 0x370   : > { %v2519_v63 = vld [vmem:[#allocation4 + $0x158] sm:$0xff]  ;;  %2486 = vst.msk [vmem:[#allocation4 + $0x169] sm:$0xff] %vm2411_vm13, %v2407_v31  ;;  %2674 = vrot.lane.b32.xlu0 %v2582_v56, %s5000_s26  ;;  %v2518_v61 = vld [vmem:[#allocation4 + $0x150] sm:$0xff]  ;;  %v6587_v31 = vld [vmem:[#allocation4 + $0xe2] sm:$0xff] }
 0x371   : > { %2551 = vst.msk [vmem:[#allocation5 + $0xe8] sm:$0xff] %vm2411_vm13, %v2519_v63  ;;  %2550 = vst.msk [vmem:[#allocation5 + $0xe0] sm:$0xff] %vm2411_vm13, %v2518_v61  ;;  %v6565_v13 = vld [vmem:[#allocation4 + $0x92] sm:$0xff]  ;;  %v6573_v21 = vld [vmem:[#allocation4 + $0xaa] sm:$0xff] }
 0x372   : > { %v6578_v27 = vld [vmem:[#allocation4 + $0xca] sm:$0xff]  ;;  %v6591_v56 = vld [vmem:[#allocation4 + $0xda] sm:$0xff] }
 0x376   : > { %v2585_v11 = vld [vmem:[#allocation4 + $0x171] sm:$0xff] }
 0x377   : > { %2680 = vrot.lane.b32.xlu1 %v2585_v11, %s5000_s26  ;;  %v2584_v34 = vld [vmem:[#allocation4 + $0x169] sm:$0xff]  ;;  %v2768_v11 = vld [vmem:[#allocation4 + $0xfa] sm:$0xff] }
 0x378   : > { %v2521_v48 = vld [vmem:[#allocation4 + $0x170] sm:$0xff]  ;;  %2678 = vrot.lane.b32.xlu0 %v2584_v34, %s5000_s26  ;;  %v2520_v25 = vld [vmem:[#allocation4 + $0x168] sm:$0xff] }
 0x379   : > { %2553 = vst.msk [vmem:[#allocation5 + $0xf8] sm:$0xff] %vm2411_vm13, %v2521_v48  ;;  %v2625_v46 = vpop.permute.xlu1 %2624  ;;  %2552 = vst.msk [vmem:[#allocation5 + $0xf0] sm:$0xff] %vm2411_vm13, %v2520_v25  ;;  %v6598_v34 = vld [vmem:[#allocation4 + $0xf2] sm:$0xff] }
 0x37a   : > { %2718 = vst.msk [vmem:[#allocation5 + $0x18] sm:$0xff] %vm2714_vm0, %v2625_v46  ;;  %v2623_v30 = vpop.permute.xlu0 %2622  ;;  %v2770_v48 = vld [vmem:[#allocation4 + $0x112] sm:$0xff] }
 0x37b   : > { %2717 = vst.msk [vmem:[#allocation5 + $0x10] sm:$0xff] %vm2714_vm0, %v2623_v30  ;;  %2813 = vrot.lane.b32.xlu1 %v2748_v33, %s5002_s28  ;;  %v2769_v33 = vld [vmem:[#allocation4 + $0x10a] sm:$0xff]  ;;  %v2771_v30 = vld [vmem:[#allocation4 + $0x122] sm:$0xff] }
 0x37c   : > { %2811 = vrot.lane.b32.xlu0 %v2747_v36, %s5002_s28  ;;  %v2772_v36 = vld [vmem:[#allocation4 + $0x12a] sm:$0xff] }
 0x37f   : > { %2817 = vrot.lane.b32.xlu1 %v2750_v37, %s5002_s28  ;;  %v2774_v37 = vld [vmem:[#allocation4 + $0x142] sm:$0xff] }
 0x380   : > { %2815 = vrot.lane.b32.xlu0 %v2749_v39, %s5002_s28  ;;  %v2773_v39 = vld [vmem:[#allocation4 + $0x13a] sm:$0xff] }
 0x381   : > { %v2629_v40 = vpop.permute.xlu1 %2628 }
 0x382   : > { %2720 = vst.msk [vmem:[#allocation5 + $0x28] sm:$0xff] %vm2714_vm0, %v2629_v40  ;;  %v2627_v54 = vpop.permute.xlu0 %2626 }
 0x383   : > { %2719 = vst.msk [vmem:[#allocation5 + $0x20] sm:$0xff] %vm2714_vm0, %v2627_v54  ;;  %2821 = vrot.lane.b32.xlu1 %v6524_v55, %s5002_s28 }
 0x384   : > { %2819 = vrot.lane.b32.xlu0 %v6529_v59, %s5002_s28 }
 0x387   : > { %2825 = vrot.lane.b32.xlu1 %v6533_v58, %s5002_s28 }
 0x388   : > { %2823 = vrot.lane.b32.xlu0 %v6537_v60, %s5002_s28 }
 0x389   : > { %v2633_v1 = vpop.permute.xlu1 %2632 }
 0x38a   : > { %2722 = vst.msk [vmem:[#allocation5 + $0x38] sm:$0xff] %vm2714_vm0, %v2633_v1  ;;  %v2631_v4 = vpop.permute.xlu0 %2630  ;;  %v2776_v1 = vld [vmem:[#allocation4 + $0x15a] sm:$0xff] }
 0x38b   : > { %2721 = vst.msk [vmem:[#allocation5 + $0x30] sm:$0xff] %vm2714_vm0, %v2631_v4  ;;  %2829 = vrot.lane.b32.xlu1 %v6542_v7, %s5002_s28  ;;  %v2775_v4 = vld [vmem:[#allocation4 + $0x152] sm:$0xff] }
 0x38c   : > { %2827 = vrot.lane.b32.xlu0 %v6547_v6, %s5002_s28 }
 0x38f   : > { %2833 = vrot.lane.b32.xlu1 %v6551_v9, %s5002_s28 }
 0x390   : > { %2831 = vrot.lane.b32.xlu0 %v6555_v8, %s5002_s28 }
 0x391   : > { %v2637_v12 = vpop.permute.xlu1 %2636 }
 0x392   : > { %2724 = vst.msk [vmem:[#allocation5 + $0x48] sm:$0xff] %vm2714_vm0, %v2637_v12  ;;  %v2635_v10 = vpop.permute.xlu0 %2634  ;;  %v2778_v12 = vld [vmem:[#allocation4 + $0x172] sm:$0xff] }
 0x393   : > { %2723 = vst.msk [vmem:[#allocation5 + $0x40] sm:$0xff] %vm2714_vm0, %v2635_v10  ;;  %2837 = vrot.lane.b32.xlu1 %v6560_v16, %s5002_s28  ;;  %v2777_v10 = vld [vmem:[#allocation4 + $0x16a] sm:$0xff] }
 0x394   : > { %2835 = vrot.lane.b32.xlu0 %v6565_v13, %s5002_s28 }
 0x397   : > { %2841 = vrot.lane.b32.xlu1 %v6569_v20, %s5002_s28 }
 0x398   : > { %2839 = vrot.lane.b32.xlu0 %v6573_v21, %s5002_s28 }
 0x399   : > { %v2641_v26 = vpop.permute.xlu1 %2640 }
 0x39a   : > { %2726 = vst.msk [vmem:[#allocation5 + $0x58] sm:$0xff] %vm2714_vm0, %v2641_v26  ;;  %v2639_v44 = vpop.permute.xlu0 %2638 }
 0x39b   : > { %2725 = vst.msk [vmem:[#allocation5 + $0x50] sm:$0xff] %vm2714_vm0, %v2639_v44  ;;  %2845 = vrot.lane.b32.xlu1 %v6578_v27, %s5002_s28 }
 0x39c   : > { %2843 = vrot.lane.b32.xlu0 %v6583_v47, %s5002_s28 }
 0x39f   : > { %2849 = vrot.lane.b32.xlu1 %v6587_v31, %s5002_s28 }
 0x3a0   : > { %2847 = vrot.lane.b32.xlu0 %v6591_v56, %s5002_s28 }
 0x3a1   : > { %v2645_v63 = vpop.permute.xlu1 %2644 }
 0x3a2   : > { %2728 = vst.msk [vmem:[#allocation5 + $0x68] sm:$0xff] %vm2714_vm0, %v2645_v63  ;;  %v2643_v61 = vpop.permute.xlu0 %2642 }
 0x3a3   : > { %2727 = vst.msk [vmem:[#allocation5 + $0x60] sm:$0xff] %vm2714_vm0, %v2643_v61  ;;  %2853 = vrot.lane.b32.xlu1 %v2768_v11, %s5002_s28 }
 0x3a4   : > { %2851 = vrot.lane.b32.xlu0 %v6598_v34, %s5002_s28 }
 0x3a7   : > { %2857 = vrot.lane.b32.xlu1 %v2770_v48, %s5002_s28 }
 0x3a8   : > { %2855 = vrot.lane.b32.xlu0 %v2769_v33, %s5002_s28 }
 0x3a9   : > { %v2649_v25 = vpop.permute.xlu1 %2648 }
 0x3aa   : > { %2730 = vst.msk [vmem:[#allocation5 + $0x78] sm:$0xff] %vm2714_vm0, %v2649_v25  ;;  %v2647_v46 = vpop.permute.xlu0 %2646 }
 0x3ab   : > { %2729 = vst.msk [vmem:[#allocation5 + $0x70] sm:$0xff] %vm2714_vm0, %v2647_v46  ;;  %2861 = vrot.lane.b32.xlu1 %v2772_v36, %s5002_s28  ;;  %v4131_v46 = vld [vmem:[%s7306_s3] sm:$0xff]  ;;  %v4132_v36 = vld [vmem:[%s7306_s3 + $0x8] sm:$0xff] }
 0x3ac   : > { %2859 = vrot.lane.b32.xlu0 %v2771_v30, %s5002_s28  ;;  %v4942_v30 = vpack.c.bf16 %v4132_v36, %v4131_v46  ;;  %v3718_v46 = vld [vmem:[#allocation4 + $0x69] sm:$0xff] }
 0x3ae   : > { %4958 = vmatprep.subr.bf16.mxu1 %v4942_v30  ;;  %4943 = vmatprep.subr.bf16.mxu0 %v4942_v30 }
 0x3af   : > { %2865 = vrot.lane.b32.xlu1 %v2774_v37, %s5002_s28  ;;  %4963 = vmatpush3.bf16.msra.mxu1 %v4942_v30  ;;  %v4134_v37 = vld [vmem:[%s7306_s3 + $0x18] sm:$0xff] }
 0x3b0   : > { %2863 = vrot.lane.b32.xlu0 %v2773_v39, %s5002_s28  ;;  %4945 = vmatpush3.bf16.msra.mxu0 %v4942_v30 }
 0x3b1   : > { %v2653_v40 = vpop.permute.xlu1 %2652 }
 0x3b2   : > { %2732 = vst.msk [vmem:[#allocation5 + $0x88] sm:$0xff] %vm2714_vm0, %v2653_v40  ;;  %v2651_v54 = vpop.permute.xlu0 %2650 }
 0x3b3   : > { %2731 = vst.msk [vmem:[#allocation5 + $0x80] sm:$0xff] %vm2714_vm0, %v2651_v54  ;;  %2869 = vrot.lane.b32.xlu1 %v2776_v1, %s5002_s28 }
 0x3b4   : > { %2867 = vrot.lane.b32.xlu0 %v2775_v4, %s5002_s28 }
 0x3b7   : > { %2873 = vrot.lane.b32.xlu1 %v2778_v12, %s5002_s28 }
 0x3b8   : > { %2871 = vrot.lane.b32.xlu0 %v2777_v10, %s5002_s28 }
 0x3b9   : > { %v2657_v26 = vpop.permute.xlu1 %2656 }
 0x3ba   : > { %2734 = vst.msk [vmem:[#allocation5 + $0x98] sm:$0xff] %vm2714_vm0, %v2657_v26  ;;  %v2655_v44 = vpop.permute.xlu0 %2654 }
 0x3bb   : > { %2733 = vst.msk [vmem:[#allocation5 + $0x90] sm:$0xff] %vm2714_vm0, %v2655_v44  ;;  %3006 = vrot.lane.b32.xlu1 %v6319_v42, %s5004_s30 }
 0x3bc   : > { %3004 = vrot.lane.b32.xlu0 %v6321_v24, %s5004_s30 }
 0x3bf   : > { %3010 = vrot.lane.b32.xlu1 %v6338_v53, %s5004_s30 }
 0x3c0   : > { %3008 = vrot.lane.b32.xlu0 %v6340_v28, %s5004_s30 }
 0x3c1   : > { %v2661_v63 = vpop.permute.xlu1 %2660 }
 0x3c2   : > { %2736 = vst.msk [vmem:[#allocation5 + $0xa8] sm:$0xff] %vm2714_vm0, %v2661_v63  ;;  %v2659_v61 = vpop.permute.xlu0 %2658 }
 0x3c3   : > { %2735 = vst.msk [vmem:[#allocation5 + $0xa0] sm:$0xff] %vm2714_vm0, %v2659_v61  ;;  %3014 = vrot.lane.b32.xlu1 %v6358_v23, %s5004_s30 }
 0x3c4   : > { %3012 = vrot.lane.b32.xlu0 %v6365_v49, %s5004_s30 }
 0x3c7   : > { %3018 = vrot.lane.b32.xlu1 %v6373_v38, %s5004_s30 }
 0x3c8   : > { %3016 = vrot.lane.b32.xlu0 %v6379_v51, %s5004_s30 }
 0x3c9   : > { %v2665_v42 = vpop.permute.xlu1 %2664 }
 0x3ca   : > { %2738 = vst.msk [vmem:[#allocation5 + $0xb8] sm:$0xff] %vm2714_vm0, %v2665_v42  ;;  %v2663_v24 = vpop.permute.xlu0 %2662 }
 0x3cb   : > { %2737 = vst.msk [vmem:[#allocation5 + $0xb0] sm:$0xff] %vm2714_vm0, %v2663_v24  ;;  %3022 = vrot.lane.b32.xlu1 %v6387_v3, %s5004_s30 }
 0x3cc   : > { %3020 = vrot.lane.b32.xlu0 %v6393_v2, %s5004_s30 }
 0x3cf   : > { %3026 = vrot.lane.b32.xlu1 %v6402_v41, %s5004_s30 }
 0x3d0   : > { %3024 = vrot.lane.b32.xlu0 %v6408_v17, %s5004_s30 }
 0x3d1   : > { %v2669_v53 = vpop.permute.xlu1 %2668 }
 0x3d2   : > { %2740 = vst.msk [vmem:[#allocation5 + $0xc8] sm:$0xff] %vm2714_vm0, %v2669_v53  ;;  %v2667_v28 = vpop.permute.xlu0 %2666 }
 0x3d3   : > { %2739 = vst.msk [vmem:[#allocation5 + $0xc0] sm:$0xff] %vm2714_vm0, %v2667_v28  ;;  %3030 = vrot.lane.b32.xlu1 %v6417_v14, %s5004_s30  ;;  %v3139_v28 = vld [vmem:[#allocation4 + $0x61] sm:$0xff] }
 0x3d4   : > { %3028 = vrot.lane.b32.xlu0 %v6423_v15, %s5004_s30 }
 0x3d7   : > { %3034 = vrot.lane.b32.xlu1 %v6431_v32, %s5004_s30 }
 0x3d8   : > { %3032 = vrot.lane.b32.xlu0 %v6437_v45, %s5004_s30 }
 0x3d9   : > { %v2673_v11 = vpop.permute.xlu1 %2672 }
 0x3da   : > { %2742 = vst.msk [vmem:[#allocation5 + $0xd8] sm:$0xff] %vm2714_vm0, %v2673_v11  ;;  %v2671_v48 = vpop.permute.xlu0 %2670 }
 0x3db   : > { %2741 = vst.msk [vmem:[#allocation5 + $0xd0] sm:$0xff] %vm2714_vm0, %v2671_v48  ;;  %3038 = vrot.lane.b32.xlu1 %v6445_v62, %s5004_s30 }
 0x3dc   : > { %3036 = vrot.lane.b32.xlu0 %v6451_v5, %s5004_s30 }
 0x3df   : > { %3042 = vrot.lane.b32.xlu1 %v6459_v29, %s5004_s30 }
 0x3e0   : > { %3040 = vrot.lane.b32.xlu0 %v6465_v43, %s5004_s30 }
 0x3e1   : > { %v2677_v33 = vpop.permute.xlu1 %2676 }
 0x3e2   : > { %2744 = vst.msk [vmem:[#allocation5 + $0xe8] sm:$0xff] %vm2714_vm0, %v2677_v33  ;;  %v2675_v25 = vpop.permute.xlu0 %2674 }
 0x3e3   : > { %2743 = vst.msk [vmem:[#allocation5 + $0xe0] sm:$0xff] %vm2714_vm0, %v2675_v25  ;;  %3203 = vrot.lane.b32.xlu1 %v6331_v0, %s5006_s17  ;;  %v4133_v0 = vld [vmem:[%s7306_s3 + $0x10] sm:$0xff] }
 0x3e4   : > { %3201 = vrot.lane.b32.xlu0 %v6336_v50, %s5006_s17  ;;  %v4946_v50 = vpack.c.bf16 %v4134_v37, %v4133_v0 }
 0x3e6   : > { %4959 = vmatprep.subr.bf16.mxu1 %v4946_v50  ;;  %4947 = vmatprep.subr.bf16.mxu0 %v4946_v50 }
 0x3e7   : > { %3396 = vrot.lane.b32.xlu1 %v6524_v55, %s5007_s27  ;;  %4964 = vmatpush3.bf16.msra.mxu1 %v4946_v50  ;;  %v4135_v55 = vld [vmem:[%s7306_s3 + $0x20] sm:$0xff] }
 0x3e8   : > { %3394 = vrot.lane.b32.xlu0 %v6529_v59, %s5007_s27  ;;  %v4136_v59 = vld [vmem:[%s7306_s3 + $0x28] sm:$0xff]  ;;  %4949 = vmatpush3.bf16.msra.mxu0 %v4946_v50 }
 0x3e9   : > { %v2681_v39 = vpop.permute.xlu1 %2680  ;;  %v4950_v54 = vpack.c.bf16 %v4136_v59, %v4135_v55 }
 0x3ea   : > { %2746 = vst.msk [vmem:[#allocation5 + $0xf8] sm:$0xff] %vm2714_vm0, %v2681_v39  ;;  %v2679_v40 = vpop.permute.xlu0 %2678 }
 0x3eb   : > { %2745 = vst.msk [vmem:[#allocation5 + $0xf0] sm:$0xff] %vm2714_vm0, %v2679_v40  ;;  %3590 = vrot.lane.b32.xlu1 %v6358_v23, %s5008_s8  ;;  %4960 = vmatprep.subr.bf16.mxu1 %v4950_v54  ;;  %v4137_v23 = vld [vmem:[%s7306_s3 + $0x30] sm:$0xff] }
 0x3ec   : > { %3588 = vrot.lane.b32.xlu0 %v6365_v49, %s5008_s8  ;;  %4951 = vmatprep.subr.bf16.mxu0 %v4950_v54  ;;  %v4138_v49 = vld [vmem:[%s7306_s3 + $0x38] sm:$0xff] }
 0x3ed   : > { %v2814_v1 = vpop.permute.xlu1 %2813  ;;  %4965 = vmatpush3.bf16.msra.mxu1 %v4950_v54  ;;  %v4954_v12 = vpack.c.bf16 %v4138_v49, %v4137_v23  ;;  %4953 = vmatpush3.bf16.msra.mxu0 %v4950_v54 }
 0x3ee   : > { %2909 = vst.msk [vmem:[#allocation5 + $0x8] sm:$0xff] %vm2907_vm12, %v2814_v1  ;;  %v2812_v4 = vpop.permute.xlu0 %2811 }
 0x3ef   : > { %2908 = vst.msk [vmem:[#allocation5] sm:$0xff] %vm2907_vm12, %v2812_v4  ;;  %3205 = vrot.lane.b32.xlu1 %v6356_v35, %s5006_s17  ;;  %4961 = vmatprep.subr.bf16.mxu1 %v4954_v12  ;;  %v3141_v4 = vld [vmem:[#allocation4 + $0x79] sm:$0xff] }
 0x3f0   : > { %3781 = vrot.lane.b32.xlu0 %v6356_v35, %s5009_s20  ;;  %4955 = vmatprep.subr.bf16.mxu0 %v4954_v12  ;;  %v4139_v35 = vld [vmem:[%s7306_s3 + $0x40] sm:$0xff] }
 0x3f1   : > { %v2818_v10 = vpop.permute.xlu1 %2817  ;;  %4966 = vmatpush3.bf16.msra.mxu1 %v4954_v12  ;;  %4957 = vmatpush3.bf16.msra.mxu0 %v4954_v12 }
 0x3f2   : > { %2911 = vst.msk [vmem:[#allocation5 + $0x18] sm:$0xff] %vm2907_vm12, %v2818_v10  ;;  %v2816_v26 = vpop.permute.xlu0 %2815  ;;  %4962 = vmatprep.subr.mxu1 %v4139_v35  ;;  %4884 = vmatprep.subr.mxu0 %v4139_v35 }
 0x3f3   : > { %2910 = vst.msk [vmem:[#allocation5 + $0x10] sm:$0xff] %vm2907_vm12, %v2816_v26  ;;  %3974 = vrot.lane.b32.xlu1 %v6537_v60, %s5010_s22 }
 0x3f4   : > { %3783 = vrot.lane.b32.xlu0 %v6351_v19, %s5009_s20 }
 0x3f5   : > { %v2822_v44 = vpop.permute.xlu1 %2821  ;;  %4967 = vmatpush3.msra.mxu1 %v4139_v35  ;;  %4885 = vmatpush3.msra.mxu0 %v4139_v35 }
 0x3f6   : > { %2913 = vst.msk [vmem:[#allocation5 + $0x28] sm:$0xff] %vm2907_vm12, %v2822_v44  ;;  %v2820_v63 = vpop.permute.xlu0 %2819 }
 0x3f7   : > { %2912 = vst.msk [vmem:[#allocation5 + $0x20] sm:$0xff] %vm2907_vm12, %v2820_v63  ;;  %3398 = vrot.lane.b32.xlu1 %v6537_v60, %s5007_s27  ;;  %v3143_v63 = vld [vmem:[#allocation4 + $0x91] sm:$0xff] }
 0x3f8   : > { %3207 = vrot.lane.b32.xlu0 %v6351_v19, %s5006_s17 }
 0x3f9   : > { %v2826_v61 = vpop.permute.xlu1 %2825 }
 0x3fa   : > { %2915 = vst.msk [vmem:[#allocation5 + $0x38] sm:$0xff] %vm2907_vm12, %v2826_v61  ;;  %v2824_v42 = vpop.permute.xlu0 %2823 }
 0x3fb   : > { %2914 = vst.msk [vmem:[#allocation5 + $0x30] sm:$0xff] %vm2907_vm12, %v2824_v42  ;;  %3400 = vrot.lane.b32.xlu1 %v6533_v58, %s5007_s27 }
 0x3fc   : > { %3976 = vrot.lane.b32.xlu0 %v6533_v58, %s5010_s22  ;;  %v4867_v58 = vpop.f32.mrb[30].mxu0 }
 0x3fd   : > { %v2830_v24 = vpop.permute.xlu1 %2829  ;;  %v2306_v33 = vpop.f32.mrb[31].mxu0 }
 0x3fe   : > { %2917 = vst.msk [vmem:[#allocation5 + $0x48] sm:$0xff] %vm2907_vm12, %v2830_v24  ;;  %v2828_v60 = vpop.permute.xlu0 %2827 }
 0x3ff   : > { %2916 = vst.msk [vmem:[#allocation5 + $0x40] sm:$0xff] %vm2907_vm12, %v2828_v60  ;;  %3594 = vrot.lane.b32.xlu1 %v6373_v38, %s5008_s8  ;;  %v4989_v38 = vld [vmem:[%s7305_s2] ss:$0 sm:$0xff] }
 0x400   : > { %3592 = vrot.lane.b32.xlu0 %v6379_v51, %s5008_s8  ;;  %v2312_v48 = vadd.f32 %v4989_v38, %v4867_v58  ;;  %v2307_v25 = vadd.f32 %v4989_v38, %v2306_v33  ;;  %v3145_v58 = vld [vmem:[#allocation4 + $0xa9] sm:$0xff] }
 0x401   : > { %v2834_v19 = vpop.permute.xlu1 %2833 }
 0x402   : > { %2919 = vst.msk [vmem:[#allocation5 + $0x58] sm:$0xff] %vm2907_vm12, %v2834_v19  ;;  %v2832_v53 = vpop.permute.xlu0 %2831  ;;  %vm2346_vm0 = vcmp.ge.f32.partialorder %v2312_v48, 0.0  ;;  %v2378_v36 = vmul.f32 0.2, %v2312_v48  ;;  %vm2345_vm4 = vcmp.ge.f32.partialorder %v2307_v25, 0.0 }
 0x403   : > { %2918 = vst.msk [vmem:[#allocation5 + $0x50] sm:$0xff] %vm2907_vm12, %v2832_v53  ;;  %3209 = vrot.lane.b32.xlu1 %v3139_v28, %s5006_s17  ;;  %v2377_v30 = vmul.f32 0.2, %v2307_v25 }
 0x404   : > { %3785 = vrot.lane.b32.xlu0 %v3139_v28, %s5009_s20  ;;  %v2410_v37 = vsel %vm2346_vm0, %v2312_v48, %v2378_v36  ;;  %v3147_v36 = vld [vmem:[#allocation4 + $0xc1] sm:$0xff] }
 0x405   : > { %v2838_v11 = vpop.permute.xlu1 %2837  ;;  %2489 = vst.msk [vmem:[#allocation4 + $0x189] sm:$0xff] %vm2411_vm13, %v2410_v37  ;;  %v2409_v39 = vsel %vm2345_vm4, %v2307_v25, %v2377_v30 }
 0x406   : > { %2921 = vst.msk [vmem:[#allocation5 + $0x68] sm:$0xff] %vm2907_vm12, %v2838_v11  ;;  %v2836_v51 = vpop.permute.xlu0 %2835 }
 0x407   : > { %2920 = vst.msk [vmem:[#allocation5 + $0x60] sm:$0xff] %vm2907_vm12, %v2836_v51  ;;  %3978 = vrot.lane.b32.xlu1 %v6547_v6, %s5010_s22 }
 0x408   : > { %3787 = vrot.lane.b32.xlu0 %v3718_v46, %s5009_s20  ;;  %2488 = vst.msk [vmem:[#allocation4 + $0x181] sm:$0xff] %vm2411_vm13, %v2409_v39 }
 0x409   : > { %v2842_v0 = vpop.permute.xlu1 %2841 }
 0x40a   : > { %2923 = vst.msk [vmem:[#allocation5 + $0x78] sm:$0xff] %vm2907_vm12, %v2842_v0  ;;  %v2840_v50 = vpop.permute.xlu0 %2839 }
 0x40b   : > { %2922 = vst.msk [vmem:[#allocation5 + $0x70] sm:$0xff] %vm2907_vm12, %v2840_v50  ;;  %3402 = vrot.lane.b32.xlu1 %v6547_v6, %s5007_s27 }
 0x40c   : > { %3211 = vrot.lane.b32.xlu0 %v3718_v46, %s5006_s17 }
 0x40d   : > { %v2846_v40 = vpop.permute.xlu1 %2845 }
 0x40e   : > { %2925 = vst.msk [vmem:[#allocation5 + $0x88] sm:$0xff] %vm2907_vm12, %v2846_v40  ;;  %v2844_v55 = vpop.permute.xlu0 %2843 }
 0x40f   : > { %2924 = vst.msk [vmem:[#allocation5 + $0x80] sm:$0xff] %vm2907_vm12, %v2844_v55  ;;  %3404 = vrot.lane.b32.xlu1 %v6542_v7, %s5007_s27 }
 0x410   : > { %3980 = vrot.lane.b32.xlu0 %v6542_v7, %s5010_s22 }
 0x411   : > { %v2850_v59 = vpop.permute.xlu1 %2849 }
 0x412   : > { %2927 = vst.msk [vmem:[#allocation5 + $0x98] sm:$0xff] %vm2907_vm12, %v2850_v59  ;;  %v2848_v6 = vpop.permute.xlu0 %2847  ;;  %v3149_v59 = vld [vmem:[#allocation4 + $0xd9] sm:$0xff] }
 0x413   : > { %2926 = vst.msk [vmem:[#allocation5 + $0x90] sm:$0xff] %vm2907_vm12, %v2848_v6  ;;  %3598 = vrot.lane.b32.xlu1 %v6387_v3, %s5008_s8  ;;  %v3720_v3 = vld [vmem:[#allocation4 + $0x81] sm:$0xff] }
 0x414   : > { %3596 = vrot.lane.b32.xlu0 %v6393_v2, %s5008_s8 }
 0x415   : > { %v2854_v54 = vpop.permute.xlu1 %2853 }
 0x416   : > { %2929 = vst.msk [vmem:[#allocation5 + $0xa8] sm:$0xff] %vm2907_vm12, %v2854_v54  ;;  %v2852_v1 = vpop.permute.xlu0 %2851 }
 0x417   : > { %2928 = vst.msk [vmem:[#allocation5 + $0xa0] sm:$0xff] %vm2907_vm12, %v2852_v1  ;;  %3213 = vrot.lane.b32.xlu1 %v3141_v4, %s5006_s17 }
 0x418   : > { %3789 = vrot.lane.b32.xlu0 %v3141_v4, %s5009_s20 }
 0x419   : > { %v2858_v7 = vpop.permute.xlu1 %2857 }
 0x41a   : > { %2931 = vst.msk [vmem:[#allocation5 + $0xb8] sm:$0xff] %vm2907_vm12, %v2858_v7  ;;  %v2856_v23 = vpop.permute.xlu0 %2855 }
 0x41b   : > { %2930 = vst.msk [vmem:[#allocation5 + $0xb0] sm:$0xff] %vm2907_vm12, %v2856_v23  ;;  %3982 = vrot.lane.b32.xlu1 %v6555_v8, %s5010_s22 }
 0x41c   : > { %3791 = vrot.lane.b32.xlu0 %v3720_v3, %s5009_s20 }
 0x41d   : > { %v2862_v2 = vpop.permute.xlu1 %2861 }
 0x41e   : > { %2933 = vst.msk [vmem:[#allocation5 + $0xc8] sm:$0xff] %vm2907_vm12, %v2862_v2  ;;  %v2860_v49 = vpop.permute.xlu0 %2859 }
 0x41f   : > { %2932 = vst.msk [vmem:[#allocation5 + $0xc0] sm:$0xff] %vm2907_vm12, %v2860_v49  ;;  %3406 = vrot.lane.b32.xlu1 %v6555_v8, %s5007_s27 }
 0x420   : > { %3215 = vrot.lane.b32.xlu0 %v3720_v3, %s5006_s17 }
 0x421   : > { %v2866_v12 = vpop.permute.xlu1 %2865 }
 0x422   : > { %2935 = vst.msk [vmem:[#allocation5 + $0xd8] sm:$0xff] %vm2907_vm12, %v2866_v12  ;;  %v2864_v10 = vpop.permute.xlu0 %2863 }
 0x423   : > { %2934 = vst.msk [vmem:[#allocation5 + $0xd0] sm:$0xff] %vm2907_vm12, %v2864_v10  ;;  %3408 = vrot.lane.b32.xlu1 %v6551_v9, %s5007_s27 }
 0x424   : > { %3984 = vrot.lane.b32.xlu0 %v6551_v9, %s5010_s22 }
 0x425   : > { %v2870_v26 = vpop.permute.xlu1 %2869 }
 0x426   : > { %2937 = vst.msk [vmem:[#allocation5 + $0xe8] sm:$0xff] %vm2907_vm12, %v2870_v26  ;;  %v2868_v35 = vpop.permute.xlu0 %2867 }
 0x427   : > { %2936 = vst.msk [vmem:[#allocation5 + $0xe0] sm:$0xff] %vm2907_vm12, %v2868_v35  ;;  %3602 = vrot.lane.b32.xlu1 %v6402_v41, %s5008_s8  ;;  %v3722_v41 = vld [vmem:[#allocation4 + $0x99] sm:$0xff] }
 0x428   : > { %3600 = vrot.lane.b32.xlu0 %v6408_v17, %s5008_s8 }
 0x429   : > { %v2874_v8 = vpop.permute.xlu1 %2873 }
 0x42a   : > { %2939 = vst.msk [vmem:[#allocation5 + $0xf8] sm:$0xff] %vm2907_vm12, %v2874_v8  ;;  %v2872_v44 = vpop.permute.xlu0 %2871 }
 0x42b   : > { %2938 = vst.msk [vmem:[#allocation5 + $0xf0] sm:$0xff] %vm2907_vm12, %v2872_v44  ;;  %3217 = vrot.lane.b32.xlu1 %v3143_v63, %s5006_s17 }
 0x42c   : > { %3793 = vrot.lane.b32.xlu0 %v3143_v63, %s5009_s20  ;;  %v3345_v63 = vld [vmem:[#allocation4 + $0xfa] sm:$0xff] }
 0x42d   : > { %v3007_v9 = vpop.permute.xlu1 %3006 }
 0x42e   : > { %3102 = vst.msk [vmem:[#allocation5 + $0x8] sm:$0xff] %vm3100_vm5, %v3007_v9  ;;  %v3005_v61 = vpop.permute.xlu0 %3004 }
 0x42f   : > { %3101 = vst.msk [vmem:[#allocation5] sm:$0xff] %vm3100_vm5, %v3005_v61  ;;  %3986 = vrot.lane.b32.xlu1 %v6565_v13, %s5010_s22 }
 0x430   : > { %3795 = vrot.lane.b32.xlu0 %v3722_v41, %s5009_s20 }
 0x431   : > { %v3011_v17 = vpop.permute.xlu1 %3010 }
 0x432   : > { %3104 = vst.msk [vmem:[#allocation5 + $0x18] sm:$0xff] %vm3100_vm5, %v3011_v17  ;;  %v3009_v42 = vpop.permute.xlu0 %3008 }
 0x433   : > { %3103 = vst.msk [vmem:[#allocation5 + $0x10] sm:$0xff] %vm3100_vm5, %v3009_v42  ;;  %3410 = vrot.lane.b32.xlu1 %v6565_v13, %s5007_s27  ;;  %v3731_v42 = vld [vmem:[#allocation4 + $0x109] sm:$0xff] }
 0x434   : > { %3219 = vrot.lane.b32.xlu0 %v3722_v41, %s5006_s17 }
 0x435   : > { %v3015_v24 = vpop.permute.xlu1 %3014 }
 0x436   : > { %3106 = vst.msk [vmem:[#allocation5 + $0x28] sm:$0xff] %vm3100_vm5, %v3015_v24  ;;  %v3013_v60 = vpop.permute.xlu0 %3012 }
 0x437   : > { %3105 = vst.msk [vmem:[#allocation5 + $0x20] sm:$0xff] %vm3100_vm5, %v3013_v60  ;;  %3412 = vrot.lane.b32.xlu1 %v6560_v16, %s5007_s27 }
 0x438   : > { %3988 = vrot.lane.b32.xlu0 %v6560_v16, %s5010_s22 }
 0x439   : > { %v3019_v19 = vpop.permute.xlu1 %3018 }
 0x43a   : > { %3108 = vst.msk [vmem:[#allocation5 + $0x38] sm:$0xff] %vm3100_vm5, %v3019_v19  ;;  %v3017_v53 = vpop.permute.xlu0 %3016 }
 0x43b   : > { %3107 = vst.msk [vmem:[#allocation5 + $0x30] sm:$0xff] %vm3100_vm5, %v3017_v53  ;;  %3606 = vrot.lane.b32.xlu1 %v6417_v14, %s5008_s8  ;;  %v3724_v14 = vld [vmem:[#allocation4 + $0xb1] sm:$0xff] }
 0x43c   : > { %3604 = vrot.lane.b32.xlu0 %v6423_v15, %s5008_s8 }
 0x43d   : > { %v3023_v13 = vpop.permute.xlu1 %3022 }
 0x43e   : > { %3110 = vst.msk [vmem:[#allocation5 + $0x48] sm:$0xff] %vm3100_vm5, %v3023_v13  ;;  %v3021_v28 = vpop.permute.xlu0 %3020  ;;  %v3924_v13 = vld [vmem:[#allocation4 + $0x10a] sm:$0xff] }
 0x43f   : > { %3109 = vst.msk [vmem:[#allocation5 + $0x40] sm:$0xff] %vm3100_vm5, %v3021_v28  ;;  %3221 = vrot.lane.b32.xlu1 %v3145_v58, %s5006_s17  ;;  %v3732_v28 = vld [vmem:[#allocation4 + $0x111] sm:$0xff] }
 0x440   : > { %3797 = vrot.lane.b32.xlu0 %v3145_v58, %s5009_s20 }
 0x441   : > { %v3027_v16 = vpop.permute.xlu1 %3026 }
 0x442   : > { %3112 = vst.msk [vmem:[#allocation5 + $0x58] sm:$0xff] %vm3100_vm5, %v3027_v16  ;;  %v3025_v11 = vpop.permute.xlu0 %3024 }
 0x443   : > { %3111 = vst.msk [vmem:[#allocation5 + $0x50] sm:$0xff] %vm3100_vm5, %v3025_v11  ;;  %3990 = vrot.lane.b32.xlu1 %v6573_v21, %s5010_s22 }
 0x444   : > { %3799 = vrot.lane.b32.xlu0 %v3724_v14, %s5009_s20 }
 0x445   : > { %v3031_v15 = vpop.permute.xlu1 %3030 }
 0x446   : > { %3114 = vst.msk [vmem:[#allocation5 + $0x68] sm:$0xff] %vm3100_vm5, %v3031_v15  ;;  %v3029_v38 = vpop.permute.xlu0 %3028 }
 0x447   : > { %3113 = vst.msk [vmem:[#allocation5 + $0x60] sm:$0xff] %vm3100_vm5, %v3029_v38  ;;  %3414 = vrot.lane.b32.xlu1 %v6573_v21, %s5007_s27 }
 0x448   : > { %3223 = vrot.lane.b32.xlu0 %v3724_v14, %s5006_s17  ;;  %v3347_v14 = vld [vmem:[#allocation4 + $0x112] sm:$0xff] }
 0x449   : > { %v3035_v48 = vpop.permute.xlu1 %3034 }
 0x44a   : > { %3116 = vst.msk [vmem:[#allocation5 + $0x78] sm:$0xff] %vm3100_vm5, %v3035_v48  ;;  %v3033_v33 = vpop.permute.xlu0 %3032 }
 0x44b   : > { %3115 = vst.msk [vmem:[#allocation5 + $0x70] sm:$0xff] %vm3100_vm5, %v3033_v33  ;;  %3416 = vrot.lane.b32.xlu1 %v6569_v20, %s5007_s27 }
 0x44c   : > { %3992 = vrot.lane.b32.xlu0 %v6569_v20, %s5010_s22 }
 0x44d   : > { %v3039_v51 = vpop.permute.xlu1 %3038 }
 0x44e   : > { %3118 = vst.msk [vmem:[#allocation5 + $0x88] sm:$0xff] %vm3100_vm5, %v3039_v51  ;;  %v3037_v25 = vpop.permute.xlu0 %3036 }
 0x44f   : > { %3117 = vst.msk [vmem:[#allocation5 + $0x80] sm:$0xff] %vm3100_vm5, %v3037_v25  ;;  %3610 = vrot.lane.b32.xlu1 %v6431_v32, %s5008_s8  ;;  %v3726_v32 = vld [vmem:[#allocation4 + $0xc9] sm:$0xff]  ;;  %v3733_v25 = vld [vmem:[#allocation4 + $0x121] sm:$0xff] }
 0x450   : > { %3608 = vrot.lane.b32.xlu0 %v6437_v45, %s5008_s8 }
 0x451   : > { %v3043_v21 = vpop.permute.xlu1 %3042 }
 0x452   : > { %3120 = vst.msk [vmem:[#allocation5 + $0x98] sm:$0xff] %vm3100_vm5, %v3043_v21  ;;  %v3041_v46 = vpop.permute.xlu0 %3040 }
 0x453   : > { %3119 = vst.msk [vmem:[#allocation5 + $0x90] sm:$0xff] %vm3100_vm5, %v3041_v46  ;;  %3225 = vrot.lane.b32.xlu1 %v3147_v36, %s5006_s17 }
 0x454   : > { %3801 = vrot.lane.b32.xlu0 %v3147_v36, %s5009_s20 }
 0x455   : > { %v3204_v20 = vpop.permute.xlu1 %3203 }
 0x456   : > { %3297 = vst.msk [vmem:[#allocation5 + $0x18] sm:$0xff] %vm3293_vm6, %v3204_v20  ;;  %v3202_v30 = vpop.permute.xlu0 %3201 }
 0x457   : > { %3296 = vst.msk [vmem:[#allocation5 + $0x10] sm:$0xff] %vm3293_vm6, %v3202_v30  ;;  %3994 = vrot.lane.b32.xlu1 %v6583_v47, %s5010_s22  ;;  %v3926_v30 = vld [vmem:[#allocation4 + $0x122] sm:$0xff] }
 0x458   : > { %3803 = vrot.lane.b32.xlu0 %v3726_v32, %s5009_s20 }
 0x459   : > { %v3397_v45 = vpop.permute.xlu1 %3396 }
 0x45a   : > { %3490 = vst.msk [vmem:[#allocation5 + $0x18] sm:$0xff] %vm3486_vm7, %v3397_v45  ;;  %v3395_v0 = vpop.permute.xlu0 %3394 }
 0x45b   : > { %3489 = vst.msk [vmem:[#allocation5 + $0x10] sm:$0xff] %vm3486_vm7, %v3395_v0  ;;  %3418 = vrot.lane.b32.xlu1 %v6583_v47, %s5007_s27 }
 0x45c   : > { %3227 = vrot.lane.b32.xlu0 %v3726_v32, %s5006_s17  ;;  %v3734_v32 = vld [vmem:[#allocation4 + $0x129] sm:$0xff] }
 0x45d   : > { %v3591_v37 = vpop.permute.xlu1 %3590 }
 0x45e   : > { %3684 = vst.msk [vmem:[#allocation5 + $0x18] sm:$0xff] %vm3680_vm8, %v3591_v37  ;;  %v3589_v50 = vpop.permute.xlu0 %3588 }
 0x45f   : > { %3683 = vst.msk [vmem:[#allocation5 + $0x10] sm:$0xff] %vm3680_vm8, %v3589_v50  ;;  %3420 = vrot.lane.b32.xlu1 %v6578_v27, %s5007_s27 }
 0x460   : > { %3996 = vrot.lane.b32.xlu0 %v6578_v27, %s5010_s22 }
 0x461   : > { %v3206_v39 = vpop.permute.xlu1 %3205 }
 0x462   : > { %3298 = vst.msk [vmem:[#allocation5 + $0x20] sm:$0xff] %vm3293_vm6, %v3206_v39  ;;  %v3782_v47 = vpop.permute.xlu0 %3781  ;;  %v3349_v39 = vld [vmem:[#allocation4 + $0x12a] sm:$0xff] }
 0x463   : > { %3876 = vst.msk [vmem:[#allocation5 + $0x10] sm:$0xff] %vm3873_vm9, %v3782_v47  ;;  %3614 = vrot.lane.b32.xlu1 %v6445_v62, %s5008_s8  ;;  %v3728_v62 = vld [vmem:[#allocation4 + $0xe1] sm:$0xff] }
 0x464   : > { %3612 = vrot.lane.b32.xlu0 %v6451_v5, %s5008_s8 }
 0x465   : > { %v3975_v40 = vpop.permute.xlu1 %3974 }
 0x466   : > { %4069 = vst.msk [vmem:[#allocation5 + $0x10] sm:$0xff] %vm4066_vm10, %v3975_v40  ;;  %v3784_v55 = vpop.permute.xlu0 %3783 }
 0x467   : > { %3877 = vst.msk [vmem:[#allocation5 + $0x18] sm:$0xff] %vm3873_vm9, %v3784_v55  ;;  %3229 = vrot.lane.b32.xlu1 %v3149_v59, %s5006_s17  ;;  %v2964_v55 = vld [vmem:[#allocation4 + $0x138] sm:$0xff] }
 0x468   : > { %3805 = vrot.lane.b32.xlu0 %v3149_v59, %s5009_s20 }
 0x469   : > { %v3399_v27 = vpop.permute.xlu1 %3398 }
 0x46a   : > { %3491 = vst.msk [vmem:[#allocation5 + $0x20] sm:$0xff] %vm3486_vm7, %v3399_v27  ;;  %v3208_v6 = vpop.permute.xlu0 %3207 }
 0x46b   : > { %3299 = vst.msk [vmem:[#allocation5 + $0x28] sm:$0xff] %vm3293_vm6, %v3208_v6  ;;  %3998 = vrot.lane.b32.xlu1 %v6591_v56, %s5010_s22 }
 0x46c   : > { %3807 = vrot.lane.b32.xlu0 %v3728_v62, %s5009_s20 }
 0x46d   : > { %v3401_v5 = vpop.permute.xlu1 %3400  ;;  %v4101_v54 = vld [vmem:[#allocation5 + $0x10] sm:$0xff] }
 0x46e   : > { %3492 = vst.msk [vmem:[#allocation5 + $0x28] sm:$0xff] %vm3486_vm7, %v3401_v5  ;;  %4889 = vmatprep.mubr.msk.f32.mxu1 %vm4147_vm11, %v4101_v54  ;;  %v3977_v1 = vpop.permute.xlu0 %3976  ;;  %v3543_v5 = vld [vmem:[#allocation4 + $0x140] sm:$0xff] }
 0x46f   : > { %4070 = vst.msk [vmem:[#allocation5 + $0x18] sm:$0xff] %vm4066_vm10, %v3977_v1  ;;  %3422 = vrot.lane.b32.xlu1 %v6591_v56, %s5007_s27 }
 0x470   : > { %3231 = vrot.lane.b32.xlu0 %v3728_v62, %s5006_s17  ;;  %v3735_v62 = vld [vmem:[#allocation4 + $0x139] sm:$0xff] }
 0x471   : > { %v3595_v4 = vpop.permute.xlu1 %3594 }
 0x472   : > { %3686 = vst.msk [vmem:[#allocation5 + $0x28] sm:$0xff] %vm3680_vm8, %v3595_v4  ;;  %v3593_v7 = vpop.permute.xlu0 %3592 }
 0x473   : > { %3685 = vst.msk [vmem:[#allocation5 + $0x20] sm:$0xff] %vm3680_vm8, %v3593_v7  ;;  %3424 = vrot.lane.b32.xlu1 %v6587_v31, %s5007_s27 }
 0x474   : > { %4000 = vrot.lane.b32.xlu0 %v6587_v31, %s5010_s22  ;;  %v3151_v31 = vld [vmem:[#allocation4 + $0xf1] sm:$0xff] }
 0x475   : > { %v3210_v23 = vpop.permute.xlu1 %3209 }
 0x476   : > { %3300 = vst.msk [vmem:[#allocation5 + $0x30] sm:$0xff] %vm3293_vm6, %v3210_v23  ;;  %v3786_v3 = vpop.permute.xlu0 %3785  ;;  %v4102_v2 = vld [vmem:[#allocation5 + $0x18] sm:$0xff]  ;;  %v3928_v23 = vld [vmem:[#allocation4 + $0x13a] sm:$0xff] }
 0x477   : > { %3878 = vst.msk [vmem:[#allocation5 + $0x20] sm:$0xff] %vm3873_vm9, %v3786_v3  ;;  %3618 = vrot.lane.b32.xlu1 %v6459_v29, %s5008_s8  ;;  %4890 = vmatmul.mubr.msk.f32.vlgmr.msra.gmra.mrb[0].mxu1 %vm4147_vm11, %v4102_v2  ;;  %v3736_v2 = vld [vmem:[#allocation4 + $0x141] sm:$0xff] }
 0x478   : > { %3616 = vrot.lane.b32.xlu0 %v6465_v43, %s5008_s8  ;;  %v3730_v43 = vld [vmem:[#allocation4 + $0xf9] sm:$0xff] }
 0x479   : > { %v3979_v56 = vpop.permute.xlu1 %3978 }
 0x47a   : > { %4071 = vst.msk [vmem:[#allocation5 + $0x20] sm:$0xff] %vm4066_vm10, %v3979_v56  ;;  %v3788_v49 = vpop.permute.xlu0 %3787 }
 0x47b   : > { %3879 = vst.msk [vmem:[#allocation5 + $0x28] sm:$0xff] %vm3873_vm9, %v3788_v49  ;;  %3233 = vrot.lane.b32.xlu1 %v3151_v31, %s5006_s17 }
 0x47c   : > { %3809 = vrot.lane.b32.xlu0 %v3151_v31, %s5009_s20 }
 0x47d   : > { %v3403_v12 = vpop.permute.xlu1 %3402 }
 0x47e   : > { %3493 = vst.msk [vmem:[#allocation5 + $0x30] sm:$0xff] %vm3486_vm7, %v3403_v12  ;;  %v3212_v29 = vpop.permute.xlu0 %3211 }
 0x47f   : > { %3301 = vst.msk [vmem:[#allocation5 + $0x38] sm:$0xff] %vm3293_vm6, %v3212_v29  ;;  %4002 = vrot.lane.b32.xlu1 %v6598_v34, %s5010_s22  ;;  %v3351_v29 = vld [vmem:[#allocation4 + $0x142] sm:$0xff] }
 0x480   : > { %3811 = vrot.lane.b32.xlu0 %v3730_v43, %s5009_s20 }
 0x481   : > { %v3405_v10 = vpop.permute.xlu1 %3404  ;;  %v4103_v26 = vld [vmem:[#allocation5 + $0x20] sm:$0xff] }
 0x482   : > { %3494 = vst.msk [vmem:[#allocation5 + $0x38] sm:$0xff] %vm3486_vm7, %v3405_v10  ;;  %v3981_v35 = vpop.permute.xlu0 %3980  ;;  %4892 = vmatprep.mubr.msk.f32.mxu1 %vm4147_vm11, %v4103_v26 }
 0x483   : > { %4072 = vst.msk [vmem:[#allocation5 + $0x28] sm:$0xff] %vm4066_vm10, %v3981_v35  ;;  %3426 = vrot.lane.b32.xlu1 %v6598_v34, %s5007_s27  ;;  %v2966_v35 = vld [vmem:[#allocation4 + $0x150] sm:$0xff] }
 0x484   : > { %3235 = vrot.lane.b32.xlu0 %v3730_v43, %s5006_s17 }
 0x485   : > { %v3599_v8 = vpop.permute.xlu1 %3598 }
 0x486   : > { %3688 = vst.msk [vmem:[#allocation5 + $0x38] sm:$0xff] %vm3680_vm8, %v3599_v8  ;;  %v3597_v44 = vpop.permute.xlu0 %3596 }
 0x487   : > { %3687 = vst.msk [vmem:[#allocation5 + $0x30] sm:$0xff] %vm3680_vm8, %v3597_v44  ;;  %3428 = vrot.lane.b32.xlu1 %v3345_v63, %s5007_s27 }
 0x488   : > { %4004 = vrot.lane.b32.xlu0 %v3345_v63, %s5010_s22  ;;  %v3737_v63 = vld [vmem:[#allocation4 + $0x151] sm:$0xff] }
 0x489   : > { %v3214_v9 = vpop.permute.xlu1 %3213 }
 0x48a   : > { %3302 = vst.msk [vmem:[#allocation5 + $0x40] sm:$0xff] %vm3293_vm6, %v3214_v9  ;;  %v3790_v61 = vpop.permute.xlu0 %3789  ;;  %v4104_v41 = vld [vmem:[#allocation5 + $0x28] sm:$0xff] }
 0x48b   : > { %3880 = vst.msk [vmem:[#allocation5 + $0x30] sm:$0xff] %vm3873_vm9, %v3790_v61  ;;  %3044 = vrot.lane.b32.xlu1 %v6479_v22, %s5004_s30  ;;  %4893 = vmatmul.mubr.msk.f32.gmra.mrb[2].mxu1 %vm4147_vm11, %v4104_v41  ;;  %v3545_v9 = vld [vmem:[#allocation4 + $0x158] sm:$0xff] }
 0x48c   : > { %3620 = vrot.lane.b32.xlu0 %v6479_v22, %s5008_s8 }
 0x48d   : > { %v3983_v34 = vpop.permute.xlu1 %3982 }
 0x48e   : > { %4073 = vst.msk [vmem:[#allocation5 + $0x30] sm:$0xff] %vm4066_vm10, %v3983_v34  ;;  %v3792_v17 = vpop.permute.xlu0 %3791 }
 0x48f   : > { %3881 = vst.msk [vmem:[#allocation5 + $0x38] sm:$0xff] %vm3873_vm9, %v3792_v17  ;;  %3813 = vrot.lane.b32.xlu1 %v3731_v42, %s5009_s20 }
 0x490   : > { %3622 = vrot.lane.b32.xlu0 %v6473_v18, %s5008_s8 }
 0x491   : > { %v3407_v24 = vpop.permute.xlu1 %3406 }
 0x492   : > { %3495 = vst.msk [vmem:[#allocation5 + $0x40] sm:$0xff] %vm3486_vm7, %v3407_v24  ;;  %v3216_v60 = vpop.permute.xlu0 %3215  ;;  %v3930_v24 = vld [vmem:[#allocation4 + $0x152] sm:$0xff] }
 0x493   : > { %3303 = vst.msk [vmem:[#allocation5 + $0x48] sm:$0xff] %vm3293_vm6, %v3216_v60  ;;  %3237 = vrot.lane.b32.xlu1 %v3731_v42, %s5006_s17  ;;  %v3738_v60 = vld [vmem:[#allocation4 + $0x159] sm:$0xff] }
 0x494   : > { %3046 = vrot.lane.b32.xlu0 %v6473_v18, %s5004_s30 }
 0x495   : > { %v3409_v22 = vpop.permute.xlu1 %3408  ;;  %v4105_v19 = vld [vmem:[#allocation5 + $0x30] sm:$0xff] }
 0x496   : > { %3496 = vst.msk [vmem:[#allocation5 + $0x48] sm:$0xff] %vm3486_vm7, %v3409_v22  ;;  %v3985_v53 = vpop.permute.xlu0 %3984  ;;  %4895 = vmatprep.mubr.msk.f32.mxu1 %vm4147_vm11, %v4105_v19 }
 0x497   : > { %4074 = vst.msk [vmem:[#allocation5 + $0x38] sm:$0xff] %vm4066_vm10, %v3985_v53  ;;  %4006 = vrot.lane.b32.xlu1 %v3924_v13, %s5010_s22 }
 0x498   : > { %3815 = vrot.lane.b32.xlu0 %v3732_v28, %s5009_s20 }
 0x499   : > { %v3603_v58 = vpop.permute.xlu1 %3602 }
 0x49a   : > { %3690 = vst.msk [vmem:[#allocation5 + $0x48] sm:$0xff] %vm3680_vm8, %v3603_v58  ;;  %v3601_v16 = vpop.permute.xlu0 %3600  ;;  %v3353_v58 = vld [vmem:[#allocation4 + $0x15a] sm:$0xff] }
 0x49b   : > { %3689 = vst.msk [vmem:[#allocation5 + $0x40] sm:$0xff] %vm3680_vm8, %v3601_v16  ;;  %3430 = vrot.lane.b32.xlu1 %v3924_v13, %s5007_s27 }
 0x49c   : > { %3239 = vrot.lane.b32.xlu0 %v3732_v28, %s5006_s17 }
 0x49d   : > { %v3218_v18 = vpop.permute.xlu1 %3217 }
 0x49e   : > { %3304 = vst.msk [vmem:[#allocation5 + $0x50] sm:$0xff] %vm3293_vm6, %v3218_v18  ;;  %v3794_v11 = vpop.permute.xlu0 %3793  ;;  %v4106_v15 = vld [vmem:[#allocation5 + $0x38] sm:$0xff] }
 0x49f   : > { %3882 = vst.msk [vmem:[#allocation5 + $0x40] sm:$0xff] %vm3873_vm9, %v3794_v11  ;;  %3432 = vrot.lane.b32.xlu1 %v3347_v14, %s5007_s27  ;;  %4896 = vmatmul.mubr.msk.f32.gmra.mrb[4].mxu1 %vm4147_vm11, %v4106_v15  ;;  %v2968_v11 = vld [vmem:[#allocation4 + $0x168] sm:$0xff] }
 0x4a0   : > { %4008 = vrot.lane.b32.xlu0 %v3347_v14, %s5010_s22 }
 0x4a1   : > { %v3987_v38 = vpop.permute.xlu1 %3986 }
 0x4a2   : > { %4075 = vst.msk [vmem:[#allocation5 + $0x40] sm:$0xff] %vm4066_vm10, %v3987_v38  ;;  %v3796_v48 = vpop.permute.xlu0 %3795  ;;  %v3739_v38 = vld [vmem:[#allocation4 + $0x169] sm:$0xff] }
 0x4a3   : > { %3883 = vst.msk [vmem:[#allocation5 + $0x48] sm:$0xff] %vm3873_vm9, %v3796_v48  ;;  %3048 = vrot.lane.b32.xlu1 %v6493_v57, %s5004_s30 }
 0x4a4   : > { %3624 = vrot.lane.b32.xlu0 %v6493_v57, %s5008_s8 }
 0x4a5   : > { %v3411_v33 = vpop.permute.xlu1 %3410 }
 0x4a6   : > { %3497 = vst.msk [vmem:[#allocation5 + $0x50] sm:$0xff] %vm3486_vm7, %v3411_v33  ;;  %v3220_v51 = vpop.permute.xlu0 %3219  ;;  %v3547_v33 = vld [vmem:[#allocation4 + $0x170] sm:$0xff] }
 0x4a7   : > { %3305 = vst.msk [vmem:[#allocation5 + $0x58] sm:$0xff] %vm3293_vm6, %v3220_v51  ;;  %3817 = vrot.lane.b32.xlu1 %v3733_v25, %s5009_s20 }
 0x4a8   : > { %3626 = vrot.lane.b32.xlu0 %v6487_v52, %s5008_s8 }
 0x4a9   : > { %v3413_v21 = vpop.permute.xlu1 %3412  ;;  %v4107_v46 = vld [vmem:[#allocation5 + $0x40] sm:$0xff] }
 0x4aa   : > { %3498 = vst.msk [vmem:[#allocation5 + $0x58] sm:$0xff] %vm3486_vm7, %v3413_v21  ;;  %v3989_v36 = vpop.permute.xlu0 %3988  ;;  %4898 = vmatprep.mubr.msk.f32.mxu1 %vm4147_vm11, %v4107_v46 }
 0x4ab   : > { %4076 = vst.msk [vmem:[#allocation5 + $0x48] sm:$0xff] %vm4066_vm10, %v3989_v36  ;;  %3241 = vrot.lane.b32.xlu1 %v3733_v25, %s5006_s17  ;;  %v3932_v36 = vld [vmem:[#allocation4 + $0x16a] sm:$0xff] }
 0x4ac   : > { %3050 = vrot.lane.b32.xlu0 %v6487_v52, %s5004_s30 }
 0x4ad   : > { %v3607_v57 = vpop.permute.xlu1 %3606 }
 0x4ae   : > { %3692 = vst.msk [vmem:[#allocation5 + $0x58] sm:$0xff] %vm3680_vm8, %v3607_v57  ;;  %v3605_v20 = vpop.permute.xlu0 %3604  ;;  %v3740_v57 = vld [vmem:[#allocation4 + $0x171] sm:$0xff] }
 0x4af   : > { %3691 = vst.msk [vmem:[#allocation5 + $0x50] sm:$0xff] %vm3680_vm8, %v3605_v20  ;;  %4010 = vrot.lane.b32.xlu1 %v3926_v30, %s5010_s22 }
 0x4b0   : > { %3819 = vrot.lane.b32.xlu0 %v3734_v32, %s5009_s20 }
 0x4b1   : > { %v3222_v45 = vpop.permute.xlu1 %3221 }
 0x4b2   : > { %3306 = vst.msk [vmem:[#allocation5 + $0x60] sm:$0xff] %vm3293_vm6, %v3222_v45  ;;  %v3798_v0 = vpop.permute.xlu0 %3797  ;;  %v4108_v37 = vld [vmem:[#allocation5 + $0x48] sm:$0xff] }
 0x4b3   : > { %3884 = vst.msk [vmem:[#allocation5 + $0x50] sm:$0xff] %vm3873_vm9, %v3798_v0  ;;  %3434 = vrot.lane.b32.xlu1 %v3926_v30, %s5007_s27  ;;  %4899 = vmatmul.mubr.msk.f32.gmra.mrb[6].mxu1 %vm4147_vm11, %v4108_v37  ;;  %v3355_v37 = vld [vmem:[#allocation4 + $0x172] sm:$0xff] }
 0x4b4   : > { %3243 = vrot.lane.b32.xlu0 %v3734_v32, %s5006_s17 }
 0x4b5   : > { %v3991_v52 = vpop.permute.xlu1 %3990 }
 0x4b6   : > { %4077 = vst.msk [vmem:[#allocation5 + $0x50] sm:$0xff] %vm4066_vm10, %v3991_v52  ;;  %v3800_v50 = vpop.permute.xlu0 %3799 }
 0x4b7   : > { %3885 = vst.msk [vmem:[#allocation5 + $0x58] sm:$0xff] %vm3873_vm9, %v3800_v50  ;;  %3436 = vrot.lane.b32.xlu1 %v3349_v39, %s5007_s27 }
 0x4b8   : > { %4012 = vrot.lane.b32.xlu0 %v3349_v39, %s5010_s22  ;;  %v2970_v39 = vld [vmem:[#allocation4 + $0x180] sm:$0xff] }
 0x4b9   : > { %v3415_v47 = vpop.permute.xlu1 %3414 }
 0x4ba   : > { %3499 = vst.msk [vmem:[#allocation5 + $0x60] sm:$0xff] %vm3486_vm7, %v3415_v47  ;;  %v3224_v40 = vpop.permute.xlu0 %3223 }
 0x4bb   : > { %3307 = vst.msk [vmem:[#allocation5 + $0x68] sm:$0xff] %vm3293_vm6, %v3224_v40  ;;  %3052 = vrot.lane.b32.xlu1 %v2964_v55, %s5004_s30 }
 0x4bc   : > { %3628 = vrot.lane.b32.xlu0 %v2964_v55, %s5008_s8 }
 0x4bd   : > { %v3417_v59 = vpop.permute.xlu1 %3416  ;;  %v4109_v27 = vld [vmem:[#allocation5 + $0x50] sm:$0xff] }
 0x4be   : > { %3500 = vst.msk [vmem:[#allocation5 + $0x68] sm:$0xff] %vm3486_vm7, %v3417_v59  ;;  %v3993_v6 = vpop.permute.xlu0 %3992  ;;  %4901 = vmatprep.mubr.msk.f32.mxu1 %vm4147_vm11, %v4109_v27  ;;  %v3741_v59 = vld [vmem:[#allocation4 + $0x181] sm:$0xff] }
 0x4bf   : > { %4078 = vst.msk [vmem:[#allocation5 + $0x58] sm:$0xff] %vm4066_vm10, %v3993_v6  ;;  %3821 = vrot.lane.b32.xlu1 %v3735_v62, %s5009_s20  ;;  %v3549_v27 = vld [vmem:[#allocation4 + $0x188] sm:$0xff] }
 0x4c0   : > { %3630 = vrot.lane.b32.xlu0 %v3543_v5, %s5008_s8 }
 0x4c1   : > { %v3611_v54 = vpop.permute.xlu1 %3610 }
 0x4c2   : > { %3694 = vst.msk [vmem:[#allocation5 + $0x68] sm:$0xff] %vm3680_vm8, %v3611_v54  ;;  %v3609_v1 = vpop.permute.xlu0 %3608 }
 0x4c3   : > { %3693 = vst.msk [vmem:[#allocation5 + $0x60] sm:$0xff] %vm3680_vm8, %v3609_v1  ;;  %3245 = vrot.lane.b32.xlu1 %v3735_v62, %s5006_s17 }
 0x4c4   : > { %3054 = vrot.lane.b32.xlu0 %v3543_v5, %s5004_s30  ;;  %v3133_v5 = vld [vmem:[#allocation4 + $0x19] sm:$0xff] }
 0x4c5   : > { %v3226_v4 = vpop.permute.xlu1 %3225 }
 0x4c6   : > { %3308 = vst.msk [vmem:[#allocation5 + $0x70] sm:$0xff] %vm3293_vm6, %v3226_v4  ;;  %v3802_v7 = vpop.permute.xlu0 %3801  ;;  %v4110_v3 = vld [vmem:[#allocation5 + $0x58] sm:$0xff] }
 0x4c7   : > { %3886 = vst.msk [vmem:[#allocation5 + $0x60] sm:$0xff] %vm3873_vm9, %v3802_v7  ;;  %4014 = vrot.lane.b32.xlu1 %v3928_v23, %s5010_s22  ;;  %4902 = vmatmul.mubr.msk.f32.gmra.mrb[8].mxu1 %vm4147_vm11, %v4110_v3  ;;  %v3742_v4 = vld [vmem:[#allocation4 + $0x189] sm:$0xff] }
 0x4c8   : > { %3823 = vrot.lane.b32.xlu0 %v3736_v2, %s5009_s20 }
 0x4c9   : > { %v3995_v56 = vpop.permute.xlu1 %3994 }
 0x4ca   : > { %4079 = vst.msk [vmem:[#allocation5 + $0x60] sm:$0xff] %vm4066_vm10, %v3995_v56  ;;  %v3804_v49 = vpop.permute.xlu0 %3803  ;;  %v3934_v56 = vld [vmem:[#allocation4 + $0x182] sm:$0xff] }
 0x4cb   : > { %3887 = vst.msk [vmem:[#allocation5 + $0x68] sm:$0xff] %vm3873_vm9, %v3804_v49  ;;  %3438 = vrot.lane.b32.xlu1 %v3928_v23, %s5007_s27 }
 0x4cc   : > { %3247 = vrot.lane.b32.xlu0 %v3736_v2, %s5006_s17  ;;  %v3134_v2 = vld [vmem:[#allocation4 + $0x21] sm:$0xff] }
 0x4cd   : > { %v3419_v31 = vpop.permute.xlu1 %3418 }
 0x4ce   : > { %3501 = vst.msk [vmem:[#allocation5 + $0x70] sm:$0xff] %vm3486_vm7, %v3419_v31  ;;  %v3228_v12 = vpop.permute.xlu0 %3227 }
 0x4cf   : > { %3309 = vst.msk [vmem:[#allocation5 + $0x78] sm:$0xff] %vm3293_vm6, %v3228_v12  ;;  %3440 = vrot.lane.b32.xlu1 %v3351_v29, %s5007_s27  ;;  %v3326_v12 = vld [vmem:[#allocation4 + $0x1a] sm:$0xff] }
 0x4d0   : > { %4016 = vrot.lane.b32.xlu0 %v3351_v29, %s5010_s22 }
 0x4d1   : > { %v3421_v43 = vpop.permute.xlu1 %3420  ;;  %v4111_v10 = vld [vmem:[#allocation5 + $0x60] sm:$0xff] }
 0x4d2   : > { %3502 = vst.msk [vmem:[#allocation5 + $0x78] sm:$0xff] %vm3486_vm7, %v3421_v43  ;;  %v3997_v26 = vpop.permute.xlu0 %3996  ;;  %4904 = vmatprep.mubr.msk.f32.mxu1 %vm4147_vm11, %v4111_v10  ;;  %v3935_v10 = vld [vmem:[#allocation4 + $0x18a] sm:$0xff] }
 0x4d3   : > { %4080 = vst.msk [vmem:[#allocation5 + $0x68] sm:$0xff] %vm4066_vm10, %v3997_v26  ;;  %3056 = vrot.lane.b32.xlu1 %v2966_v35, %s5004_s30 }
 0x4d4   : > { %3632 = vrot.lane.b32.xlu0 %v2966_v35, %s5008_s8 }
 0x4d5   : > { %v3615_v8 = vpop.permute.xlu1 %3614 }
 0x4d6   : > { %3696 = vst.msk [vmem:[#allocation5 + $0x78] sm:$0xff] %vm3680_vm8, %v3615_v8  ;;  %v3613_v44 = vpop.permute.xlu0 %3612 }
 0x4d7   : > { %3695 = vst.msk [vmem:[#allocation5 + $0x70] sm:$0xff] %vm3680_vm8, %v3613_v44  ;;  %3825 = vrot.lane.b32.xlu1 %v3737_v63, %s5009_s20  ;;  %v3327_v44 = vld [vmem:[#allocation4 + $0x22] sm:$0xff] }
 0x4d8   : > { %3634 = vrot.lane.b32.xlu0 %v3545_v9, %s5008_s8 }
 0x4d9   : > { %v3230_v61 = vpop.permute.xlu1 %3229 }
 0x4da   : > { %3310 = vst.msk [vmem:[#allocation5 + $0x80] sm:$0xff] %vm3293_vm6, %v3230_v61  ;;  %v3806_v41 = vpop.permute.xlu0 %3805  ;;  %v4112_v34 = vld [vmem:[#allocation5 + $0x68] sm:$0xff] }
 0x4db   : > { %3888 = vst.msk [vmem:[#allocation5 + $0x70] sm:$0xff] %vm3873_vm9, %v3806_v41  ;;  %3249 = vrot.lane.b32.xlu1 %v3737_v63, %s5006_s17  ;;  %4905 = vmatmul.mubr.msk.f32.gmra.mrb[10].mxu1 %vm4147_vm11, %v4112_v34  ;;  %v3550_v63 = vld [vmem:[#allocation4 + $0x198] sm:$0xff]  ;;  %v3520_v41 = vld [vmem:[#allocation4 + $0x30] sm:$0xff]  ;;  %v3551_v34 = vld [vmem:[#allocation4 + $0x1a0] sm:$0xff] }
 0x4dc   : > { %3058 = vrot.lane.b32.xlu0 %v3545_v9, %s5004_s30 }
 0x4dd   : > { %v3999_v17 = vpop.permute.xlu1 %3998 }
 0x4de   : > { %4081 = vst.msk [vmem:[#allocation5 + $0x70] sm:$0xff] %vm4066_vm10, %v3999_v17  ;;  %v3808_v42 = vpop.permute.xlu0 %3807 }
 0x4df   : > { %3889 = vst.msk [vmem:[#allocation5 + $0x78] sm:$0xff] %vm3873_vm9, %v3808_v42  ;;  %4018 = vrot.lane.b32.xlu1 %v3930_v24, %s5010_s22 }
 0x4e0   : > { %3827 = vrot.lane.b32.xlu0 %v3738_v60, %s5009_s20 }
 0x4e1   : > { %v3423_v22 = vpop.permute.xlu1 %3422 }
 0x4e2   : > { %3503 = vst.msk [vmem:[#allocation5 + $0x80] sm:$0xff] %vm3486_vm7, %v3423_v22  ;;  %v3232_v19 = vpop.permute.xlu0 %3231 }
 0x4e3   : > { %3311 = vst.msk [vmem:[#allocation5 + $0x88] sm:$0xff] %vm3293_vm6, %v3232_v19  ;;  %3442 = vrot.lane.b32.xlu1 %v3930_v24, %s5007_s27  ;;  %v3521_v24 = vld [vmem:[#allocation4 + $0x38] sm:$0xff] }
 0x4e4   : > { %3251 = vrot.lane.b32.xlu0 %v3738_v60, %s5006_s17  ;;  %v3743_v60 = vld [vmem:[#allocation4 + $0x199] sm:$0xff] }
 0x4e5   : > { %v3425_v53 = vpop.permute.xlu1 %3424  ;;  %v4113_v13 = vld [vmem:[#allocation5 + $0x70] sm:$0xff] }
 0x4e6   : > { %3504 = vst.msk [vmem:[#allocation5 + $0x88] sm:$0xff] %vm3486_vm7, %v3425_v53  ;;  %v4001_v28 = vpop.permute.xlu0 %4000  ;;  %4907 = vmatprep.mubr.msk.f32.mxu1 %vm4147_vm11, %v4113_v13  ;;  %v3713_v13 = vld [vmem:[#allocation4 + $0x31] sm:$0xff] }
 0x4e7   : > { %4082 = vst.msk [vmem:[#allocation5 + $0x78] sm:$0xff] %vm4066_vm10, %v4001_v28  ;;  %3444 = vrot.lane.b32.xlu1 %v3353_v58, %s5007_s27  ;;  %v3744_v28 = vld [vmem:[#allocation4 + $0x1a1] sm:$0xff] }
 0x4e8   : > { %4020 = vrot.lane.b32.xlu0 %v3353_v58, %s5010_s22 }
 0x4e9   : > { %v3619_v16 = vpop.permute.xlu1 %3618 }
 0x4ea   : > { %3698 = vst.msk [vmem:[#allocation5 + $0x88] sm:$0xff] %vm3680_vm8, %v3619_v16  ;;  %v3617_v18 = vpop.permute.xlu0 %3616 }
 0x4eb   : > { %3697 = vst.msk [vmem:[#allocation5 + $0x80] sm:$0xff] %vm3680_vm8, %v3617_v18  ;;  %3060 = vrot.lane.b32.xlu1 %v2968_v11, %s5004_s30  ;;  %v3714_v18 = vld [vmem:[#allocation4 + $0x39] sm:$0xff] }
 0x4ec   : > { %3636 = vrot.lane.b32.xlu0 %v2968_v11, %s5008_s8  ;;  %v3936_v11 = vld [vmem:[#allocation4 + $0x19a] sm:$0xff] }
 0x4ed   : > { %v3234_v14 = vpop.permute.xlu1 %3233 }
 0x4ee   : > { %3312 = vst.msk [vmem:[#allocation5 + $0x90] sm:$0xff] %vm3293_vm6, %v3234_v14  ;;  %v3810_v15 = vpop.permute.xlu0 %3809  ;;  %v4114_v48 = vld [vmem:[#allocation5 + $0x78] sm:$0xff] }
 0x4ef   : > { %3890 = vst.msk [vmem:[#allocation5 + $0x80] sm:$0xff] %vm3873_vm9, %v3810_v15  ;;  %3829 = vrot.lane.b32.xlu1 %v3739_v38, %s5009_s20  ;;  %4908 = vmatmul.mubr.msk.f32.gmra.mrb[12].mxu1 %vm4147_vm11, %v4114_v48  ;;  %v3906_v48 = vld [vmem:[#allocation4 + $0x32] sm:$0xff] }
 0x4f0   : > { %3638 = vrot.lane.b32.xlu0 %v3547_v33, %s5008_s8 }
 0x4f1   : > { %v4003_v51 = vpop.permute.xlu1 %4002 }
 0x4f2   : > { %4083 = vst.msk [vmem:[#allocation5 + $0x80] sm:$0xff] %vm4066_vm10, %v4003_v51  ;;  %v3812_v25 = vpop.permute.xlu0 %3811 }
 0x4f3   : > { %3891 = vst.msk [vmem:[#allocation5 + $0x88] sm:$0xff] %vm3873_vm9, %v3812_v25  ;;  %3253 = vrot.lane.b32.xlu1 %v3739_v38, %s5006_s17 }
 0x4f4   : > { %3062 = vrot.lane.b32.xlu0 %v3547_v33, %s5004_s30  ;;  %v3937_v33 = vld [vmem:[#allocation4 + $0x1a2] sm:$0xff] }
 0x4f5   : > { %v3427_v21 = vpop.permute.xlu1 %3426 }
 0x4f6   : > { %3505 = vst.msk [vmem:[#allocation5 + $0x90] sm:$0xff] %vm3486_vm7, %v3427_v21  ;;  %v3236_v46 = vpop.permute.xlu0 %3235  ;;  %v3907_v21 = vld [vmem:[#allocation4 + $0x3a] sm:$0xff] }
 0x4f7   : > { %3313 = vst.msk [vmem:[#allocation5 + $0x98] sm:$0xff] %vm3293_vm6, %v3236_v46  ;;  %4022 = vrot.lane.b32.xlu1 %v3932_v36, %s5010_s22 }
 0x4f8   : > { %3831 = vrot.lane.b32.xlu0 %v3740_v57, %s5009_s20 }
 0x4f9   : > { %v3429_v20 = vpop.permute.xlu1 %3428  ;;  %v4115_v30 = vld [vmem:[#allocation5 + $0x80] sm:$0xff] }
 0x4fa   : > { %3506 = vst.msk [vmem:[#allocation5 + $0x98] sm:$0xff] %vm3486_vm7, %v3429_v20  ;;  %v4005_v32 = vpop.permute.xlu0 %4004  ;;  %4910 = vmatprep.mubr.msk.f32.mxu1 %vm4147_vm11, %v4115_v30 }
 0x4fb   : > { %4084 = vst.msk [vmem:[#allocation5 + $0x88] sm:$0xff] %vm4066_vm10, %v4005_v32  ;;  %3446 = vrot.lane.b32.xlu1 %v3932_v36, %s5007_s27 }
 0x4fc   : > { %3255 = vrot.lane.b32.xlu0 %v3740_v57, %s5006_s17 }
 0x4fd   : > { %v3045_v45 = vpop.permute.xlu1 %3044 }
 0x4fe   : > { %3121 = vst.msk [vmem:[#allocation5 + $0xa0] sm:$0xff] %vm3100_vm5, %v3045_v45  ;;  %v3621_v0 = vpop.permute.xlu0 %3620 }
 0x4ff   : > { %3699 = vst.msk [vmem:[#allocation5 + $0x90] sm:$0xff] %vm3680_vm8, %v3621_v0  ;;  %3448 = vrot.lane.b32.xlu1 %v3355_v37, %s5007_s27 }
 0x500   : > { %4024 = vrot.lane.b32.xlu0 %v3355_v37, %s5010_s22 }
 0x501   : > { %v3814_v52 = vpop.permute.xlu1 %3813 }
 0x502   : > { %3892 = vst.msk [vmem:[#allocation5 + $0x90] sm:$0xff] %vm3873_vm9, %v3814_v52  ;;  %v3623_v50 = vpop.permute.xlu0 %3622  ;;  %v4116_v47 = vld [vmem:[#allocation5 + $0x88] sm:$0xff]  ;;  %v7134_v52 = vld [vmem:[%s7307_s4] ss:$0 sm:$0xff] }
 0x503   : > { %3700 = vst.msk [vmem:[#allocation5 + $0x98] sm:$0xff] %vm3680_vm8, %v3623_v50  ;;  %3064 = vrot.lane.b32.xlu1 %v2970_v39, %s5004_s30  ;;  %4911 = vmatmul.mubr.msk.f32.gmra.mrb[14].mxu1 %vm4147_vm11, %v4116_v47 }
 0x504   : > { %3640 = vrot.lane.b32.xlu0 %v2970_v39, %s5008_s8 }
 0x505   : > { %v3238_v40 = vpop.permute.xlu1 %3237 }
 0x506   : > { %3314 = vst.msk [vmem:[#allocation5 + $0xa0] sm:$0xff] %vm3293_vm6, %v3238_v40  ;;  %v3047_v55 = vpop.permute.xlu0 %3046 }
 0x507   : > { %3122 = vst.msk [vmem:[#allocation5 + $0xa8] sm:$0xff] %vm3100_vm5, %v3047_v55  ;;  %3833 = vrot.lane.b32.xlu1 %v3741_v59, %s5009_s20 }
 0x508   : > { %3642 = vrot.lane.b32.xlu0 %v3549_v27, %s5008_s8 }
 0x509   : > { %v4007_v6 = vpop.permute.xlu1 %4006 }
 0x50a   : > { %4085 = vst.msk [vmem:[#allocation5 + $0x90] sm:$0xff] %vm4066_vm10, %v4007_v6  ;;  %v3816_v62 = vpop.permute.xlu0 %3815 }
 0x50b   : > { %3893 = vst.msk [vmem:[#allocation5 + $0x98] sm:$0xff] %vm3873_vm9, %v3816_v62  ;;  %3197 = vrot.lane.b32.xlu1 %v3133_v5, %s5006_s17 }
 0x50c   : > { %3066 = vrot.lane.b32.xlu0 %v3549_v27, %s5004_s30 }
 0x50d   : > { %v3431_v54 = vpop.permute.xlu1 %3430 }
 0x50e   : > { %3507 = vst.msk [vmem:[#allocation5 + $0xa0] sm:$0xff] %vm3486_vm7, %v3431_v54  ;;  %v3240_v1 = vpop.permute.xlu0 %3239 }
 0x50f   : > { %3315 = vst.msk [vmem:[#allocation5 + $0xa8] sm:$0xff] %vm3293_vm6, %v3240_v1  ;;  %3835 = vrot.lane.b32.xlu1 %v3742_v4, %s5009_s20 }
 0x510   : > { %3257 = vrot.lane.b32.xlu0 %v3741_v59, %s5006_s17 }
 0x511   : > { %v3433_v7 = vpop.permute.xlu1 %3432  ;;  %v4117_v23 = vld [vmem:[#allocation5 + $0x90] sm:$0xff] }
 0x512   : > { %3508 = vst.msk [vmem:[#allocation5 + $0xa8] sm:$0xff] %vm3486_vm7, %v3433_v7  ;;  %v4009_v3 = vpop.permute.xlu0 %4008  ;;  %4913 = vmatprep.mubr.msk.f32.mxu1 %vm4147_vm11, %v4117_v23 }
 0x513   : > { %4086 = vst.msk [vmem:[#allocation5 + $0x98] sm:$0xff] %vm4066_vm10, %v4009_v3  ;;  %3199 = vrot.lane.b32.xlu1 %v3134_v2, %s5006_s17 }
 0x514   : > { %4026 = vrot.lane.b32.xlu0 %v3934_v56, %s5010_s22 }
 0x515   : > { %v3049_v49 = vpop.permute.xlu1 %3048 }
 0x516   : > { %3123 = vst.msk [vmem:[#allocation5 + $0xb0] sm:$0xff] %vm3100_vm5, %v3049_v49  ;;  %v3625_v31 = vpop.permute.xlu0 %3624 }
 0x517   : > { %3701 = vst.msk [vmem:[#allocation5 + $0xa0] sm:$0xff] %vm3680_vm8, %v3625_v31  ;;  %3390 = vrot.lane.b32.xlu1 %v3326_v12, %s5007_s27 }
 0x518   : > { %3259 = vrot.lane.b32.xlu0 %v3742_v4, %s5006_s17 }
 0x519   : > { %v3818_v29 = vpop.permute.xlu1 %3817 }
 0x51a   : > { %3894 = vst.msk [vmem:[#allocation5 + $0xa0] sm:$0xff] %vm3873_vm9, %v3818_v29  ;;  %v3627_v43 = vpop.permute.xlu0 %3626  ;;  %v4118_v26 = vld [vmem:[#allocation5 + $0x98] sm:$0xff] }
 0x51b   : > { %3702 = vst.msk [vmem:[#allocation5 + $0xa8] sm:$0xff] %vm3680_vm8, %v3627_v43  ;;  %4028 = vrot.lane.b32.xlu1 %v3935_v10, %s5010_s22  ;;  %4914 = vmatmul.mubr.msk.f32.gmra.mrb[16].mxu1 %vm4147_vm11, %v4118_v26 }
 0x51c   : > { %3450 = vrot.lane.b32.xlu0 %v3934_v56, %s5007_s27 }
 0x51d   : > { %v3242_v35 = vpop.permute.xlu1 %3241 }
 0x51e   : > { %3316 = vst.msk [vmem:[#allocation5 + $0xb0] sm:$0xff] %vm3293_vm6, %v3242_v35  ;;  %v3051_v8 = vpop.permute.xlu0 %3050 }
 0x51f   : > { %3124 = vst.msk [vmem:[#allocation5 + $0xb8] sm:$0xff] %vm3100_vm5, %v3051_v8  ;;  %3452 = vrot.lane.b32.xlu1 %v3935_v10, %s5007_s27 }
 0x520   : > { %3392 = vrot.lane.b32.xlu0 %v3327_v44, %s5007_s27 }
 0x521   : > { %v4011_v9 = vpop.permute.xlu1 %4010 }
 0x522   : > { %4087 = vst.msk [vmem:[#allocation5 + $0xa0] sm:$0xff] %vm4066_vm10, %v4011_v9  ;;  %v3820_v61 = vpop.permute.xlu0 %3819 }
 0x523   : > { %3895 = vst.msk [vmem:[#allocation5 + $0xa8] sm:$0xff] %vm3873_vm9, %v3820_v61  ;;  %3644 = vrot.lane.b32.xlu1 %v3550_v63, %s5008_s8 }
 0x524   : > { %3584 = vrot.lane.b32.xlu0 %v3520_v41, %s5008_s8 }
 0x525   : > { %v3435_v17 = vpop.permute.xlu1 %3434 }
 0x526   : > { %3509 = vst.msk [vmem:[#allocation5 + $0xb0] sm:$0xff] %vm3486_vm7, %v3435_v17  ;;  %v3244_v42 = vpop.permute.xlu0 %3243 }
 0x527   : > { %3317 = vst.msk [vmem:[#allocation5 + $0xb8] sm:$0xff] %vm3293_vm6, %v3244_v42  ;;  %3646 = vrot.lane.b32.xlu1 %v3551_v34, %s5008_s8 }
 0x528   : > { %3586 = vrot.lane.b32.xlu0 %v3521_v24, %s5008_s8 }
 0x529   : > { %v3437_v22 = vpop.permute.xlu1 %3436  ;;  %v4119_v19 = vld [vmem:[#allocation5 + $0xa0] sm:$0xff] }
 0x52a   : > { %3510 = vst.msk [vmem:[#allocation5 + $0xb8] sm:$0xff] %vm3486_vm7, %v3437_v22  ;;  %v4013_v53 = vpop.permute.xlu0 %4012  ;;  %4916 = vmatprep.mubr.msk.f32.mxu1 %vm4147_vm11, %v4119_v19 }
 0x52b   : > { %4088 = vst.msk [vmem:[#allocation5 + $0xa8] sm:$0xff] %vm4066_vm10, %v4013_v53  ;;  %3837 = vrot.lane.b32.xlu1 %v3743_v60, %s5009_s20 }
 0x52c   : > { %3777 = vrot.lane.b32.xlu0 %v3713_v13, %s5009_s20 }
 0x52d   : > { %v3053_v58 = vpop.permute.xlu1 %3052 }
 0x52e   : > { %3125 = vst.msk [vmem:[#allocation5 + $0xc0] sm:$0xff] %vm3100_vm5, %v3053_v58  ;;  %v3629_v16 = vpop.permute.xlu0 %3628 }
 0x52f   : > { %3703 = vst.msk [vmem:[#allocation5 + $0xb0] sm:$0xff] %vm3680_vm8, %v3629_v16  ;;  %3839 = vrot.lane.b32.xlu1 %v3744_v28, %s5009_s20 }
 0x530   : > { %3779 = vrot.lane.b32.xlu0 %v3714_v18, %s5009_s20 }
 0x531   : > { %v3822_v14 = vpop.permute.xlu1 %3821 }
 0x532   : > { %3896 = vst.msk [vmem:[#allocation5 + $0xb0] sm:$0xff] %vm3873_vm9, %v3822_v14  ;;  %v3631_v15 = vpop.permute.xlu0 %3630  ;;  %v4120_v38 = vld [vmem:[#allocation5 + $0xa8] sm:$0xff] }
 0x533   : > { %3704 = vst.msk [vmem:[#allocation5 + $0xb8] sm:$0xff] %vm3680_vm8, %v3631_v15  ;;  %4030 = vrot.lane.b32.xlu1 %v3936_v11, %s5010_s22  ;;  %4917 = vmatmul.mubr.msk.f32.gmra.mrb[18].mxu1 %vm4147_vm11, %v4120_v38 }
 0x534   : > { %3970 = vrot.lane.b32.xlu0 %v3906_v48, %s5010_s22 }
 0x535   : > { %v3246_v51 = vpop.permute.xlu1 %3245 }
 0x536   : > { %3318 = vst.msk [vmem:[#allocation5 + $0xc0] sm:$0xff] %vm3293_vm6, %v3246_v51  ;;  %v3055_v25 = vpop.permute.xlu0 %3054 }
 0x537   : > { %3126 = vst.msk [vmem:[#allocation5 + $0xc8] sm:$0xff] %vm3100_vm5, %v3055_v25  ;;  %4032 = vrot.lane.b32.xlu1 %v3937_v33, %s5010_s22 }
 0x538   : > { %3972 = vrot.lane.b32.xlu0 %v3907_v21, %s5010_s22 }
 0x539   : > { %v4015_v46 = vpop.permute.xlu1 %4014 }
 0x53a   : > { %4089 = vst.msk [vmem:[#allocation5 + $0xb0] sm:$0xff] %vm4066_vm10, %v4015_v46  ;;  %v3824_v36 = vpop.permute.xlu0 %3823 }
 0x53b   : > { %3897 = vst.msk [vmem:[#allocation5 + $0xb8] sm:$0xff] %vm3873_vm9, %v3824_v36 }
 0x53d   : > { %v3439_v57 = vpop.permute.xlu1 %3438 }
 0x53e   : > { %3511 = vst.msk [vmem:[#allocation5 + $0xc0] sm:$0xff] %vm3486_vm7, %v3439_v57  ;;  %v3248_v20 = vpop.permute.xlu0 %3247 }
 0x53f   : > { %3319 = vst.msk [vmem:[#allocation5 + $0xc8] sm:$0xff] %vm3293_vm6, %v3248_v20 }
 0x541   : > { %v3441_v30 = vpop.permute.xlu1 %3440  ;;  %v4121_v32 = vld [vmem:[#allocation5 + $0xb0] sm:$0xff] }
 0x542   : > { %3512 = vst.msk [vmem:[#allocation5 + $0xc8] sm:$0xff] %vm3486_vm7, %v3441_v30  ;;  %v4017_v45 = vpop.permute.xlu0 %4016  ;;  %4919 = vmatprep.mubr.msk.f32.mxu1 %vm4147_vm11, %v4121_v32 }
 0x543   : > { %4090 = vst.msk [vmem:[#allocation5 + $0xb8] sm:$0xff] %vm4066_vm10, %v4017_v45 }
 0x545   : > { %v3057_v0 = vpop.permute.xlu1 %3056 }
 0x546   : > { %3127 = vst.msk [vmem:[#allocation5 + $0xd0] sm:$0xff] %vm3100_vm5, %v3057_v0  ;;  %v3633_v37 = vpop.permute.xlu0 %3632 }
 0x547   : > { %3705 = vst.msk [vmem:[#allocation5 + $0xc0] sm:$0xff] %vm3680_vm8, %v3633_v37 }
 0x549   : > { %v3826_v50 = vpop.permute.xlu1 %3825 }
 0x54a   : > { %3898 = vst.msk [vmem:[#allocation5 + $0xc0] sm:$0xff] %vm3873_vm9, %v3826_v50  ;;  %v4891_v39 = vpop.f32.mrb[0].mxu1  ;;  %v3635_v47 = vpop.permute.xlu0 %3634  ;;  %v4122_v40 = vld [vmem:[#allocation5 + $0xb8] sm:$0xff] }
 0x54b   : > { %v4326_v55 = vadd.f32 %v4891_v39, %v7134_v52  ;;  %3706 = vst.msk [vmem:[#allocation5 + $0xc8] sm:$0xff] %vm3680_vm8, %v3635_v47  ;;  %v4320_v59 = vpop.f32.mrb[1].mxu1  ;;  %4920 = vmatmul.mubr.msk.f32.gmra.mrb[20].mxu1 %vm4147_vm11, %v4122_v40 }
 0x54c   : > { %v4321_v27 = vadd.f32 %v7134_v52, %v4320_v59 }
 0x54d   : > { %vm4472_vm14 = vcmp.ge.f32.partialorder %v4326_v55, 0.0  ;;  %v4504_v6 = vmul.f32 0.2, %v4326_v55  ;;  %v3250_v62 = vpop.permute.xlu1 %3249 }
 0x54e   : > { %vm4471_vm15 = vcmp.ge.f32.partialorder %v4321_v27, 0.0  ;;  %v4503_v5 = vmul.f32 0.2, %v4321_v27  ;;  %3320 = vst.msk [vmem:[#allocation5 + $0xd0] sm:$0xff] %vm3293_vm6, %v3250_v62  ;;  %v3059_v54 = vpop.permute.xlu0 %3058 }
 0x54f   : > { %v4536_v1 = vsel %vm4472_vm14, %v4326_v55, %v4504_v6  ;;  %3128 = vst.msk [vmem:[#allocation5 + $0xd8] sm:$0xff] %vm3100_vm5, %v3059_v54 }
 0x550   : > { %4568 = vst.msk [vmem:[%s7146_s29 + $0x18] sm:$0xff] %vm2411_vm13, %v4536_v1  ;;  %v4535_v4 = vsel %vm4471_vm15, %v4321_v27, %v4503_v5 }
 0x551   : > { %4567 = vst.msk [vmem:[%s7146_s29 + $0x10] sm:$0xff] %vm2411_vm13, %v4535_v4  ;;  %v4019_v7 = vpop.permute.xlu1 %4018 }
 0x552   : > { %4091 = vst.msk [vmem:[#allocation5 + $0xc0] sm:$0xff] %vm4066_vm10, %v4019_v7  ;;  %v3828_v23 = vpop.permute.xlu0 %3827 }
 0x553   : > { %3899 = vst.msk [vmem:[#allocation5 + $0xc8] sm:$0xff] %vm3873_vm9, %v3828_v23 }
 0x555   : > { %v3443_v3 = vpop.permute.xlu1 %3442 }
 0x556   : > { %3513 = vst.msk [vmem:[#allocation5 + $0xd0] sm:$0xff] %vm3486_vm7, %v3443_v3  ;;  %v3252_v2 = vpop.permute.xlu0 %3251 }
 0x557   : > { %3321 = vst.msk [vmem:[#allocation5 + $0xd8] sm:$0xff] %vm3293_vm6, %v3252_v2 }
 0x559   : > { %v3445_v56 = vpop.permute.xlu1 %3444  ;;  %v4123_v49 = vld [vmem:[#allocation5 + $0xc0] sm:$0xff] }
 0x55a   : > { %3514 = vst.msk [vmem:[#allocation5 + $0xd8] sm:$0xff] %vm3486_vm7, %v3445_v56  ;;  %v4021_v31 = vpop.permute.xlu0 %4020  ;;  %4922 = vmatprep.mubr.msk.f32.mxu1 %vm4147_vm11, %v4123_v49 }
 0x55b   : > { %4092 = vst.msk [vmem:[#allocation5 + $0xc8] sm:$0xff] %vm4066_vm10, %v4021_v31 }
 0x55d   : > { %v3061_v12 = vpop.permute.xlu1 %3060 }
 0x55e   : > { %3129 = vst.msk [vmem:[#allocation5 + $0xe0] sm:$0xff] %vm3100_vm5, %v3061_v12  ;;  %v3637_v29 = vpop.permute.xlu0 %3636  ;;  %v4894_v43 = vpop.f32.mrb[2].mxu1 }
 0x55f   : > { %3707 = vst.msk [vmem:[#allocation5 + $0xd0] sm:$0xff] %vm3680_vm8, %v3637_v29  ;;  %v4336_v10 = vadd.f32 %v4894_v43, %v7134_v52  ;;  %v4330_v26 = vpop.f32.mrb[3].mxu1 }
 0x560   : > { %v4331_v35 = vadd.f32 %v7134_v52, %v4330_v26 }
 0x561   : > { %vm4474_vm1 = vcmp.ge.f32.partialorder %v4336_v10, 0.0  ;;  %v4506_v8 = vmul.f32 0.2, %v4336_v10  ;;  %v3830_v44 = vpop.permute.xlu1 %3829 }
 0x562   : > { %vm4473_vm2 = vcmp.ge.f32.partialorder %v4331_v35, 0.0  ;;  %v4505_v63 = vmul.f32 0.2, %v4331_v35  ;;  %3900 = vst.msk [vmem:[#allocation5 + $0xd0] sm:$0xff] %vm3873_vm9, %v3830_v44  ;;  %v3639_v9 = vpop.permute.xlu0 %3638  ;;  %v4124_v61 = vld [vmem:[#allocation5 + $0xc8] sm:$0xff] }
 0x563   : > { %v4538_v41 = vsel %vm4474_vm1, %v4336_v10, %v4506_v8  ;;  %3708 = vst.msk [vmem:[#allocation5 + $0xd8] sm:$0xff] %vm3680_vm8, %v3639_v9  ;;  %4923 = vmatmul.mubr.msk.f32.gmra.mrb[22].mxu1 %vm4147_vm11, %v4124_v61 }
 0x564   : > { %4570 = vst.msk [vmem:[%s7146_s29 + $0x28] sm:$0xff] %vm2411_vm13, %v4538_v41  ;;  %v4537_v34 = vsel %vm4473_vm2, %v4331_v35, %v4505_v63 }
 0x565   : > { %4569 = vst.msk [vmem:[%s7146_s29 + $0x20] sm:$0xff] %vm2411_vm13, %v4537_v34  ;;  %v3254_v17 = vpop.permute.xlu1 %3253 }
 0x566   : > { %3322 = vst.msk [vmem:[#allocation5 + $0xe0] sm:$0xff] %vm3293_vm6, %v3254_v17  ;;  %v3063_v42 = vpop.permute.xlu0 %3062 }
 0x567   : > { %3130 = vst.msk [vmem:[#allocation5 + $0xe8] sm:$0xff] %vm3100_vm5, %v3063_v42 }
 0x569   : > { %v4023_v24 = vpop.permute.xlu1 %4022 }
 0x56a   : > { %4093 = vst.msk [vmem:[#allocation5 + $0xd0] sm:$0xff] %vm4066_vm10, %v4023_v24  ;;  %v3832_v60 = vpop.permute.xlu0 %3831 }
 0x56b   : > { %3901 = vst.msk [vmem:[#allocation5 + $0xd8] sm:$0xff] %vm3873_vm9, %v3832_v60 }
 0x56d   : > { %v3447_v22 = vpop.permute.xlu1 %3446 }
 0x56e   : > { %3515 = vst.msk [vmem:[#allocation5 + $0xe0] sm:$0xff] %vm3486_vm7, %v3447_v22  ;;  %v3256_v19 = vpop.permute.xlu0 %3255 }
 0x56f   : > { %3323 = vst.msk [vmem:[#allocation5 + $0xe8] sm:$0xff] %vm3293_vm6, %v3256_v19 }
 0x571   : > { %v3449_v53 = vpop.permute.xlu1 %3448  ;;  %v4125_v13 = vld [vmem:[#allocation5 + $0xd0] sm:$0xff] }
 0x572   : > { %3516 = vst.msk [vmem:[#allocation5 + $0xe8] sm:$0xff] %vm3486_vm7, %v3449_v53  ;;  %v4025_v28 = vpop.permute.xlu0 %4024  ;;  %v4897_v58 = vpop.f32.mrb[4].mxu1  ;;  %4925 = vmatprep.mubr.msk.f32.mxu1 %vm4147_vm11, %v4125_v13 }
 0x573   : > { %4094 = vst.msk [vmem:[#allocation5 + $0xd8] sm:$0xff] %vm4066_vm10, %v4025_v28  ;;  %v4346_v16 = vadd.f32 %v4897_v58, %v7134_v52  ;;  %v4340_v18 = vpop.f32.mrb[5].mxu1 }
 0x574   : > { %v4341_v11 = vadd.f32 %v7134_v52, %v4340_v18 }
 0x575   : > { %vm4476_vm3 = vcmp.ge.f32.partialorder %v4346_v16, 0.0  ;;  %v4508_v14 = vmul.f32 0.2, %v4346_v16  ;;  %v3065_v15 = vpop.permute.xlu1 %3064 }
 0x576   : > { %vm4475_vm12 = vcmp.ge.f32.partialorder %v4341_v11, 0.0  ;;  %v4507_v38 = vmul.f32 0.2, %v4341_v11  ;;  %3131 = vst.msk [vmem:[#allocation5 + $0xf0] sm:$0xff] %vm3100_vm5, %v3065_v15  ;;  %v3641_v48 = vpop.permute.xlu0 %3640 }
 0x577   : > { %v4540_v33 = vsel %vm4476_vm3, %v4346_v16, %v4508_v14  ;;  %3709 = vst.msk [vmem:[#allocation5 + $0xe0] sm:$0xff] %vm3680_vm8, %v3641_v48 }
 0x578   : > { %4572 = vst.msk [vmem:[%s7146_s29 + $0x38] sm:$0xff] %vm2411_vm13, %v4540_v33  ;;  %v4539_v51 = vsel %vm4475_vm12, %v4341_v11, %v4507_v38 }
 0x579   : > { %4571 = vst.msk [vmem:[%s7146_s29 + $0x30] sm:$0xff] %vm2411_vm13, %v4539_v51  ;;  %v3834_v25 = vpop.permute.xlu1 %3833 }
 0x57a   : > { %3902 = vst.msk [vmem:[#allocation5 + $0xe0] sm:$0xff] %vm3873_vm9, %v3834_v25  ;;  %v3643_v21 = vpop.permute.xlu0 %3642  ;;  %v4126_v46 = vld [vmem:[#allocation5 + $0xd8] sm:$0xff] }
 0x57b   : > { %3710 = vst.msk [vmem:[#allocation5 + $0xe8] sm:$0xff] %vm3680_vm8, %v3643_v21  ;;  %4926 = vmatmul.mubr.msk.f32.gmra.mrb[24].mxu1 %vm4147_vm11, %v4126_v46 }
 0x57d   : > { %v3198_v36 = vpop.permute.xlu1 %3197 }
 0x57e   : > { %3294 = vst.msk [vmem:[#allocation5] sm:$0xff] %vm3293_vm6, %v3198_v36  ;;  %v3067_v57 = vpop.permute.xlu0 %3066 }
 0x57f   : > { %3132 = vst.msk [vmem:[#allocation5 + $0xf8] sm:$0xff] %vm3100_vm5, %v3067_v57 }
 0x581   : > { %v3836_v20 = vpop.permute.xlu1 %3835 }
 0x582   : > { %3903 = vst.msk [vmem:[#allocation5 + $0xe8] sm:$0xff] %vm3873_vm9, %v3836_v20  ;;  %v3258_v30 = vpop.permute.xlu0 %3257 }
 0x583   : > { %3324 = vst.msk [vmem:[#allocation5 + $0xf0] sm:$0xff] %vm3293_vm6, %v3258_v30 }
 0x585   : > { %v3200_v32 = vpop.permute.xlu1 %3199 }
 0x586   : > { %3295 = vst.msk [vmem:[#allocation5 + $0x8] sm:$0xff] %vm3293_vm6, %v3200_v32  ;;  %v4027_v45 = vpop.permute.xlu0 %4026  ;;  %v4900_v0 = vpop.f32.mrb[6].mxu1 }
 0x587   : > { %4095 = vst.msk [vmem:[#allocation5 + $0xe0] sm:$0xff] %vm4066_vm10, %v4027_v45  ;;  %v4356_v37 = vadd.f32 %v4900_v0, %v7134_v52  ;;  %v4350_v50 = vpop.f32.mrb[7].mxu1 }
 0x588   : > { %v4351_v39 = vadd.f32 %v7134_v52, %v4350_v50 }
 0x589   : > { %vm4478_vm0 = vcmp.ge.f32.partialorder %v4356_v37, 0.0  ;;  %v4510_v47 = vmul.f32 0.2, %v4356_v37  ;;  %v3391_v40 = vpop.permute.xlu1 %3390 }
 0x58a   : > { %vm4477_vm4 = vcmp.ge.f32.partialorder %v4351_v39, 0.0  ;;  %v4509_v55 = vmul.f32 0.2, %v4351_v39  ;;  %3487 = vst.msk [vmem:[#allocation5] sm:$0xff] %vm3486_vm7, %v3391_v40  ;;  %v3260_v59 = vpop.permute.xlu0 %3259 }
 0x58b   : > { %v4542_v27 = vsel %vm4478_vm0, %v4356_v37, %v4510_v47  ;;  %3325 = vst.msk [vmem:[#allocation5 + $0xf8] sm:$0xff] %vm3293_vm6, %v3260_v59 }
 0x58c   : > { %4574 = vst.msk [vmem:[%s7146_s29 + $0x48] sm:$0xff] %vm2411_vm13, %v4542_v27  ;;  %v4541_v6 = vsel %vm4477_vm4, %v4351_v39, %v4509_v55 }
 0x58d   : > { %4573 = vst.msk [vmem:[%s7146_s29 + $0x40] sm:$0xff] %vm2411_vm13, %v4541_v6  ;;  %v4029_v62 = vpop.permute.xlu1 %4028 }
 0x58e   : > { %4096 = vst.msk [vmem:[#allocation5 + $0xe8] sm:$0xff] %vm4066_vm10, %v4029_v62  ;;  %v3451_v5 = vpop.permute.xlu0 %3450  ;;  %v4127_v54 = vld [vmem:[#allocation5 + $0xe0] sm:$0xff] }
 0x58f   : > { %3517 = vst.msk [vmem:[#allocation5 + $0xf0] sm:$0xff] %vm3486_vm7, %v3451_v5  ;;  %4928 = vmatprep.mubr.msk.f32.mxu1 %vm4147_vm11, %v4127_v54 }
 0x591   : > { %v3453_v1 = vpop.permute.xlu1 %3452 }
 0x592   : > { %3518 = vst.msk [vmem:[#allocation5 + $0xf8] sm:$0xff] %vm3486_vm7, %v3453_v1  ;;  %v3393_v4 = vpop.permute.xlu0 %3392 }
 0x593   : > { %3488 = vst.msk [vmem:[#allocation5 + $0x8] sm:$0xff] %vm3486_vm7, %v3393_v4 }
 0x595   : > { %v3645_v7 = vpop.permute.xlu1 %3644  ;;  %v4128_v23 = vld [vmem:[#allocation5 + $0xe8] sm:$0xff] }
 0x596   : > { %3711 = vst.msk [vmem:[#allocation5 + $0xf0] sm:$0xff] %vm3680_vm8, %v3645_v7  ;;  %v3585_v3 = vpop.permute.xlu0 %3584  ;;  %4929 = vmatmul.mubr.msk.f32.gmra.mrb[26].mxu1 %vm4147_vm11, %v4128_v23 }
 0x597   : > { %3681 = vst.msk [vmem:[#allocation5] sm:$0xff] %vm3680_vm8, %v3585_v3 }
 0x599   : > { %v3647_v2 = vpop.permute.xlu1 %3646 }
 0x59a   : > { %3712 = vst.msk [vmem:[#allocation5 + $0xf8] sm:$0xff] %vm3680_vm8, %v3647_v2  ;;  %v3587_v56 = vpop.permute.xlu0 %3586  ;;  %v4903_v49 = vpop.f32.mrb[8].mxu1 }
 0x59b   : > { %3682 = vst.msk [vmem:[#allocation5 + $0x8] sm:$0xff] %vm3680_vm8, %v3587_v56  ;;  %v4366_v31 = vadd.f32 %v4903_v49, %v7134_v52  ;;  %v4360_v12 = vpop.f32.mrb[9].mxu1 }
 0x59c   : > { %v4361_v29 = vadd.f32 %v7134_v52, %v4360_v12 }
 0x59d   : > { %vm4480_vm5 = vcmp.ge.f32.partialorder %v4366_v31, 0.0  ;;  %v4512_v43 = vmul.f32 0.2, %v4366_v31  ;;  %v3838_v10 = vpop.permute.xlu1 %3837 }
 0x59e   : > { %vm4479_vm6 = vcmp.ge.f32.partialorder %v4361_v29, 0.0  ;;  %v4511_v26 = vmul.f32 0.2, %v4361_v29  ;;  %3904 = vst.msk [vmem:[#allocation5 + $0xf0] sm:$0xff] %vm3873_vm9, %v3838_v10  ;;  %v3778_v35 = vpop.permute.xlu0 %3777 }
 0x59f   : > { %v4544_v8 = vsel %vm4480_vm5, %v4366_v31, %v4512_v43  ;;  %3874 = vst.msk [vmem:[#allocation5] sm:$0xff] %vm3873_vm9, %v3778_v35 }
 0x5a0   : > { %4576 = vst.msk [vmem:[%s7146_s29 + $0x58] sm:$0xff] %vm2411_vm13, %v4544_v8  ;;  %v4543_v44 = vsel %vm4479_vm6, %v4361_v29, %v4511_v26 }
 0x5a1   : > { %4575 = vst.msk [vmem:[%s7146_s29 + $0x50] sm:$0xff] %vm2411_vm13, %v4543_v44  ;;  %v3840_v63 = vpop.permute.xlu1 %3839 }
 0x5a2   : > { %3905 = vst.msk [vmem:[#allocation5 + $0xf8] sm:$0xff] %vm3873_vm9, %v3840_v63  ;;  %v3780_v9 = vpop.permute.xlu0 %3779 }
 0x5a3   : > { %3875 = vst.msk [vmem:[#allocation5 + $0x8] sm:$0xff] %vm3873_vm9, %v3780_v9 }
 0x5a5   : > { %v4031_v61 = vpop.permute.xlu1 %4030 }
 0x5a6   : > { %4097 = vst.msk [vmem:[#allocation5 + $0xf0] sm:$0xff] %vm4066_vm10, %v4031_v61  ;;  %v3971_v41 = vpop.permute.xlu0 %3970 }
 0x5a7   : > { %4067 = vst.msk [vmem:[#allocation5] sm:$0xff] %vm4066_vm10, %v3971_v41 }
 0x5a9   : > { %v4033_v34 = vpop.permute.xlu1 %4032 }
 0x5aa   : > { %4098 = vst.msk [vmem:[#allocation5 + $0xf8] sm:$0xff] %vm4066_vm10, %v4033_v34  ;;  %v3973_v17 = vpop.permute.xlu0 %3972 }
 0x5ab   : > { %4068 = vst.msk [vmem:[#allocation5 + $0x8] sm:$0xff] %vm4066_vm10, %v3973_v17 }
 0x5ad   : > { %v4129_v42 = vld [vmem:[#allocation5 + $0xf0] sm:$0xff] }
 0x5ae   : > { %v4906_v24 = vpop.f32.mrb[10].mxu1  ;;  %v4099_v60 = vld [vmem:[#allocation5] sm:$0xff]  ;;  %4931 = vmatprep.mubr.msk.f32.mxu1 %vm4147_vm11, %v4129_v42 }
 0x5af   : > { %v4376_v22 = vadd.f32 %v4906_v24, %v7134_v52  ;;  %4886 = vmatprep.mubr.msk.f32.mxu0 %vm4147_vm11, %v4099_v60  ;;  %v4370_v19 = vpop.f32.mrb[11].mxu1 }
 0x5b0   : > { %v4371_v53 = vadd.f32 %v7134_v52, %v4370_v19 }
 0x5b1   : > { %vm4482_vm7 = vcmp.ge.f32.partialorder %v4376_v22, 0.0  ;;  %v4514_v13 = vmul.f32 0.2, %v4376_v22  ;;  %v4130_v28 = vld [vmem:[#allocation5 + $0xf8] sm:$0xff] }
 0x5b2   : > { %vm4481_vm8 = vcmp.ge.f32.partialorder %v4371_v53, 0.0  ;;  %v4513_v58 = vmul.f32 0.2, %v4371_v53  ;;  %4932 = vmatmul.mubr.msk.f32.gmra.mrb[28].mxu1 %vm4147_vm11, %v4130_v28  ;;  %v4100_v16 = vld [vmem:[#allocation5 + $0x8] sm:$0xff] }
 0x5b3   : > { %v4546_v18 = vsel %vm4482_vm7, %v4376_v22, %v4514_v13  ;;  %4887 = vmatmul.mubr.msk.f32.vlgmr.msra.gmra.mrb[32].mxu0 %vm4147_vm11, %v4100_v16 }
 0x5b4   : > { %4578 = vst.msk [vmem:[%s7146_s29 + $0x68] sm:$0xff] %vm2411_vm13, %v4546_v18  ;;  %v4545_v11 = vsel %vm4481_vm8, %v4371_v53, %v4513_v58 }
 0x5b5   : > { %4577 = vst.msk [vmem:[%s7146_s29 + $0x60] sm:$0xff] %vm2411_vm13, %v4545_v11 }
 0x5c2   : > { %v4909_v14 = vpop.f32.mrb[12].mxu1 }
 0x5c3   : > { %v4386_v15 = vadd.f32 %v4909_v14, %v7134_v52  ;;  %v4380_v38 = vpop.f32.mrb[13].mxu1 }
 0x5c4   : > { %v4381_v48 = vadd.f32 %v7134_v52, %v4380_v38 }
 0x5c5   : > { %vm4484_vm9 = vcmp.ge.f32.partialorder %v4386_v15, 0.0  ;;  %v4516_v33 = vmul.f32 0.2, %v4386_v15 }
 0x5c6   : > { %vm4483_vm10 = vcmp.ge.f32.partialorder %v4381_v48, 0.0  ;;  %v4515_v51 = vmul.f32 0.2, %v4381_v48 }
 0x5c7   : > { %v4548_v25 = vsel %vm4484_vm9, %v4386_v15, %v4516_v33 }
 0x5c8   : > { %4580 = vst.msk [vmem:[%s7146_s29 + $0x78] sm:$0xff] %vm2411_vm13, %v4548_v25  ;;  %v4547_v21 = vsel %vm4483_vm10, %v4381_v48, %v4515_v51 }
 0x5c9   : > { %4579 = vst.msk [vmem:[%s7146_s29 + $0x70] sm:$0xff] %vm2411_vm13, %v4547_v21 }
 0x5d6   : > { %v4912_v46 = vpop.f32.mrb[14].mxu1 }
 0x5d7   : > { %v4396_v36 = vadd.f32 %v4912_v46, %v7134_v52  ;;  %v4390_v57 = vpop.f32.mrb[15].mxu1 }
 0x5d8   : > { %v4391_v20 = vadd.f32 %v7134_v52, %v4390_v57 }
 0x5d9   : > { %vm4486_vm11 = vcmp.ge.f32.partialorder %v4396_v36, 0.0  ;;  %v4518_v30 = vmul.f32 0.2, %v4396_v36 }
 0x5da   : > { %vm4485_vm14 = vcmp.ge.f32.partialorder %v4391_v20, 0.0  ;;  %v4517_v32 = vmul.f32 0.2, %v4391_v20 }
 0x5db   : > { %v4550_v45 = vsel %vm4486_vm11, %v4396_v36, %v4518_v30 }
 0x5dc   : > { %4582 = vst.msk [vmem:[%s7146_s29 + $0x88] sm:$0xff] %vm2411_vm13, %v4550_v45  ;;  %v4549_v0 = vsel %vm4485_vm14, %v4391_v20, %v4517_v32 }
 0x5dd   : > { %4581 = vst.msk [vmem:[%s7146_s29 + $0x80] sm:$0xff] %vm2411_vm13, %v4549_v0 }
 0x5ee   : > { %v4915_v37 = vpop.f32.mrb[16].mxu1 }
 0x5ef   : > { %v4406_v50 = vadd.f32 %v4915_v37, %v7134_v52  ;;  %v4400_v39 = vpop.f32.mrb[17].mxu1 }
 0x5f0   : > { %v4401_v47 = vadd.f32 %v7134_v52, %v4400_v39 }
 0x5f1   : > { %vm4488_vm15 = vcmp.ge.f32.partialorder %v4406_v50, 0.0  ;;  %v4520_v40 = vmul.f32 0.2, %v4406_v50 }
 0x5f2   : > { %vm4487_vm1 = vcmp.ge.f32.partialorder %v4401_v47, 0.0  ;;  %v4519_v55 = vmul.f32 0.2, %v4401_v47 }
 0x5f3   : > { %v4552_v59 = vsel %vm4488_vm15, %v4406_v50, %v4520_v40 }
 0x5f4   : > { %4584 = vst.msk [vmem:[%s7146_s29 + $0x98] sm:$0xff] %vm2411_vm13, %v4552_v59  ;;  %v4551_v27 = vsel %vm4487_vm1, %v4401_v47, %v4519_v55 }
 0x5f5   : > { %4583 = vst.msk [vmem:[%s7146_s29 + $0x90] sm:$0xff] %vm2411_vm13, %v4551_v27 }
 0x606   : > { %v4918_v6 = vpop.f32.mrb[18].mxu1 }
 0x607   : > { %v4416_v62 = vadd.f32 %v4918_v6, %v7134_v52  ;;  %v4410_v5 = vpop.f32.mrb[19].mxu1 }
 0x608   : > { %v4411_v54 = vadd.f32 %v7134_v52, %v4410_v5 }
 0x609   : > { %vm4490_vm2 = vcmp.ge.f32.partialorder %v4416_v62, 0.0  ;;  %v4522_v1 = vmul.f32 0.2, %v4416_v62 }
 0x60a   : > { %vm4489_vm3 = vcmp.ge.f32.partialorder %v4411_v54, 0.0  ;;  %v4521_v4 = vmul.f32 0.2, %v4411_v54 }
 0x60b   : > { %v4554_v7 = vsel %vm4490_vm2, %v4416_v62, %v4522_v1 }
 0x60c   : > { %4586 = vst.msk [vmem:[%s7146_s29 + $0xa8] sm:$0xff] %vm2411_vm13, %v4554_v7  ;;  %v4553_v23 = vsel %vm4489_vm3, %v4411_v54, %v4521_v4 }
 0x60d   : > { %4585 = vst.msk [vmem:[%s7146_s29 + $0xa0] sm:$0xff] %vm2411_vm13, %v4553_v23 }
 0x61e   : > { %v4921_v3 = vpop.f32.mrb[20].mxu1 }
 0x61f   : > { %v4426_v2 = vadd.f32 %v4921_v3, %v7134_v52  ;;  %v4420_v56 = vpop.f32.mrb[21].mxu1 }
 0x620   : > { %v4421_v49 = vadd.f32 %v7134_v52, %v4420_v56 }
 0x621   : > { %vm4492_vm12 = vcmp.ge.f32.partialorder %v4426_v2, 0.0  ;;  %v4524_v31 = vmul.f32 0.2, %v4426_v2 }
 0x622   : > { %vm4491_vm0 = vcmp.ge.f32.partialorder %v4421_v49, 0.0  ;;  %v4523_v12 = vmul.f32 0.2, %v4421_v49 }
 0x623   : > { %v4556_v29 = vsel %vm4492_vm12, %v4426_v2, %v4524_v31 }
 0x624   : > { %4588 = vst.msk [vmem:[%s7146_s29 + $0xb8] sm:$0xff] %vm2411_vm13, %v4556_v29  ;;  %v4555_v43 = vsel %vm4491_vm0, %v4421_v49, %v4523_v12 }
 0x625   : > { %4587 = vst.msk [vmem:[%s7146_s29 + $0xb0] sm:$0xff] %vm2411_vm13, %v4555_v43 }
 0x636   : > { %v4924_v10 = vpop.f32.mrb[22].mxu1 }
 0x637   : > { %v4436_v26 = vadd.f32 %v4924_v10, %v7134_v52  ;;  %v4430_v35 = vpop.f32.mrb[23].mxu1 }
 0x638   : > { %v4431_v8 = vadd.f32 %v7134_v52, %v4430_v35 }
 0x639   : > { %vm4494_vm4 = vcmp.ge.f32.partialorder %v4436_v26, 0.0  ;;  %v4526_v44 = vmul.f32 0.2, %v4436_v26 }
 0x63a   : > { %vm4493_vm5 = vcmp.ge.f32.partialorder %v4431_v8, 0.0  ;;  %v4525_v63 = vmul.f32 0.2, %v4431_v8 }
 0x63b   : > { %v4558_v9 = vsel %vm4494_vm4, %v4436_v26, %v4526_v44 }
 0x63c   : > { %4590 = vst.msk [vmem:[%s7146_s29 + $0xc8] sm:$0xff] %vm2411_vm13, %v4558_v9  ;;  %v4557_v61 = vsel %vm4493_vm5, %v4431_v8, %v4525_v63 }
 0x63d   : > { %4589 = vst.msk [vmem:[%s7146_s29 + $0xc0] sm:$0xff] %vm2411_vm13, %v4557_v61 }
 0x64e   : > { %v4927_v41 = vpop.f32.mrb[24].mxu1 }
 0x64f   : > { %v4446_v34 = vadd.f32 %v4927_v41, %v7134_v52  ;;  %v4440_v17 = vpop.f32.mrb[25].mxu1 }
 0x650   : > { %v4441_v42 = vadd.f32 %v7134_v52, %v4440_v17 }
 0x651   : > { %vm4496_vm6 = vcmp.ge.f32.partialorder %v4446_v34, 0.0  ;;  %v4528_v24 = vmul.f32 0.2, %v4446_v34 }
 0x652   : > { %vm4495_vm7 = vcmp.ge.f32.partialorder %v4441_v42, 0.0  ;;  %v4527_v60 = vmul.f32 0.2, %v4441_v42 }
 0x653   : > { %v4560_v22 = vsel %vm4496_vm6, %v4446_v34, %v4528_v24 }
 0x654   : > { %4592 = vst.msk [vmem:[%s7146_s29 + $0xd8] sm:$0xff] %vm2411_vm13, %v4560_v22  ;;  %v4559_v19 = vsel %vm4495_vm7, %v4441_v42, %v4527_v60 }
 0x655   : > { %4591 = vst.msk [vmem:[%s7146_s29 + $0xd0] sm:$0xff] %vm2411_vm13, %v4559_v19 }
 0x669   : > { %v4930_v53 = vpop.f32.mrb[26].mxu1 }
 0x66a   : > { %v4456_v13 = vadd.f32 %v4930_v53, %v7134_v52  ;;  %v4450_v28 = vpop.f32.mrb[27].mxu1 }
 0x66b   : > { %v4451_v58 = vadd.f32 %v7134_v52, %v4450_v28 }
 0x66c   : > { %vm4498_vm8 = vcmp.ge.f32.partialorder %v4456_v13, 0.0  ;;  %v4530_v16 = vmul.f32 0.2, %v4456_v13 }
 0x66d   : > { %vm4497_vm9 = vcmp.ge.f32.partialorder %v4451_v58, 0.0  ;;  %v4529_v18 = vmul.f32 0.2, %v4451_v58 }
 0x66e   : > { %v4562_v11 = vsel %vm4498_vm8, %v4456_v13, %v4530_v16 }
 0x66f   : > { %4594 = vst.msk [vmem:[%s7146_s29 + $0xe8] sm:$0xff] %vm2411_vm13, %v4562_v11  ;;  %v4561_v14 = vsel %vm4497_vm9, %v4451_v58, %v4529_v18 }
 0x670   : > { %4593 = vst.msk [vmem:[%s7146_s29 + $0xe0] sm:$0xff] %vm2411_vm13, %v4561_v14 }
 0x685   : > { %v4933_v15 = vpop.f32.mrb[28].mxu1 }
 0x686   : > { %v4466_v38 = vadd.f32 %v4933_v15, %v7134_v52  ;;  %v4888_v48 = vpop.f32.mrb[32].mxu0  ;;  %v4460_v33 = vpop.f32.mrb[29].mxu1 }
 0x687   : > { %v4316_v51 = vadd.f32 %v4888_v48, %v7134_v52  ;;  %v4461_v25 = vadd.f32 %v7134_v52, %v4460_v33  ;;  %v4310_v21 = vpop.f32.mrb[33].mxu0 }
 0x688   : > { %vm4500_vm10 = vcmp.ge.f32.partialorder %v4466_v38, 0.0  ;;  %v4532_v46 = vmul.f32 0.2, %v4466_v38  ;;  %v4311_v36 = vadd.f32 %v7134_v52, %v4310_v21 }
 0x689   : > { %vm4470_vm11 = vcmp.ge.f32.partialorder %v4316_v51, 0.0  ;;  %v4502_v57 = vmul.f32 0.2, %v4316_v51  ;;  %vm4499_vm14 = vcmp.ge.f32.partialorder %v4461_v25, 0.0  ;;  %v4531_v20 = vmul.f32 0.2, %v4461_v25 }
 0x68a   : > { %v4564_v30 = vsel %vm4500_vm10, %v4466_v38, %v4532_v46  ;;  %vm4469_vm15 = vcmp.ge.f32.partialorder %v4311_v36, 0.0  ;;  %v4501_v32 = vmul.f32 0.2, %v4311_v36 }
 0x68b   : > { %4596 = vst.msk [vmem:[%s7146_s29 + $0xf8] sm:$0xff] %vm2411_vm13, %v4564_v30  ;;  %v4534_v45 = vsel %vm4470_vm11, %v4316_v51, %v4502_v57  ;;  %v4563_v0 = vsel %vm4499_vm14, %v4461_v25, %v4531_v20 }
 0x68c   : > { %4566 = vst.msk [vmem:[%s7146_s29 + $0x8] sm:$0xff] %vm2411_vm13, %v4534_v45  ;;  %4595 = vst.msk [vmem:[%s7146_s29 + $0xf0] sm:$0xff] %vm2411_vm13, %v4563_v0  ;;  %v4533_v37 = vsel %vm4469_vm15, %v4311_v36, %v4501_v32 }
 0x68d   : > { %4565 = vst.msk [vmem:[%s7146_s29] sm:$0xff] %vm2411_vm13, %v4533_v37 }
 0x68e PF: > { %s15_s18 = sadd.s32 1, %s4996_s18  }
 0x68f   : > { %p12_p4 = scmp.ge.s32.totalorder %s15_s18, 4  }
 0x691   :  { %14 = sbr.rel (!%p12_p4) target bundleno = 1 (0x1), region = 76 }

</bundles_post_ra>
